<compile_context>
chip_gen: v7x
topology: tpu7x:2x2x1
jax: 0.10.0
libtpu: 0.0.40
codegen_flags: <defaults>
</compile_context>

<pallas_src>
import functools
import math

import jax
import jax.numpy as jnp
from jax.experimental import pallas as pl
from jax.experimental.pallas import tpu as pltpu

TWO_PI = 2.0 * math.pi
PI = math.pi
INV_2PI = 1.0 / TWO_PI

# bf16 tanh for the conditioner activations: halves work on the binding EUP
# slot on v6e/v7x (bf16 EUP).  Set False on v5e (no bf16 EUP -> casts only).
MLP_TANH_BF16 = True


def _round_up(x, m):
    return ((x + m - 1) // m) * m


def _ipow(x, n):
    """Integer power via repeated multiply (avoids transcendental pow)."""
    if n == 0:
        return jnp.ones_like(x)
    r = x
    for _ in range(n - 1):
        r = r * x
    return r


def _sigmoid(x):
    # one EUP tanh instead of exp + divide
    return 0.5 * (jnp.tanh(0.5 * x) + 1.0)


def make_flow_kernel(K, B, LAT, Npad, n_linear, n_mixture, weighted,
                     min_weight, ramp_pow):
    """Whole-flow kernel: all K hierarchical levels in one invocation."""
    M = n_mixture
    p = int(ramp_pow)
    N = B * LAT
    act_dtype = jnp.bfloat16 if MLP_TANH_BF16 else jnp.float32

    def row_sum(x):            # (M, Npad) -> (1, Npad), unrolled sublane adds
        r = x[0:1, :]
        for m in range(1, M):
            r = r + x[m:m + 1, :]
        return r

    def row_max(x):
        r = x[0:1, :]
        for m in range(1, M):
            r = jnp.maximum(r, x[m:m + 1, :])
        return r

    def kernel(*refs):
        phi0_ref, z_ref = refs[0], refs[1]
        w_refs = refs[2:2 + 2 * n_linear]
        phi_ref = refs[2 + 2 * n_linear]
        ldj_ref = refs[3 + 2 * n_linear]

        pos = jax.lax.broadcasted_iota(jnp.int32, (1, Npad), 1)
        in_range = pos < N

        buf = phi0_ref[...]                        # (1, Npad) running angles
        ldj = jnp.zeros((1, Npad), jnp.float32)    # per-site log|det J|

        for k in range(K):                         # static unroll over levels
            S = LAT >> k                           # final-position stride

            # --- neighbour angle = per-sample roll(phi, -1) -----------------
            if S == LAT:                           # level 0: neighbour == self
                nbr = buf
            else:
                r_fwd = pltpu.roll(buf, shift=Npad - S, axis=1)   # buf[n + S]
                r_wrap = pltpu.roll(buf, shift=LAT - S, axis=1)   # wrap lane
                wrap = (pos & (LAT - 1)) >= (LAT - S)
                nbr = jnp.where(wrap, r_wrap, r_fwd)

            # --- conditioner MLP on context = as_vector(phi - nbr) ----------
            dphi = buf - nbr
            c = jnp.cos(dphi)
            s = jnp.sin(dphi)
            W0 = w_refs[0][k]                      # (H0, 2)  f32 (VPU path)
            b0 = w_refs[1][k]                      # (H0, 1)  f32
            pre = W0[:, 0:1] * c + W0[:, 1:2] * s + b0            # (H0, Npad)
            if n_linear == 1:
                params = pre
            else:
                h = jnp.tanh(pre.astype(act_dtype))
                for li in range(1, n_linear - 1):
                    W = w_refs[2 * li][k]                          # bf16
                    bvec = w_refs[2 * li + 1][k]                   # f32
                    ph = jnp.dot(W, h.astype(jnp.bfloat16),
                                 preferred_element_type=jnp.float32) + bvec
                    h = jnp.tanh(ph.astype(act_dtype))
                Wf = w_refs[2 * (n_linear - 1)][k]                 # bf16
                bL = w_refs[2 * (n_linear - 1) + 1][k]             # f32
                params = jnp.dot(Wf, h.astype(jnp.bfloat16),
                                 preferred_element_type=jnp.float32) + bL

            # --- mixture-of-sigmoids circle transform (f32, feeds ldj) ------
            a = jnp.exp(jnp.clip(params[0:M, :], -8.0, 8.0))      # (M, Npad)
            bb = params[M:2 * M, :]
            if weighted:
                w_hat = params[2 * M:3 * M, :]
                w_hat = w_hat - row_max(w_hat)
                e = jnp.exp(w_hat)
                rho = e * pl.reciprocal(row_sum(e), approx=True)
                rho = min_weight + (1.0 - M * min_weight) * rho
            else:
                rho = jnp.full_like(a, 1.0 / M)

            zl = z_ref[k]                                         # (1, Npad)
            zmod = zl - TWO_PI * jnp.floor(zl * INV_2PI)
            u = jnp.clip(zmod * INV_2PI, 1e-6, 1.0 - 1e-6)
            v = 1.0 - u
            up = _ipow(u, p)
            vp = _ipow(v, p)
            den = up + vp
            inv_den = pl.reciprocal(den, approx=True)
            inv_den = inv_den * (2.0 - den * inv_den)   # Newton refine (VPU)
            r = up * inv_den                            # ramp(u)
            dr = float(p) * _ipow(u, p - 1) * _ipow(v, p - 1) * inv_den * inv_den

            t = a * (r - 0.5) + bb
            sg = _sigmoid(t)
            s0 = _sigmoid(bb - 0.5 * a)
            s1 = _sigmoid(bb + 0.5 * a)
            span = jnp.maximum(s1 - s0, 1e-12)
            inv_span = pl.reciprocal(span, approx=True)
            inv_span = inv_span * (2.0 - span * inv_span)   # Newton refine
            g = (sg - s0) * inv_span
            dgq = a * sg * (1.0 - sg) * inv_span

            F = row_sum(rho * g)                                  # (1, Npad)
            dF = jnp.maximum(dr * row_sum(rho * dgq), 1e-20)

            # --- alpha = mean_angle(phi, nbr); phi_x = mod_2pi(2*pi*F+alpha) -
            d = nbr - buf
            dw = (d + PI) - TWO_PI * jnp.floor((d + PI) * INV_2PI) - PI
            alpha = buf + 0.5 * dw
            phix = TWO_PI * F + alpha
            phix = phix - TWO_PI * jnp.floor(phix * INV_2PI)

            # --- scatter phi_x to positions p + S/2, accumulate ldj ----------
            src = ((pos & (S - 1)) == 0) & in_range
            dst = ((pos & (S - 1)) == (S // 2)) & in_range
            ldj = ldj + jnp.log(jnp.where(src, dF, 1.0))
            sc = pltpu.roll(phix, shift=S // 2, axis=1)  # dest q <- src q-S/2
            buf = jnp.where(dst, sc, buf)

        phi_ref[...] = buf
        ldj_ref[...] = ldj

    return kernel


def hierarchical_flow_forward(z, layer_params_list, cfg):
    """HierarchicalFlow.forward.  z: (B, lattice_size, 1) angles in [0, 2pi)."""
    B, LAT, _ = z.shape
    K = len(layer_params_list)
    assert LAT & (LAT - 1) == 0 and LAT == (1 << K)
    N = B * LAT
    Npad = max(128, _round_up(N, 128))

    z2 = z[:, :, 0]
    # running buffer in final-position order; initialise phi_0 = z[:, 0]
    buf0 = jnp.zeros((B, LAT), jnp.float32).at[:, 0].set(z2[:, 0])
    buf0 = jnp.pad(buf0.reshape(1, N), ((0, 0), (0, Npad - N)))

    # per-level z_x pre-scattered onto the level's source lattice positions
    zlv = jnp.zeros((K, B, LAT), jnp.float32)
    for k in range(K):
        L = 1 << k
        S = LAT >> k
        zlv = zlv.at[k, :, ::S].set(z2[:, L:2 * L])
    z_levels = jnp.pad(zlv.reshape(K, 1, N), ((0, 0), (0, 0), (0, Npad - N)))

    # stack per-level conditioner weights; MXU-fed matrices pre-cast to bf16
    n_linear = len(layer_params_list[0]) // 2
    stacked = []
    for i in range(2 * n_linear):
        arr = jnp.stack([lp[i] for lp in layer_params_list], axis=0)
        if i % 2 == 0 and i > 0:
            arr = arr.astype(jnp.bfloat16)
        stacked.append(arr)

    kernel = make_flow_kernel(K, B, LAT, Npad, n_linear, cfg["n_mixture"],
                              cfg["weighted"], float(cfg["min_weight"]),
                              int(cfg["ramp_pow"]))

    phi_flat, ldj_sites = pl.pallas_call(
        kernel,
        out_shape=(jax.ShapeDtypeStruct((1, Npad), jnp.float32),
                   jax.ShapeDtypeStruct((1, Npad), jnp.float32)),
    )(buf0, z_levels, *stacked)

    phi = phi_flat[0, :N].reshape(B, LAT)
    ldj = ldj_sites[0, :N].reshape(B, LAT).sum(axis=1)
    return phi[:, :, None], ldj


def reference_forward(z, layer_params_list, cfg):
    """Independent pure-JAX reference following the PyTorch control flow."""
    M = cfg["n_mixture"]
    weighted = cfg["weighted"]
    min_w = float(cfg["min_weight"])
    p = int(cfg["ramp_pow"])
    act_dtype = jnp.bfloat16 if MLP_TANH_BF16 else jnp.float32
    B = z.shape[0]
    phi = z[:, :1, 0]
    rest = z[:, 1:, 0]
    ldj_total = jnp.zeros((B,), jnp.float32)
    for lw in layer_params_list:
        L = phi.shape[1]
        zx, rest = rest[:, :L], rest[:, L:]
        nbr = jnp.roll(phi, -1, axis=1)
        dphi = phi - nbr
        c, s = jnp.cos(dphi), jnp.sin(dphi)
        n_linear = len(lw) // 2
        W0, b0 = lw[0], lw[1]
        pre = c[..., None] * W0[:, 0] + s[..., None] * W0[:, 1] + b0[:, 0]
        if n_linear == 1:
            params = pre
        else:
            h = jnp.tanh(pre.astype(act_dtype)).astype(jnp.float32)
            for li in range(1, n_linear - 1):
                W = lw[2 * li].astype(jnp.bfloat16).astype(jnp.float32)
                b = lw[2 * li + 1][:, 0]
                hq = h.astype(jnp.bfloat16).astype(jnp.float32)
                h = jnp.tanh((hq @ W.T + b).astype(act_dtype)).astype(jnp.float32)
            Wf = lw[2 * (n_linear - 1)].astype(jnp.bfloat16).astype(jnp.float32)
            bL = lw[2 * (n_linear - 1) + 1][:, 0]
            hq = h.astype(jnp.bfloat16).astype(jnp.float32)
            params = hq @ Wf.T + bL
        a = jnp.exp(jnp.clip(params[..., 0:M], -8.0, 8.0))
        bb = params[..., M:2 * M]
        if weighted:
            w_hat = params[..., 2 * M:3 * M]
            w_hat = w_hat - jnp.max(w_hat, axis=-1, keepdims=True)
            e = jnp.exp(w_hat)
            rho = e / jnp.sum(e, axis=-1, keepdims=True)
            rho = min_w + (1.0 - M * min_w) * rho
        else:
            rho = jnp.full_like(a, 1.0 / M)
        zmod = zx - TWO_PI * jnp.floor(zx * INV_2PI)
        u = jnp.clip(zmod * INV_2PI, 1e-6, 1.0 - 1e-6)[..., None]
        v = 1.0 - u
        up, vp = _ipow(u, p), _ipow(v, p)
        den = up + vp
        r = up / den
        dr = float(p) * _ipow(u, p - 1) * _ipow(v, p - 1) / (den * den)
        t = a * (r - 0.5) + bb
        sg = _sigmoid(t)
        s0 = _sigmoid(bb - 0.5 * a)
        s1 = _sigmoid(bb + 0.5 * a)
        span = jnp.maximum(s1 - s0, 1e-12)
        g = (sg - s0) / span
        dgq = a * sg * (1.0 - sg) / span
        F = jnp.sum(rho * g, axis=-1)
        dF = jnp.maximum(dr[..., 0] * jnp.sum(rho * dgq, axis=-1), 1e-20)
        d = nbr - phi
        dw = (d + PI) - TWO_PI * jnp.floor((d + PI) * INV_2PI) - PI
        alpha = phi + 0.5 * dw
        phix = TWO_PI * F + alpha
        phix = phix - TWO_PI * jnp.floor(phix * INV_2PI)
        ldj_total = ldj_total + jnp.sum(jnp.log(dF), axis=1)
        phi = jnp.stack([phi, phix], axis=-1).reshape(B, 2 * L)
    return phi[:, :, None], ldj_total


if __name__ == "__main__":
    # Module hyperparameters (small, consistent with __init__)
    lattice_size = 16            # power of two -> 4 hierarchical levels
    n_mixture = 4
    net_shape = [32, 32]
    weighted = True
    min_weight = 0.01
    ramp_pow = 2
    B = 2

    cfg = dict(n_mixture=n_mixture, weighted=weighted,
               min_weight=min_weight, ramp_pow=ramp_pow)

    n_layers = int(round(math.log2(lattice_size)))
    P = n_mixture * (3 if weighted else 2)
    dims = [2] + list(net_shape) + [P]

    # Deterministic parameter init (one conditioner MLP per hierarchical level)
    # Weights are stored (out_features, in_features), biases (out_features, 1).
    key = jax.random.PRNGKey(0)
    layer_params_list = []
    for _ in range(n_layers):
        lw = []
        for i in range(len(dims) - 1):
            key, kk = jax.random.split(key)
            W = jax.random.normal(kk, (dims[i + 1], dims[i]), jnp.float32)
            W = W / math.sqrt(dims[i])
            b = jnp.zeros((dims[i + 1], 1), jnp.float32)
            lw += [W, b]
        layer_params_list.append(lw)

    key, kz = jax.random.split(key)
    z = jax.random.uniform(kz, (B, lattice_size, 1), jnp.float32, 0.0, TWO_PI)

    fwd = jax.jit(functools.partial(hierarchical_flow_forward, cfg=cfg))
    phi, ldj = fwd(z, layer_params_list)
    jax.block_until_ready((phi, ldj))

    assert phi.shape == (B, lattice_size, 1)
    assert ldj.shape == (B,)
    assert bool(jnp.all(jnp.isfinite(phi))) and bool(jnp.all(jnp.isfinite(ldj)))

    # Validate the fused kernel against an independent pure-JAX reference that
    # follows the PyTorch control flow (per-level roll / interleave).  Loose
    # tolerances absorb bf16-tanh / approx-reciprocal noise while still
    # catching any structural (roll / scatter / mask) error.
    phi_ref, ldj_ref = reference_forward(z, layer_params_list, cfg)
    ang = jnp.abs(jnp.mod(phi[..., 0] - phi_ref[..., 0] + PI, TWO_PI) - PI)
    max_ang = float(jnp.max(ang))
    max_ldj = float(jnp.max(jnp.abs(ldj - ldj_ref)))
    assert max_ang < 0.5, f"phi mismatch vs reference: {max_ang}"
    assert max_ldj < 2.0 + 0.1 * float(jnp.max(jnp.abs(ldj_ref))), \
        f"ldj mismatch vs reference: {max_ldj}"
    print("KERNEL_OK")
</pallas_src>

<mosaic_0001>
module attributes {stable_mosaic.version = 11 : i64} {
  func.func @kernel(%arg0: memref<1x128xf32, #tpu.memory_space<vmem>>, %arg1: memref<4x1x128xf32, #tpu.memory_space<vmem>>, %arg2: memref<4x32x2xf32, #tpu.memory_space<vmem>>, %arg3: memref<4x32x1xf32, #tpu.memory_space<vmem>>, %arg4: memref<4x32x32xbf16, #tpu.memory_space<vmem>>, %arg5: memref<4x32x1xf32, #tpu.memory_space<vmem>>, %arg6: memref<4x12x32xbf16, #tpu.memory_space<vmem>>, %arg7: memref<4x12x1xf32, #tpu.memory_space<vmem>>, %arg8: memref<1x128xf32, #tpu.memory_space<vmem>>, %arg9: memref<1x128xf32, #tpu.memory_space<vmem>>) attributes {dimension_semantics = [], scalar_prefetch = 0 : i64, scratch_operands = 0 : i64, tpu.core_type = #tpu.core_type<tc>} {
    %0 = tpu.iota {dimensions = array<i32: 1>} : vector<1x128xi32>
    %c32_i32 = arith.constant 32 : i32
    %1 = vector.broadcast %c32_i32 : i32 to vector<1x128xi32>
    %2 = arith.cmpi slt, %0, %1 : vector<1x128xi32>
    %c0 = arith.constant 0 : index
    %c0_0 = arith.constant 0 : index
    %3 = vector.load %arg0[%c0, %c0_0] : memref<1x128xf32, #tpu.memory_space<vmem>>, vector<1x128xf32>
    %cst = arith.constant 0.000000e+00 : f32
    %4 = vector.broadcast %cst : f32 to vector<1x128xf32>
    %5 = arith.subf %3, %3 : vector<1x128xf32>
    %6 = math.cos %5 : vector<1x128xf32>
    %7 = math.sin %5 : vector<1x128xf32>
    %c0_1 = arith.constant 0 : index
    %c0_2 = arith.constant 0 : index
    %c0_3 = arith.constant 0 : index
    %8 = vector.load %arg2[%c0_1, %c0_2, %c0_3] : memref<4x32x2xf32, #tpu.memory_space<vmem>>, vector<1x32x2xf32>
    %9 = vector.shape_cast %8 : vector<1x32x2xf32> to vector<32x2xf32>
    %c0_4 = arith.constant 0 : index
    %c0_5 = arith.constant 0 : index
    %c0_6 = arith.constant 0 : index
    %10 = vector.load %arg3[%c0_4, %c0_5, %c0_6] : memref<4x32x1xf32, #tpu.memory_space<vmem>>, vector<1x32x1xf32>
    %11 = vector.shape_cast %10 : vector<1x32x1xf32> to vector<32x1xf32>
    %12 = vector.extract_strided_slice %9 {offsets = [0, 0], sizes = [32, 1], strides = [1, 1]} : vector<32x2xf32> to vector<32x1xf32>
    %13 = vector.broadcast %12 : vector<32x1xf32> to vector<32x128xf32>
    %14 = vector.broadcast %6 : vector<1x128xf32> to vector<32x128xf32>
    %15 = arith.mulf %13, %14 : vector<32x128xf32>
    %16 = vector.extract_strided_slice %9 {offsets = [0, 1], sizes = [32, 1], strides = [1, 1]} : vector<32x2xf32> to vector<32x1xf32>
    %17 = vector.broadcast %16 : vector<32x1xf32> to vector<32x128xf32>
    %18 = vector.broadcast %7 : vector<1x128xf32> to vector<32x128xf32>
    %19 = arith.mulf %17, %18 : vector<32x128xf32>
    %20 = arith.addf %15, %19 : vector<32x128xf32>
    %21 = vector.broadcast %11 : vector<32x1xf32> to vector<32x128xf32>
    %22 = arith.addf %20, %21 : vector<32x128xf32>
    %23 = arith.truncf %22 : vector<32x128xf32> to vector<32x128xbf16>
    %24 = math.tanh %23 : vector<32x128xbf16>
    %c0_7 = arith.constant 0 : index
    %c0_8 = arith.constant 0 : index
    %c0_9 = arith.constant 0 : index
    %25 = vector.load %arg4[%c0_7, %c0_8, %c0_9] : memref<4x32x32xbf16, #tpu.memory_space<vmem>>, vector<1x32x32xbf16>
    %26 = vector.shape_cast %25 : vector<1x32x32xbf16> to vector<32x32xbf16>
    %c0_10 = arith.constant 0 : index
    %c0_11 = arith.constant 0 : index
    %c0_12 = arith.constant 0 : index
    %27 = vector.load %arg5[%c0_10, %c0_11, %c0_12] : memref<4x32x1xf32, #tpu.memory_space<vmem>>, vector<1x32x1xf32>
    %28 = vector.shape_cast %27 : vector<1x32x1xf32> to vector<32x1xf32>
    %cst_13 = arith.constant dense<0.000000e+00> : vector<32x128xf32>
    %29 = tpu.matmul %26, %24, %cst_13 {dimension_numbers = #tpu.dot_dimension_numbers<[1], [0], [0], [1], [0, 0, 1, 1], [], []>} : vector<32x32xbf16>, vector<32x128xbf16>, vector<32x128xf32> -> vector<32x128xf32>
    %30 = vector.broadcast %28 : vector<32x1xf32> to vector<32x128xf32>
    %31 = arith.addf %29, %30 : vector<32x128xf32>
    %32 = arith.truncf %31 : vector<32x128xf32> to vector<32x128xbf16>
    %33 = math.tanh %32 : vector<32x128xbf16>
    %c0_14 = arith.constant 0 : index
    %c0_15 = arith.constant 0 : index
    %c0_16 = arith.constant 0 : index
    %34 = vector.load %arg6[%c0_14, %c0_15, %c0_16] : memref<4x12x32xbf16, #tpu.memory_space<vmem>>, vector<1x12x32xbf16>
    %35 = vector.shape_cast %34 : vector<1x12x32xbf16> to vector<12x32xbf16>
    %c0_17 = arith.constant 0 : index
    %c0_18 = arith.constant 0 : index
    %c0_19 = arith.constant 0 : index
    %36 = vector.load %arg7[%c0_17, %c0_18, %c0_19] : memref<4x12x1xf32, #tpu.memory_space<vmem>>, vector<1x12x1xf32>
    %37 = vector.shape_cast %36 : vector<1x12x1xf32> to vector<12x1xf32>
    %cst_20 = arith.constant dense<0.000000e+00> : vector<12x128xf32>
    %38 = tpu.matmul %35, %33, %cst_20 {dimension_numbers = #tpu.dot_dimension_numbers<[1], [0], [0], [1], [0, 0, 1, 1], [], []>} : vector<12x32xbf16>, vector<32x128xbf16>, vector<12x128xf32> -> vector<12x128xf32>
    %39 = vector.broadcast %37 : vector<12x1xf32> to vector<12x128xf32>
    %40 = arith.addf %38, %39 : vector<12x128xf32>
    %41 = vector.extract_strided_slice %40 {offsets = [0, 0], sizes = [4, 128], strides = [1, 1]} : vector<12x128xf32> to vector<4x128xf32>
    %cst_21 = arith.constant -8.000000e+00 : f32
    %cst_22 = arith.constant 8.000000e+00 : f32
    %42 = vector.broadcast %cst_21 : f32 to vector<4x128xf32>
    %43 = arith.maximumf %42, %41 : vector<4x128xf32>
    %44 = vector.broadcast %cst_22 : f32 to vector<4x128xf32>
    %45 = arith.minimumf %44, %43 : vector<4x128xf32>
    %46 = math.exp %45 : vector<4x128xf32>
    %47 = vector.extract_strided_slice %40 {offsets = [4, 0], sizes = [4, 128], strides = [1, 1]} : vector<12x128xf32> to vector<4x128xf32>
    %48 = vector.extract_strided_slice %40 {offsets = [8, 0], sizes = [4, 128], strides = [1, 1]} : vector<12x128xf32> to vector<4x128xf32>
    %49 = vector.extract_strided_slice %48 {offsets = [0, 0], sizes = [1, 128], strides = [1, 1]} : vector<4x128xf32> to vector<1x128xf32>
    %50 = vector.extract_strided_slice %48 {offsets = [1, 0], sizes = [1, 128], strides = [1, 1]} : vector<4x128xf32> to vector<1x128xf32>
    %51 = arith.maximumf %49, %50 : vector<1x128xf32>
    %52 = vector.extract_strided_slice %48 {offsets = [2, 0], sizes = [1, 128], strides = [1, 1]} : vector<4x128xf32> to vector<1x128xf32>
    %53 = arith.maximumf %51, %52 : vector<1x128xf32>
    %54 = vector.extract_strided_slice %48 {offsets = [3, 0], sizes = [1, 128], strides = [1, 1]} : vector<4x128xf32> to vector<1x128xf32>
    %55 = arith.maximumf %53, %54 : vector<1x128xf32>
    %56 = vector.broadcast %55 : vector<1x128xf32> to vector<4x128xf32>
    %57 = arith.subf %48, %56 : vector<4x128xf32>
    %58 = math.exp %57 : vector<4x128xf32>
    %59 = vector.extract_strided_slice %58 {offsets = [0, 0], sizes = [1, 128], strides = [1, 1]} : vector<4x128xf32> to vector<1x128xf32>
    %60 = vector.extract_strided_slice %58 {offsets = [1, 0], sizes = [1, 128], strides = [1, 1]} : vector<4x128xf32> to vector<1x128xf32>
    %61 = arith.addf %59, %60 : vector<1x128xf32>
    %62 = vector.extract_strided_slice %58 {offsets = [2, 0], sizes = [1, 128], strides = [1, 1]} : vector<4x128xf32> to vector<1x128xf32>
    %63 = arith.addf %61, %62 : vector<1x128xf32>
    %64 = vector.extract_strided_slice %58 {offsets = [3, 0], sizes = [1, 128], strides = [1, 1]} : vector<4x128xf32> to vector<1x128xf32>
    %65 = arith.addf %63, %64 : vector<1x128xf32>
    %66 = tpu.reciprocal %65 {approx = true} : vector<1x128xf32> -> vector<1x128xf32>
    %67 = vector.broadcast %66 : vector<1x128xf32> to vector<4x128xf32>
    %68 = arith.mulf %58, %67 : vector<4x128xf32>
    %cst_23 = arith.constant 0.959999978 : f32
    %69 = vector.broadcast %cst_23 : f32 to vector<4x128xf32>
    %70 = arith.mulf %69, %68 : vector<4x128xf32>
    %cst_24 = arith.constant 0.00999999977 : f32
    %71 = vector.broadcast %cst_24 : f32 to vector<4x128xf32>
    %72 = arith.addf %71, %70 : vector<4x128xf32>
    %c0_25 = arith.constant 0 : index
    %c0_26 = arith.constant 0 : index
    %c0_27 = arith.constant 0 : index
    %73 = vector.load %arg1[%c0_25, %c0_26, %c0_27] : memref<4x1x128xf32, #tpu.memory_space<vmem>>, vector<1x1x128xf32>
    %74 = vector.shape_cast %73 : vector<1x1x128xf32> to vector<1x128xf32>
    %cst_28 = arith.constant 0.159154937 : f32
    %75 = vector.broadcast %cst_28 : f32 to vector<1x128xf32>
    %76 = arith.mulf %74, %75 : vector<1x128xf32>
    %77 = math.floor %76 : vector<1x128xf32>
    %cst_29 = arith.constant 6.28318548 : f32
    %78 = vector.broadcast %cst_29 : f32 to vector<1x128xf32>
    %79 = arith.mulf %78, %77 : vector<1x128xf32>
    %80 = arith.subf %74, %79 : vector<1x128xf32>
    %cst_30 = arith.constant 0.159154937 : f32
    %81 = vector.broadcast %cst_30 : f32 to vector<1x128xf32>
    %82 = arith.mulf %80, %81 : vector<1x128xf32>
    %cst_31 = arith.constant 9.99999997E-7 : f32
    %cst_32 = arith.constant 0.999998986 : f32
    %83 = vector.broadcast %cst_31 : f32 to vector<1x128xf32>
    %84 = arith.maximumf %83, %82 : vector<1x128xf32>
    %85 = vector.broadcast %cst_32 : f32 to vector<1x128xf32>
    %86 = arith.minimumf %85, %84 : vector<1x128xf32>
    %cst_33 = arith.constant 1.000000e+00 : f32
    %87 = vector.broadcast %cst_33 : f32 to vector<1x128xf32>
    %88 = arith.subf %87, %86 : vector<1x128xf32>
    %89 = arith.mulf %86, %86 : vector<1x128xf32>
    %90 = arith.mulf %88, %88 : vector<1x128xf32>
    %91 = arith.addf %89, %90 : vector<1x128xf32>
    %92 = tpu.reciprocal %91 {approx = true} : vector<1x128xf32> -> vector<1x128xf32>
    %93 = arith.mulf %91, %92 : vector<1x128xf32>
    %cst_34 = arith.constant 2.000000e+00 : f32
    %94 = vector.broadcast %cst_34 : f32 to vector<1x128xf32>
    %95 = arith.subf %94, %93 : vector<1x128xf32>
    %96 = arith.mulf %92, %95 : vector<1x128xf32>
    %97 = arith.mulf %89, %96 : vector<1x128xf32>
    %cst_35 = arith.constant 2.000000e+00 : f32
    %98 = vector.broadcast %cst_35 : f32 to vector<1x128xf32>
    %99 = arith.mulf %98, %86 : vector<1x128xf32>
    %100 = arith.mulf %99, %88 : vector<1x128xf32>
    %101 = arith.mulf %100, %96 : vector<1x128xf32>
    %102 = arith.mulf %101, %96 : vector<1x128xf32>
    %cst_36 = arith.constant 5.000000e-01 : f32
    %103 = vector.broadcast %cst_36 : f32 to vector<1x128xf32>
    %104 = arith.subf %97, %103 : vector<1x128xf32>
    %105 = vector.broadcast %104 : vector<1x128xf32> to vector<4x128xf32>
    %106 = arith.mulf %46, %105 : vector<4x128xf32>
    %107 = arith.addf %106, %47 : vector<4x128xf32>
    %cst_37 = arith.constant 5.000000e-01 : f32
    %108 = vector.broadcast %cst_37 : f32 to vector<4x128xf32>
    %109 = arith.mulf %108, %107 : vector<4x128xf32>
    %110 = math.tanh %109 : vector<4x128xf32>
    %cst_38 = arith.constant 1.000000e+00 : f32
    %111 = vector.broadcast %cst_38 : f32 to vector<4x128xf32>
    %112 = arith.addf %110, %111 : vector<4x128xf32>
    %cst_39 = arith.constant 5.000000e-01 : f32
    %113 = vector.broadcast %cst_39 : f32 to vector<4x128xf32>
    %114 = arith.mulf %113, %112 : vector<4x128xf32>
    %cst_40 = arith.constant 5.000000e-01 : f32
    %115 = vector.broadcast %cst_40 : f32 to vector<4x128xf32>
    %116 = arith.mulf %115, %46 : vector<4x128xf32>
    %117 = arith.subf %47, %116 : vector<4x128xf32>
    %cst_41 = arith.constant 5.000000e-01 : f32
    %118 = vector.broadcast %cst_41 : f32 to vector<4x128xf32>
    %119 = arith.mulf %118, %117 : vector<4x128xf32>
    %120 = math.tanh %119 : vector<4x128xf32>
    %cst_42 = arith.constant 1.000000e+00 : f32
    %121 = vector.broadcast %cst_42 : f32 to vector<4x128xf32>
    %122 = arith.addf %120, %121 : vector<4x128xf32>
    %cst_43 = arith.constant 5.000000e-01 : f32
    %123 = vector.broadcast %cst_43 : f32 to vector<4x128xf32>
    %124 = arith.mulf %123, %122 : vector<4x128xf32>
    %cst_44 = arith.constant 5.000000e-01 : f32
    %125 = vector.broadcast %cst_44 : f32 to vector<4x128xf32>
    %126 = arith.mulf %125, %46 : vector<4x128xf32>
    %127 = arith.addf %47, %126 : vector<4x128xf32>
    %cst_45 = arith.constant 5.000000e-01 : f32
    %128 = vector.broadcast %cst_45 : f32 to vector<4x128xf32>
    %129 = arith.mulf %128, %127 : vector<4x128xf32>
    %130 = math.tanh %129 : vector<4x128xf32>
    %cst_46 = arith.constant 1.000000e+00 : f32
    %131 = vector.broadcast %cst_46 : f32 to vector<4x128xf32>
    %132 = arith.addf %130, %131 : vector<4x128xf32>
    %cst_47 = arith.constant 5.000000e-01 : f32
    %133 = vector.broadcast %cst_47 : f32 to vector<4x128xf32>
    %134 = arith.mulf %133, %132 : vector<4x128xf32>
    %135 = arith.subf %134, %124 : vector<4x128xf32>
    %cst_48 = arith.constant 9.99999996E-13 : f32
    %136 = vector.broadcast %cst_48 : f32 to vector<4x128xf32>
    %137 = arith.maximumf %135, %136 : vector<4x128xf32>
    %138 = tpu.reciprocal %137 {approx = true} : vector<4x128xf32> -> vector<4x128xf32>
    %139 = arith.mulf %137, %138 : vector<4x128xf32>
    %cst_49 = arith.constant 2.000000e+00 : f32
    %140 = vector.broadcast %cst_49 : f32 to vector<4x128xf32>
    %141 = arith.subf %140, %139 : vector<4x128xf32>
    %142 = arith.mulf %138, %141 : vector<4x128xf32>
    %143 = arith.subf %114, %124 : vector<4x128xf32>
    %144 = arith.mulf %143, %142 : vector<4x128xf32>
    %145 = arith.mulf %46, %114 : vector<4x128xf32>
    %cst_50 = arith.constant 1.000000e+00 : f32
    %146 = vector.broadcast %cst_50 : f32 to vector<4x128xf32>
    %147 = arith.subf %146, %114 : vector<4x128xf32>
    %148 = arith.mulf %145, %147 : vector<4x128xf32>
    %149 = arith.mulf %148, %142 : vector<4x128xf32>
    %150 = arith.mulf %72, %144 : vector<4x128xf32>
    %151 = vector.extract_strided_slice %150 {offsets = [0, 0], sizes = [1, 128], strides = [1, 1]} : vector<4x128xf32> to vector<1x128xf32>
    %152 = vector.extract_strided_slice %150 {offsets = [1, 0], sizes = [1, 128], strides = [1, 1]} : vector<4x128xf32> to vector<1x128xf32>
    %153 = arith.addf %151, %152 : vector<1x128xf32>
    %154 = vector.extract_strided_slice %150 {offsets = [2, 0], sizes = [1, 128], strides = [1, 1]} : vector<4x128xf32> to vector<1x128xf32>
    %155 = arith.addf %153, %154 : vector<1x128xf32>
    %156 = vector.extract_strided_slice %150 {offsets = [3, 0], sizes = [1, 128], strides = [1, 1]} : vector<4x128xf32> to vector<1x128xf32>
    %157 = arith.addf %155, %156 : vector<1x128xf32>
    %158 = arith.mulf %72, %149 : vector<4x128xf32>
    %159 = vector.extract_strided_slice %158 {offsets = [0, 0], sizes = [1, 128], strides = [1, 1]} : vector<4x128xf32> to vector<1x128xf32>
    %160 = vector.extract_strided_slice %158 {offsets = [1, 0], sizes = [1, 128], strides = [1, 1]} : vector<4x128xf32> to vector<1x128xf32>
    %161 = arith.addf %159, %160 : vector<1x128xf32>
    %162 = vector.extract_strided_slice %158 {offsets = [2, 0], sizes = [1, 128], strides = [1, 1]} : vector<4x128xf32> to vector<1x128xf32>
    %163 = arith.addf %161, %162 : vector<1x128xf32>
    %164 = vector.extract_strided_slice %158 {offsets = [3, 0], sizes = [1, 128], strides = [1, 1]} : vector<4x128xf32> to vector<1x128xf32>
    %165 = arith.addf %163, %164 : vector<1x128xf32>
    %166 = arith.mulf %102, %165 : vector<1x128xf32>
    %cst_51 = arith.constant 9.99999968E-21 : f32
    %167 = vector.broadcast %cst_51 : f32 to vector<1x128xf32>
    %168 = arith.maximumf %166, %167 : vector<1x128xf32>
    %169 = arith.subf %3, %3 : vector<1x128xf32>
    %cst_52 = arith.constant 3.14159274 : f32
    %170 = vector.broadcast %cst_52 : f32 to vector<1x128xf32>
    %171 = arith.addf %169, %170 : vector<1x128xf32>
    %cst_53 = arith.constant 3.14159274 : f32
    %172 = vector.broadcast %cst_53 : f32 to vector<1x128xf32>
    %173 = arith.addf %169, %172 : vector<1x128xf32>
    %cst_54 = arith.constant 0.159154937 : f32
    %174 = vector.broadcast %cst_54 : f32 to vector<1x128xf32>
    %175 = arith.mulf %173, %174 : vector<1x128xf32>
    %176 = math.floor %175 : vector<1x128xf32>
    %cst_55 = arith.constant 6.28318548 : f32
    %177 = vector.broadcast %cst_55 : f32 to vector<1x128xf32>
    %178 = arith.mulf %177, %176 : vector<1x128xf32>
    %179 = arith.subf %171, %178 : vector<1x128xf32>
    %cst_56 = arith.constant 3.14159274 : f32
    %180 = vector.broadcast %cst_56 : f32 to vector<1x128xf32>
    %181 = arith.subf %179, %180 : vector<1x128xf32>
    %cst_57 = arith.constant 5.000000e-01 : f32
    %182 = vector.broadcast %cst_57 : f32 to vector<1x128xf32>
    %183 = arith.mulf %182, %181 : vector<1x128xf32>
    %184 = arith.addf %3, %183 : vector<1x128xf32>
    %cst_58 = arith.constant 6.28318548 : f32
    %185 = vector.broadcast %cst_58 : f32 to vector<1x128xf32>
    %186 = arith.mulf %185, %157 : vector<1x128xf32>
    %187 = arith.addf %186, %184 : vector<1x128xf32>
    %cst_59 = arith.constant 0.159154937 : f32
    %188 = vector.broadcast %cst_59 : f32 to vector<1x128xf32>
    %189 = arith.mulf %187, %188 : vector<1x128xf32>
    %190 = math.floor %189 : vector<1x128xf32>
    %cst_60 = arith.constant 6.28318548 : f32
    %191 = vector.broadcast %cst_60 : f32 to vector<1x128xf32>
    %192 = arith.mulf %191, %190 : vector<1x128xf32>
    %193 = arith.subf %187, %192 : vector<1x128xf32>
    %c15_i32 = arith.constant 15 : i32
    %194 = vector.broadcast %c15_i32 : i32 to vector<1x128xi32>
    %195 = arith.andi %0, %194 : vector<1x128xi32>
    %c0_i32 = arith.constant 0 : i32
    %196 = vector.broadcast %c0_i32 : i32 to vector<1x128xi32>
    %197 = arith.cmpi eq, %195, %196 : vector<1x128xi32>
    %198 = arith.andi %197, %2 : vector<1x128xi1>
    %c15_i32_61 = arith.constant 15 : i32
    %199 = vector.broadcast %c15_i32_61 : i32 to vector<1x128xi32>
    %200 = arith.andi %0, %199 : vector<1x128xi32>
    %c8_i32 = arith.constant 8 : i32
    %201 = vector.broadcast %c8_i32 : i32 to vector<1x128xi32>
    %202 = arith.cmpi eq, %200, %201 : vector<1x128xi32>
    %203 = arith.andi %202, %2 : vector<1x128xi1>
    %cst_62 = arith.constant 1.000000e+00 : f32
    %204 = vector.broadcast %cst_62 : f32 to vector<1x128xf32>
    %205 = arith.select %198, %168, %204 : vector<1x128xi1>, vector<1x128xf32>
    %206 = math.log %205 : vector<1x128xf32>
    %207 = arith.addf %4, %206 : vector<1x128xf32>
    %c8_i32_63 = arith.constant 8 : i32
    %208 = tpu.dynamic_rotate %193 by %c8_i32_63 dim 1 : vector<1x128xf32>, i32 -> vector<1x128xf32>
    %209 = arith.select %203, %208, %3 : vector<1x128xi1>, vector<1x128xf32>
    %c120_i32 = arith.constant 120 : i32
    %210 = tpu.dynamic_rotate %209 by %c120_i32 dim 1 : vector<1x128xf32>, i32 -> vector<1x128xf32>
    %c8_i32_64 = arith.constant 8 : i32
    %211 = tpu.dynamic_rotate %209 by %c8_i32_64 dim 1 : vector<1x128xf32>, i32 -> vector<1x128xf32>
    %c15_i32_65 = arith.constant 15 : i32
    %212 = vector.broadcast %c15_i32_65 : i32 to vector<1x128xi32>
    %213 = arith.andi %0, %212 : vector<1x128xi32>
    %c8_i32_66 = arith.constant 8 : i32
    %214 = vector.broadcast %c8_i32_66 : i32 to vector<1x128xi32>
    %215 = arith.cmpi sge, %213, %214 : vector<1x128xi32>
    %216 = arith.select %215, %211, %210 : vector<1x128xi1>, vector<1x128xf32>
    %217 = arith.subf %209, %216 : vector<1x128xf32>
    %218 = math.cos %217 : vector<1x128xf32>
    %219 = math.sin %217 : vector<1x128xf32>
    %c1 = arith.constant 1 : index
    %c0_67 = arith.constant 0 : index
    %c0_68 = arith.constant 0 : index
    %220 = vector.load %arg2[%c1, %c0_67, %c0_68] : memref<4x32x2xf32, #tpu.memory_space<vmem>>, vector<1x32x2xf32>
    %221 = vector.shape_cast %220 : vector<1x32x2xf32> to vector<32x2xf32>
    %c1_69 = arith.constant 1 : index
    %c0_70 = arith.constant 0 : index
    %c0_71 = arith.constant 0 : index
    %222 = vector.load %arg3[%c1_69, %c0_70, %c0_71] : memref<4x32x1xf32, #tpu.memory_space<vmem>>, vector<1x32x1xf32>
    %223 = vector.shape_cast %222 : vector<1x32x1xf32> to vector<32x1xf32>
    %224 = vector.extract_strided_slice %221 {offsets = [0, 0], sizes = [32, 1], strides = [1, 1]} : vector<32x2xf32> to vector<32x1xf32>
    %225 = vector.broadcast %224 : vector<32x1xf32> to vector<32x128xf32>
    %226 = vector.broadcast %218 : vector<1x128xf32> to vector<32x128xf32>
    %227 = arith.mulf %225, %226 : vector<32x128xf32>
    %228 = vector.extract_strided_slice %221 {offsets = [0, 1], sizes = [32, 1], strides = [1, 1]} : vector<32x2xf32> to vector<32x1xf32>
    %229 = vector.broadcast %228 : vector<32x1xf32> to vector<32x128xf32>
    %230 = vector.broadcast %219 : vector<1x128xf32> to vector<32x128xf32>
    %231 = arith.mulf %229, %230 : vector<32x128xf32>
    %232 = arith.addf %227, %231 : vector<32x128xf32>
    %233 = vector.broadcast %223 : vector<32x1xf32> to vector<32x128xf32>
    %234 = arith.addf %232, %233 : vector<32x128xf32>
    %235 = arith.truncf %234 : vector<32x128xf32> to vector<32x128xbf16>
    %236 = math.tanh %235 : vector<32x128xbf16>
    %c1_72 = arith.constant 1 : index
    %c0_73 = arith.constant 0 : index
    %c0_74 = arith.constant 0 : index
    %237 = vector.load %arg4[%c1_72, %c0_73, %c0_74] : memref<4x32x32xbf16, #tpu.memory_space<vmem>>, vector<1x32x32xbf16>
    %238 = vector.shape_cast %237 : vector<1x32x32xbf16> to vector<32x32xbf16>
    %c1_75 = arith.constant 1 : index
    %c0_76 = arith.constant 0 : index
    %c0_77 = arith.constant 0 : index
    %239 = vector.load %arg5[%c1_75, %c0_76, %c0_77] : memref<4x32x1xf32, #tpu.memory_space<vmem>>, vector<1x32x1xf32>
    %240 = vector.shape_cast %239 : vector<1x32x1xf32> to vector<32x1xf32>
    %cst_78 = arith.constant dense<0.000000e+00> : vector<32x128xf32>
    %241 = tpu.matmul %238, %236, %cst_78 {dimension_numbers = #tpu.dot_dimension_numbers<[1], [0], [0], [1], [0, 0, 1, 1], [], []>} : vector<32x32xbf16>, vector<32x128xbf16>, vector<32x128xf32> -> vector<32x128xf32>
    %242 = vector.broadcast %240 : vector<32x1xf32> to vector<32x128xf32>
    %243 = arith.addf %241, %242 : vector<32x128xf32>
    %244 = arith.truncf %243 : vector<32x128xf32> to vector<32x128xbf16>
    %245 = math.tanh %244 : vector<32x128xbf16>
    %c1_79 = arith.constant 1 : index
    %c0_80 = arith.constant 0 : index
    %c0_81 = arith.constant 0 : index
    %246 = vector.load %arg6[%c1_79, %c0_80, %c0_81] : memref<4x12x32xbf16, #tpu.memory_space<vmem>>, vector<1x12x32xbf16>
    %247 = vector.shape_cast %246 : vector<1x12x32xbf16> to vector<12x32xbf16>
    %c1_82 = arith.constant 1 : index
    %c0_83 = arith.constant 0 : index
    %c0_84 = arith.constant 0 : index
    %248 = vector.load %arg7[%c1_82, %c0_83, %c0_84] : memref<4x12x1xf32, #tpu.memory_space<vmem>>, vector<1x12x1xf32>
    %249 = vector.shape_cast %248 : vector<1x12x1xf32> to vector<12x1xf32>
    %cst_85 = arith.constant dense<0.000000e+00> : vector<12x128xf32>
    %250 = tpu.matmul %247, %245, %cst_85 {dimension_numbers = #tpu.dot_dimension_numbers<[1], [0], [0], [1], [0, 0, 1, 1], [], []>} : vector<12x32xbf16>, vector<32x128xbf16>, vector<12x128xf32> -> vector<12x128xf32>
    %251 = vector.broadcast %249 : vector<12x1xf32> to vector<12x128xf32>
    %252 = arith.addf %250, %251 : vector<12x128xf32>
    %253 = vector.extract_strided_slice %252 {offsets = [0, 0], sizes = [4, 128], strides = [1, 1]} : vector<12x128xf32> to vector<4x128xf32>
    %cst_86 = arith.constant -8.000000e+00 : f32
    %cst_87 = arith.constant 8.000000e+00 : f32
    %254 = vector.broadcast %cst_86 : f32 to vector<4x128xf32>
    %255 = arith.maximumf %254, %253 : vector<4x128xf32>
    %256 = vector.broadcast %cst_87 : f32 to vector<4x128xf32>
    %257 = arith.minimumf %256, %255 : vector<4x128xf32>
    %258 = math.exp %257 : vector<4x128xf32>
    %259 = vector.extract_strided_slice %252 {offsets = [4, 0], sizes = [4, 128], strides = [1, 1]} : vector<12x128xf32> to vector<4x128xf32>
    %260 = vector.extract_strided_slice %252 {offsets = [8, 0], sizes = [4, 128], strides = [1, 1]} : vector<12x128xf32> to vector<4x128xf32>
    %261 = vector.extract_strided_slice %260 {offsets = [0, 0], sizes = [1, 128], strides = [1, 1]} : vector<4x128xf32> to vector<1x128xf32>
    %262 = vector.extract_strided_slice %260 {offsets = [1, 0], sizes = [1, 128], strides = [1, 1]} : vector<4x128xf32> to vector<1x128xf32>
    %263 = arith.maximumf %261, %262 : vector<1x128xf32>
    %264 = vector.extract_strided_slice %260 {offsets = [2, 0], sizes = [1, 128], strides = [1, 1]} : vector<4x128xf32> to vector<1x128xf32>
    %265 = arith.maximumf %263, %264 : vector<1x128xf32>
    %266 = vector.extract_strided_slice %260 {offsets = [3, 0], sizes = [1, 128], strides = [1, 1]} : vector<4x128xf32> to vector<1x128xf32>
    %267 = arith.maximumf %265, %266 : vector<1x128xf32>
    %268 = vector.broadcast %267 : vector<1x128xf32> to vector<4x128xf32>
    %269 = arith.subf %260, %268 : vector<4x128xf32>
    %270 = math.exp %269 : vector<4x128xf32>
    %271 = vector.extract_strided_slice %270 {offsets = [0, 0], sizes = [1, 128], strides = [1, 1]} : vector<4x128xf32> to vector<1x128xf32>
    %272 = vector.extract_strided_slice %270 {offsets = [1, 0], sizes = [1, 128], strides = [1, 1]} : vector<4x128xf32> to vector<1x128xf32>
    %273 = arith.addf %271, %272 : vector<1x128xf32>
    %274 = vector.extract_strided_slice %270 {offsets = [2, 0], sizes = [1, 128], strides = [1, 1]} : vector<4x128xf32> to vector<1x128xf32>
    %275 = arith.addf %273, %274 : vector<1x128xf32>
    %276 = vector.extract_strided_slice %270 {offsets = [3, 0], sizes = [1, 128], strides = [1, 1]} : vector<4x128xf32> to vector<1x128xf32>
    %277 = arith.addf %275, %276 : vector<1x128xf32>
    %278 = tpu.reciprocal %277 {approx = true} : vector<1x128xf32> -> vector<1x128xf32>
    %279 = vector.broadcast %278 : vector<1x128xf32> to vector<4x128xf32>
    %280 = arith.mulf %270, %279 : vector<4x128xf32>
    %cst_88 = arith.constant 0.959999978 : f32
    %281 = vector.broadcast %cst_88 : f32 to vector<4x128xf32>
    %282 = arith.mulf %281, %280 : vector<4x128xf32>
    %cst_89 = arith.constant 0.00999999977 : f32
    %283 = vector.broadcast %cst_89 : f32 to vector<4x128xf32>
    %284 = arith.addf %283, %282 : vector<4x128xf32>
    %c1_90 = arith.constant 1 : index
    %c0_91 = arith.constant 0 : index
    %c0_92 = arith.constant 0 : index
    %285 = vector.load %arg1[%c1_90, %c0_91, %c0_92] : memref<4x1x128xf32, #tpu.memory_space<vmem>>, vector<1x1x128xf32>
    %286 = vector.shape_cast %285 : vector<1x1x128xf32> to vector<1x128xf32>
    %cst_93 = arith.constant 0.159154937 : f32
    %287 = vector.broadcast %cst_93 : f32 to vector<1x128xf32>
    %288 = arith.mulf %286, %287 : vector<1x128xf32>
    %289 = math.floor %288 : vector<1x128xf32>
    %cst_94 = arith.constant 6.28318548 : f32
    %290 = vector.broadcast %cst_94 : f32 to vector<1x128xf32>
    %291 = arith.mulf %290, %289 : vector<1x128xf32>
    %292 = arith.subf %286, %291 : vector<1x128xf32>
    %cst_95 = arith.constant 0.159154937 : f32
    %293 = vector.broadcast %cst_95 : f32 to vector<1x128xf32>
    %294 = arith.mulf %292, %293 : vector<1x128xf32>
    %cst_96 = arith.constant 9.99999997E-7 : f32
    %cst_97 = arith.constant 0.999998986 : f32
    %295 = vector.broadcast %cst_96 : f32 to vector<1x128xf32>
    %296 = arith.maximumf %295, %294 : vector<1x128xf32>
    %297 = vector.broadcast %cst_97 : f32 to vector<1x128xf32>
    %298 = arith.minimumf %297, %296 : vector<1x128xf32>
    %cst_98 = arith.constant 1.000000e+00 : f32
    %299 = vector.broadcast %cst_98 : f32 to vector<1x128xf32>
    %300 = arith.subf %299, %298 : vector<1x128xf32>
    %301 = arith.mulf %298, %298 : vector<1x128xf32>
    %302 = arith.mulf %300, %300 : vector<1x128xf32>
    %303 = arith.addf %301, %302 : vector<1x128xf32>
    %304 = tpu.reciprocal %303 {approx = true} : vector<1x128xf32> -> vector<1x128xf32>
    %305 = arith.mulf %303, %304 : vector<1x128xf32>
    %cst_99 = arith.constant 2.000000e+00 : f32
    %306 = vector.broadcast %cst_99 : f32 to vector<1x128xf32>
    %307 = arith.subf %306, %305 : vector<1x128xf32>
    %308 = arith.mulf %304, %307 : vector<1x128xf32>
    %309 = arith.mulf %301, %308 : vector<1x128xf32>
    %cst_100 = arith.constant 2.000000e+00 : f32
    %310 = vector.broadcast %cst_100 : f32 to vector<1x128xf32>
    %311 = arith.mulf %310, %298 : vector<1x128xf32>
    %312 = arith.mulf %311, %300 : vector<1x128xf32>
    %313 = arith.mulf %312, %308 : vector<1x128xf32>
    %314 = arith.mulf %313, %308 : vector<1x128xf32>
    %cst_101 = arith.constant 5.000000e-01 : f32
    %315 = vector.broadcast %cst_101 : f32 to vector<1x128xf32>
    %316 = arith.subf %309, %315 : vector<1x128xf32>
    %317 = vector.broadcast %316 : vector<1x128xf32> to vector<4x128xf32>
    %318 = arith.mulf %258, %317 : vector<4x128xf32>
    %319 = arith.addf %318, %259 : vector<4x128xf32>
    %cst_102 = arith.constant 5.000000e-01 : f32
    %320 = vector.broadcast %cst_102 : f32 to vector<4x128xf32>
    %321 = arith.mulf %320, %319 : vector<4x128xf32>
    %322 = math.tanh %321 : vector<4x128xf32>
    %cst_103 = arith.constant 1.000000e+00 : f32
    %323 = vector.broadcast %cst_103 : f32 to vector<4x128xf32>
    %324 = arith.addf %322, %323 : vector<4x128xf32>
    %cst_104 = arith.constant 5.000000e-01 : f32
    %325 = vector.broadcast %cst_104 : f32 to vector<4x128xf32>
    %326 = arith.mulf %325, %324 : vector<4x128xf32>
    %cst_105 = arith.constant 5.000000e-01 : f32
    %327 = vector.broadcast %cst_105 : f32 to vector<4x128xf32>
    %328 = arith.mulf %327, %258 : vector<4x128xf32>
    %329 = arith.subf %259, %328 : vector<4x128xf32>
    %cst_106 = arith.constant 5.000000e-01 : f32
    %330 = vector.broadcast %cst_106 : f32 to vector<4x128xf32>
    %331 = arith.mulf %330, %329 : vector<4x128xf32>
    %332 = math.tanh %331 : vector<4x128xf32>
    %cst_107 = arith.constant 1.000000e+00 : f32
    %333 = vector.broadcast %cst_107 : f32 to vector<4x128xf32>
    %334 = arith.addf %332, %333 : vector<4x128xf32>
    %cst_108 = arith.constant 5.000000e-01 : f32
    %335 = vector.broadcast %cst_108 : f32 to vector<4x128xf32>
    %336 = arith.mulf %335, %334 : vector<4x128xf32>
    %cst_109 = arith.constant 5.000000e-01 : f32
    %337 = vector.broadcast %cst_109 : f32 to vector<4x128xf32>
    %338 = arith.mulf %337, %258 : vector<4x128xf32>
    %339 = arith.addf %259, %338 : vector<4x128xf32>
    %cst_110 = arith.constant 5.000000e-01 : f32
    %340 = vector.broadcast %cst_110 : f32 to vector<4x128xf32>
    %341 = arith.mulf %340, %339 : vector<4x128xf32>
    %342 = math.tanh %341 : vector<4x128xf32>
    %cst_111 = arith.constant 1.000000e+00 : f32
    %343 = vector.broadcast %cst_111 : f32 to vector<4x128xf32>
    %344 = arith.addf %342, %343 : vector<4x128xf32>
    %cst_112 = arith.constant 5.000000e-01 : f32
    %345 = vector.broadcast %cst_112 : f32 to vector<4x128xf32>
    %346 = arith.mulf %345, %344 : vector<4x128xf32>
    %347 = arith.subf %346, %336 : vector<4x128xf32>
    %cst_113 = arith.constant 9.99999996E-13 : f32
    %348 = vector.broadcast %cst_113 : f32 to vector<4x128xf32>
    %349 = arith.maximumf %347, %348 : vector<4x128xf32>
    %350 = tpu.reciprocal %349 {approx = true} : vector<4x128xf32> -> vector<4x128xf32>
    %351 = arith.mulf %349, %350 : vector<4x128xf32>
    %cst_114 = arith.constant 2.000000e+00 : f32
    %352 = vector.broadcast %cst_114 : f32 to vector<4x128xf32>
    %353 = arith.subf %352, %351 : vector<4x128xf32>
    %354 = arith.mulf %350, %353 : vector<4x128xf32>
    %355 = arith.subf %326, %336 : vector<4x128xf32>
    %356 = arith.mulf %355, %354 : vector<4x128xf32>
    %357 = arith.mulf %258, %326 : vector<4x128xf32>
    %cst_115 = arith.constant 1.000000e+00 : f32
    %358 = vector.broadcast %cst_115 : f32 to vector<4x128xf32>
    %359 = arith.subf %358, %326 : vector<4x128xf32>
    %360 = arith.mulf %357, %359 : vector<4x128xf32>
    %361 = arith.mulf %360, %354 : vector<4x128xf32>
    %362 = arith.mulf %284, %356 : vector<4x128xf32>
    %363 = vector.extract_strided_slice %362 {offsets = [0, 0], sizes = [1, 128], strides = [1, 1]} : vector<4x128xf32> to vector<1x128xf32>
    %364 = vector.extract_strided_slice %362 {offsets = [1, 0], sizes = [1, 128], strides = [1, 1]} : vector<4x128xf32> to vector<1x128xf32>
    %365 = arith.addf %363, %364 : vector<1x128xf32>
    %366 = vector.extract_strided_slice %362 {offsets = [2, 0], sizes = [1, 128], strides = [1, 1]} : vector<4x128xf32> to vector<1x128xf32>
    %367 = arith.addf %365, %366 : vector<1x128xf32>
    %368 = vector.extract_strided_slice %362 {offsets = [3, 0], sizes = [1, 128], strides = [1, 1]} : vector<4x128xf32> to vector<1x128xf32>
    %369 = arith.addf %367, %368 : vector<1x128xf32>
    %370 = arith.mulf %284, %361 : vector<4x128xf32>
    %371 = vector.extract_strided_slice %370 {offsets = [0, 0], sizes = [1, 128], strides = [1, 1]} : vector<4x128xf32> to vector<1x128xf32>
    %372 = vector.extract_strided_slice %370 {offsets = [1, 0], sizes = [1, 128], strides = [1, 1]} : vector<4x128xf32> to vector<1x128xf32>
    %373 = arith.addf %371, %372 : vector<1x128xf32>
    %374 = vector.extract_strided_slice %370 {offsets = [2, 0], sizes = [1, 128], strides = [1, 1]} : vector<4x128xf32> to vector<1x128xf32>
    %375 = arith.addf %373, %374 : vector<1x128xf32>
    %376 = vector.extract_strided_slice %370 {offsets = [3, 0], sizes = [1, 128], strides = [1, 1]} : vector<4x128xf32> to vector<1x128xf32>
    %377 = arith.addf %375, %376 : vector<1x128xf32>
    %378 = arith.mulf %314, %377 : vector<1x128xf32>
    %cst_116 = arith.constant 9.99999968E-21 : f32
    %379 = vector.broadcast %cst_116 : f32 to vector<1x128xf32>
    %380 = arith.maximumf %378, %379 : vector<1x128xf32>
    %381 = arith.subf %216, %209 : vector<1x128xf32>
    %cst_117 = arith.constant 3.14159274 : f32
    %382 = vector.broadcast %cst_117 : f32 to vector<1x128xf32>
    %383 = arith.addf %381, %382 : vector<1x128xf32>
    %cst_118 = arith.constant 3.14159274 : f32
    %384 = vector.broadcast %cst_118 : f32 to vector<1x128xf32>
    %385 = arith.addf %381, %384 : vector<1x128xf32>
    %cst_119 = arith.constant 0.159154937 : f32
    %386 = vector.broadcast %cst_119 : f32 to vector<1x128xf32>
    %387 = arith.mulf %385, %386 : vector<1x128xf32>
    %388 = math.floor %387 : vector<1x128xf32>
    %cst_120 = arith.constant 6.28318548 : f32
    %389 = vector.broadcast %cst_120 : f32 to vector<1x128xf32>
    %390 = arith.mulf %389, %388 : vector<1x128xf32>
    %391 = arith.subf %383, %390 : vector<1x128xf32>
    %cst_121 = arith.constant 3.14159274 : f32
    %392 = vector.broadcast %cst_121 : f32 to vector<1x128xf32>
    %393 = arith.subf %391, %392 : vector<1x128xf32>
    %cst_122 = arith.constant 5.000000e-01 : f32
    %394 = vector.broadcast %cst_122 : f32 to vector<1x128xf32>
    %395 = arith.mulf %394, %393 : vector<1x128xf32>
    %396 = arith.addf %209, %395 : vector<1x128xf32>
    %cst_123 = arith.constant 6.28318548 : f32
    %397 = vector.broadcast %cst_123 : f32 to vector<1x128xf32>
    %398 = arith.mulf %397, %369 : vector<1x128xf32>
    %399 = arith.addf %398, %396 : vector<1x128xf32>
    %cst_124 = arith.constant 0.159154937 : f32
    %400 = vector.broadcast %cst_124 : f32 to vector<1x128xf32>
    %401 = arith.mulf %399, %400 : vector<1x128xf32>
    %402 = math.floor %401 : vector<1x128xf32>
    %cst_125 = arith.constant 6.28318548 : f32
    %403 = vector.broadcast %cst_125 : f32 to vector<1x128xf32>
    %404 = arith.mulf %403, %402 : vector<1x128xf32>
    %405 = arith.subf %399, %404 : vector<1x128xf32>
    %c7_i32 = arith.constant 7 : i32
    %406 = vector.broadcast %c7_i32 : i32 to vector<1x128xi32>
    %407 = arith.andi %0, %406 : vector<1x128xi32>
    %c0_i32_126 = arith.constant 0 : i32
    %408 = vector.broadcast %c0_i32_126 : i32 to vector<1x128xi32>
    %409 = arith.cmpi eq, %407, %408 : vector<1x128xi32>
    %410 = arith.andi %409, %2 : vector<1x128xi1>
    %c7_i32_127 = arith.constant 7 : i32
    %411 = vector.broadcast %c7_i32_127 : i32 to vector<1x128xi32>
    %412 = arith.andi %0, %411 : vector<1x128xi32>
    %c4_i32 = arith.constant 4 : i32
    %413 = vector.broadcast %c4_i32 : i32 to vector<1x128xi32>
    %414 = arith.cmpi eq, %412, %413 : vector<1x128xi32>
    %415 = arith.andi %414, %2 : vector<1x128xi1>
    %cst_128 = arith.constant 1.000000e+00 : f32
    %416 = vector.broadcast %cst_128 : f32 to vector<1x128xf32>
    %417 = arith.select %410, %380, %416 : vector<1x128xi1>, vector<1x128xf32>
    %418 = math.log %417 : vector<1x128xf32>
    %419 = arith.addf %207, %418 : vector<1x128xf32>
    %c4_i32_129 = arith.constant 4 : i32
    %420 = tpu.dynamic_rotate %405 by %c4_i32_129 dim 1 : vector<1x128xf32>, i32 -> vector<1x128xf32>
    %421 = arith.select %415, %420, %209 : vector<1x128xi1>, vector<1x128xf32>
    %c124_i32 = arith.constant 124 : i32
    %422 = tpu.dynamic_rotate %421 by %c124_i32 dim 1 : vector<1x128xf32>, i32 -> vector<1x128xf32>
    %c12_i32 = arith.constant 12 : i32
    %423 = tpu.dynamic_rotate %421 by %c12_i32 dim 1 : vector<1x128xf32>, i32 -> vector<1x128xf32>
    %c15_i32_130 = arith.constant 15 : i32
    %424 = vector.broadcast %c15_i32_130 : i32 to vector<1x128xi32>
    %425 = arith.andi %0, %424 : vector<1x128xi32>
    %c12_i32_131 = arith.constant 12 : i32
    %426 = vector.broadcast %c12_i32_131 : i32 to vector<1x128xi32>
    %427 = arith.cmpi sge, %425, %426 : vector<1x128xi32>
    %428 = arith.select %427, %423, %422 : vector<1x128xi1>, vector<1x128xf32>
    %429 = arith.subf %421, %428 : vector<1x128xf32>
    %430 = math.cos %429 : vector<1x128xf32>
    %431 = math.sin %429 : vector<1x128xf32>
    %c2 = arith.constant 2 : index
    %c0_132 = arith.constant 0 : index
    %c0_133 = arith.constant 0 : index
    %432 = vector.load %arg2[%c2, %c0_132, %c0_133] : memref<4x32x2xf32, #tpu.memory_space<vmem>>, vector<1x32x2xf32>
    %433 = vector.shape_cast %432 : vector<1x32x2xf32> to vector<32x2xf32>
    %c2_134 = arith.constant 2 : index
    %c0_135 = arith.constant 0 : index
    %c0_136 = arith.constant 0 : index
    %434 = vector.load %arg3[%c2_134, %c0_135, %c0_136] : memref<4x32x1xf32, #tpu.memory_space<vmem>>, vector<1x32x1xf32>
    %435 = vector.shape_cast %434 : vector<1x32x1xf32> to vector<32x1xf32>
    %436 = vector.extract_strided_slice %433 {offsets = [0, 0], sizes = [32, 1], strides = [1, 1]} : vector<32x2xf32> to vector<32x1xf32>
    %437 = vector.broadcast %436 : vector<32x1xf32> to vector<32x128xf32>
    %438 = vector.broadcast %430 : vector<1x128xf32> to vector<32x128xf32>
    %439 = arith.mulf %437, %438 : vector<32x128xf32>
    %440 = vector.extract_strided_slice %433 {offsets = [0, 1], sizes = [32, 1], strides = [1, 1]} : vector<32x2xf32> to vector<32x1xf32>
    %441 = vector.broadcast %440 : vector<32x1xf32> to vector<32x128xf32>
    %442 = vector.broadcast %431 : vector<1x128xf32> to vector<32x128xf32>
    %443 = arith.mulf %441, %442 : vector<32x128xf32>
    %444 = arith.addf %439, %443 : vector<32x128xf32>
    %445 = vector.broadcast %435 : vector<32x1xf32> to vector<32x128xf32>
    %446 = arith.addf %444, %445 : vector<32x128xf32>
    %447 = arith.truncf %446 : vector<32x128xf32> to vector<32x128xbf16>
    %448 = math.tanh %447 : vector<32x128xbf16>
    %c2_137 = arith.constant 2 : index
    %c0_138 = arith.constant 0 : index
    %c0_139 = arith.constant 0 : index
    %449 = vector.load %arg4[%c2_137, %c0_138, %c0_139] : memref<4x32x32xbf16, #tpu.memory_space<vmem>>, vector<1x32x32xbf16>
    %450 = vector.shape_cast %449 : vector<1x32x32xbf16> to vector<32x32xbf16>
    %c2_140 = arith.constant 2 : index
    %c0_141 = arith.constant 0 : index
    %c0_142 = arith.constant 0 : index
    %451 = vector.load %arg5[%c2_140, %c0_141, %c0_142] : memref<4x32x1xf32, #tpu.memory_space<vmem>>, vector<1x32x1xf32>
    %452 = vector.shape_cast %451 : vector<1x32x1xf32> to vector<32x1xf32>
    %cst_143 = arith.constant dense<0.000000e+00> : vector<32x128xf32>
    %453 = tpu.matmul %450, %448, %cst_143 {dimension_numbers = #tpu.dot_dimension_numbers<[1], [0], [0], [1], [0, 0, 1, 1], [], []>} : vector<32x32xbf16>, vector<32x128xbf16>, vector<32x128xf32> -> vector<32x128xf32>
    %454 = vector.broadcast %452 : vector<32x1xf32> to vector<32x128xf32>
    %455 = arith.addf %453, %454 : vector<32x128xf32>
    %456 = arith.truncf %455 : vector<32x128xf32> to vector<32x128xbf16>
    %457 = math.tanh %456 : vector<32x128xbf16>
    %c2_144 = arith.constant 2 : index
    %c0_145 = arith.constant 0 : index
    %c0_146 = arith.constant 0 : index
    %458 = vector.load %arg6[%c2_144, %c0_145, %c0_146] : memref<4x12x32xbf16, #tpu.memory_space<vmem>>, vector<1x12x32xbf16>
    %459 = vector.shape_cast %458 : vector<1x12x32xbf16> to vector<12x32xbf16>
    %c2_147 = arith.constant 2 : index
    %c0_148 = arith.constant 0 : index
    %c0_149 = arith.constant 0 : index
    %460 = vector.load %arg7[%c2_147, %c0_148, %c0_149] : memref<4x12x1xf32, #tpu.memory_space<vmem>>, vector<1x12x1xf32>
    %461 = vector.shape_cast %460 : vector<1x12x1xf32> to vector<12x1xf32>
    %cst_150 = arith.constant dense<0.000000e+00> : vector<12x128xf32>
    %462 = tpu.matmul %459, %457, %cst_150 {dimension_numbers = #tpu.dot_dimension_numbers<[1], [0], [0], [1], [0, 0, 1, 1], [], []>} : vector<12x32xbf16>, vector<32x128xbf16>, vector<12x128xf32> -> vector<12x128xf32>
    %463 = vector.broadcast %461 : vector<12x1xf32> to vector<12x128xf32>
    %464 = arith.addf %462, %463 : vector<12x128xf32>
    %465 = vector.extract_strided_slice %464 {offsets = [0, 0], sizes = [4, 128], strides = [1, 1]} : vector<12x128xf32> to vector<4x128xf32>
    %cst_151 = arith.constant -8.000000e+00 : f32
    %cst_152 = arith.constant 8.000000e+00 : f32
    %466 = vector.broadcast %cst_151 : f32 to vector<4x128xf32>
    %467 = arith.maximumf %466, %465 : vector<4x128xf32>
    %468 = vector.broadcast %cst_152 : f32 to vector<4x128xf32>
    %469 = arith.minimumf %468, %467 : vector<4x128xf32>
    %470 = math.exp %469 : vector<4x128xf32>
    %471 = vector.extract_strided_slice %464 {offsets = [4, 0], sizes = [4, 128], strides = [1, 1]} : vector<12x128xf32> to vector<4x128xf32>
    %472 = vector.extract_strided_slice %464 {offsets = [8, 0], sizes = [4, 128], strides = [1, 1]} : vector<12x128xf32> to vector<4x128xf32>
    %473 = vector.extract_strided_slice %472 {offsets = [0, 0], sizes = [1, 128], strides = [1, 1]} : vector<4x128xf32> to vector<1x128xf32>
    %474 = vector.extract_strided_slice %472 {offsets = [1, 0], sizes = [1, 128], strides = [1, 1]} : vector<4x128xf32> to vector<1x128xf32>
    %475 = arith.maximumf %473, %474 : vector<1x128xf32>
    %476 = vector.extract_strided_slice %472 {offsets = [2, 0], sizes = [1, 128], strides = [1, 1]} : vector<4x128xf32> to vector<1x128xf32>
    %477 = arith.maximumf %475, %476 : vector<1x128xf32>
    %478 = vector.extract_strided_slice %472 {offsets = [3, 0], sizes = [1, 128], strides = [1, 1]} : vector<4x128xf32> to vector<1x128xf32>
    %479 = arith.maximumf %477, %478 : vector<1x128xf32>
    %480 = vector.broadcast %479 : vector<1x128xf32> to vector<4x128xf32>
    %481 = arith.subf %472, %480 : vector<4x128xf32>
    %482 = math.exp %481 : vector<4x128xf32>
    %483 = vector.extract_strided_slice %482 {offsets = [0, 0], sizes = [1, 128], strides = [1, 1]} : vector<4x128xf32> to vector<1x128xf32>
    %484 = vector.extract_strided_slice %482 {offsets = [1, 0], sizes = [1, 128], strides = [1, 1]} : vector<4x128xf32> to vector<1x128xf32>
    %485 = arith.addf %483, %484 : vector<1x128xf32>
    %486 = vector.extract_strided_slice %482 {offsets = [2, 0], sizes = [1, 128], strides = [1, 1]} : vector<4x128xf32> to vector<1x128xf32>
    %487 = arith.addf %485, %486 : vector<1x128xf32>
    %488 = vector.extract_strided_slice %482 {offsets = [3, 0], sizes = [1, 128], strides = [1, 1]} : vector<4x128xf32> to vector<1x128xf32>
    %489 = arith.addf %487, %488 : vector<1x128xf32>
    %490 = tpu.reciprocal %489 {approx = true} : vector<1x128xf32> -> vector<1x128xf32>
    %491 = vector.broadcast %490 : vector<1x128xf32> to vector<4x128xf32>
    %492 = arith.mulf %482, %491 : vector<4x128xf32>
    %cst_153 = arith.constant 0.959999978 : f32
    %493 = vector.broadcast %cst_153 : f32 to vector<4x128xf32>
    %494 = arith.mulf %493, %492 : vector<4x128xf32>
    %cst_154 = arith.constant 0.00999999977 : f32
    %495 = vector.broadcast %cst_154 : f32 to vector<4x128xf32>
    %496 = arith.addf %495, %494 : vector<4x128xf32>
    %c2_155 = arith.constant 2 : index
    %c0_156 = arith.constant 0 : index
    %c0_157 = arith.constant 0 : index
    %497 = vector.load %arg1[%c2_155, %c0_156, %c0_157] : memref<4x1x128xf32, #tpu.memory_space<vmem>>, vector<1x1x128xf32>
    %498 = vector.shape_cast %497 : vector<1x1x128xf32> to vector<1x128xf32>
    %cst_158 = arith.constant 0.159154937 : f32
    %499 = vector.broadcast %cst_158 : f32 to vector<1x128xf32>
    %500 = arith.mulf %498, %499 : vector<1x128xf32>
    %501 = math.floor %500 : vector<1x128xf32>
    %cst_159 = arith.constant 6.28318548 : f32
    %502 = vector.broadcast %cst_159 : f32 to vector<1x128xf32>
    %503 = arith.mulf %502, %501 : vector<1x128xf32>
    %504 = arith.subf %498, %503 : vector<1x128xf32>
    %cst_160 = arith.constant 0.159154937 : f32
    %505 = vector.broadcast %cst_160 : f32 to vector<1x128xf32>
    %506 = arith.mulf %504, %505 : vector<1x128xf32>
    %cst_161 = arith.constant 9.99999997E-7 : f32
    %cst_162 = arith.constant 0.999998986 : f32
    %507 = vector.broadcast %cst_161 : f32 to vector<1x128xf32>
    %508 = arith.maximumf %507, %506 : vector<1x128xf32>
    %509 = vector.broadcast %cst_162 : f32 to vector<1x128xf32>
    %510 = arith.minimumf %509, %508 : vector<1x128xf32>
    %cst_163 = arith.constant 1.000000e+00 : f32
    %511 = vector.broadcast %cst_163 : f32 to vector<1x128xf32>
    %512 = arith.subf %511, %510 : vector<1x128xf32>
    %513 = arith.mulf %510, %510 : vector<1x128xf32>
    %514 = arith.mulf %512, %512 : vector<1x128xf32>
    %515 = arith.addf %513, %514 : vector<1x128xf32>
    %516 = tpu.reciprocal %515 {approx = true} : vector<1x128xf32> -> vector<1x128xf32>
    %517 = arith.mulf %515, %516 : vector<1x128xf32>
    %cst_164 = arith.constant 2.000000e+00 : f32
    %518 = vector.broadcast %cst_164 : f32 to vector<1x128xf32>
    %519 = arith.subf %518, %517 : vector<1x128xf32>
    %520 = arith.mulf %516, %519 : vector<1x128xf32>
    %521 = arith.mulf %513, %520 : vector<1x128xf32>
    %cst_165 = arith.constant 2.000000e+00 : f32
    %522 = vector.broadcast %cst_165 : f32 to vector<1x128xf32>
    %523 = arith.mulf %522, %510 : vector<1x128xf32>
    %524 = arith.mulf %523, %512 : vector<1x128xf32>
    %525 = arith.mulf %524, %520 : vector<1x128xf32>
    %526 = arith.mulf %525, %520 : vector<1x128xf32>
    %cst_166 = arith.constant 5.000000e-01 : f32
    %527 = vector.broadcast %cst_166 : f32 to vector<1x128xf32>
    %528 = arith.subf %521, %527 : vector<1x128xf32>
    %529 = vector.broadcast %528 : vector<1x128xf32> to vector<4x128xf32>
    %530 = arith.mulf %470, %529 : vector<4x128xf32>
    %531 = arith.addf %530, %471 : vector<4x128xf32>
    %cst_167 = arith.constant 5.000000e-01 : f32
    %532 = vector.broadcast %cst_167 : f32 to vector<4x128xf32>
    %533 = arith.mulf %532, %531 : vector<4x128xf32>
    %534 = math.tanh %533 : vector<4x128xf32>
    %cst_168 = arith.constant 1.000000e+00 : f32
    %535 = vector.broadcast %cst_168 : f32 to vector<4x128xf32>
    %536 = arith.addf %534, %535 : vector<4x128xf32>
    %cst_169 = arith.constant 5.000000e-01 : f32
    %537 = vector.broadcast %cst_169 : f32 to vector<4x128xf32>
    %538 = arith.mulf %537, %536 : vector<4x128xf32>
    %cst_170 = arith.constant 5.000000e-01 : f32
    %539 = vector.broadcast %cst_170 : f32 to vector<4x128xf32>
    %540 = arith.mulf %539, %470 : vector<4x128xf32>
    %541 = arith.subf %471, %540 : vector<4x128xf32>
    %cst_171 = arith.constant 5.000000e-01 : f32
    %542 = vector.broadcast %cst_171 : f32 to vector<4x128xf32>
    %543 = arith.mulf %542, %541 : vector<4x128xf32>
    %544 = math.tanh %543 : vector<4x128xf32>
    %cst_172 = arith.constant 1.000000e+00 : f32
    %545 = vector.broadcast %cst_172 : f32 to vector<4x128xf32>
    %546 = arith.addf %544, %545 : vector<4x128xf32>
    %cst_173 = arith.constant 5.000000e-01 : f32
    %547 = vector.broadcast %cst_173 : f32 to vector<4x128xf32>
    %548 = arith.mulf %547, %546 : vector<4x128xf32>
    %cst_174 = arith.constant 5.000000e-01 : f32
    %549 = vector.broadcast %cst_174 : f32 to vector<4x128xf32>
    %550 = arith.mulf %549, %470 : vector<4x128xf32>
    %551 = arith.addf %471, %550 : vector<4x128xf32>
    %cst_175 = arith.constant 5.000000e-01 : f32
    %552 = vector.broadcast %cst_175 : f32 to vector<4x128xf32>
    %553 = arith.mulf %552, %551 : vector<4x128xf32>
    %554 = math.tanh %553 : vector<4x128xf32>
    %cst_176 = arith.constant 1.000000e+00 : f32
    %555 = vector.broadcast %cst_176 : f32 to vector<4x128xf32>
    %556 = arith.addf %554, %555 : vector<4x128xf32>
    %cst_177 = arith.constant 5.000000e-01 : f32
    %557 = vector.broadcast %cst_177 : f32 to vector<4x128xf32>
    %558 = arith.mulf %557, %556 : vector<4x128xf32>
    %559 = arith.subf %558, %548 : vector<4x128xf32>
    %cst_178 = arith.constant 9.99999996E-13 : f32
    %560 = vector.broadcast %cst_178 : f32 to vector<4x128xf32>
    %561 = arith.maximumf %559, %560 : vector<4x128xf32>
    %562 = tpu.reciprocal %561 {approx = true} : vector<4x128xf32> -> vector<4x128xf32>
    %563 = arith.mulf %561, %562 : vector<4x128xf32>
    %cst_179 = arith.constant 2.000000e+00 : f32
    %564 = vector.broadcast %cst_179 : f32 to vector<4x128xf32>
    %565 = arith.subf %564, %563 : vector<4x128xf32>
    %566 = arith.mulf %562, %565 : vector<4x128xf32>
    %567 = arith.subf %538, %548 : vector<4x128xf32>
    %568 = arith.mulf %567, %566 : vector<4x128xf32>
    %569 = arith.mulf %470, %538 : vector<4x128xf32>
    %cst_180 = arith.constant 1.000000e+00 : f32
    %570 = vector.broadcast %cst_180 : f32 to vector<4x128xf32>
    %571 = arith.subf %570, %538 : vector<4x128xf32>
    %572 = arith.mulf %569, %571 : vector<4x128xf32>
    %573 = arith.mulf %572, %566 : vector<4x128xf32>
    %574 = arith.mulf %496, %568 : vector<4x128xf32>
    %575 = vector.extract_strided_slice %574 {offsets = [0, 0], sizes = [1, 128], strides = [1, 1]} : vector<4x128xf32> to vector<1x128xf32>
    %576 = vector.extract_strided_slice %574 {offsets = [1, 0], sizes = [1, 128], strides = [1, 1]} : vector<4x128xf32> to vector<1x128xf32>
    %577 = arith.addf %575, %576 : vector<1x128xf32>
    %578 = vector.extract_strided_slice %574 {offsets = [2, 0], sizes = [1, 128], strides = [1, 1]} : vector<4x128xf32> to vector<1x128xf32>
    %579 = arith.addf %577, %578 : vector<1x128xf32>
    %580 = vector.extract_strided_slice %574 {offsets = [3, 0], sizes = [1, 128], strides = [1, 1]} : vector<4x128xf32> to vector<1x128xf32>
    %581 = arith.addf %579, %580 : vector<1x128xf32>
    %582 = arith.mulf %496, %573 : vector<4x128xf32>
    %583 = vector.extract_strided_slice %582 {offsets = [0, 0], sizes = [1, 128], strides = [1, 1]} : vector<4x128xf32> to vector<1x128xf32>
    %584 = vector.extract_strided_slice %582 {offsets = [1, 0], sizes = [1, 128], strides = [1, 1]} : vector<4x128xf32> to vector<1x128xf32>
    %585 = arith.addf %583, %584 : vector<1x128xf32>
    %586 = vector.extract_strided_slice %582 {offsets = [2, 0], sizes = [1, 128], strides = [1, 1]} : vector<4x128xf32> to vector<1x128xf32>
    %587 = arith.addf %585, %586 : vector<1x128xf32>
    %588 = vector.extract_strided_slice %582 {offsets = [3, 0], sizes = [1, 128], strides = [1, 1]} : vector<4x128xf32> to vector<1x128xf32>
    %589 = arith.addf %587, %588 : vector<1x128xf32>
    %590 = arith.mulf %526, %589 : vector<1x128xf32>
    %cst_181 = arith.constant 9.99999968E-21 : f32
    %591 = vector.broadcast %cst_181 : f32 to vector<1x128xf32>
    %592 = arith.maximumf %590, %591 : vector<1x128xf32>
    %593 = arith.subf %428, %421 : vector<1x128xf32>
    %cst_182 = arith.constant 3.14159274 : f32
    %594 = vector.broadcast %cst_182 : f32 to vector<1x128xf32>
    %595 = arith.addf %593, %594 : vector<1x128xf32>
    %cst_183 = arith.constant 3.14159274 : f32
    %596 = vector.broadcast %cst_183 : f32 to vector<1x128xf32>
    %597 = arith.addf %593, %596 : vector<1x128xf32>
    %cst_184 = arith.constant 0.159154937 : f32
    %598 = vector.broadcast %cst_184 : f32 to vector<1x128xf32>
    %599 = arith.mulf %597, %598 : vector<1x128xf32>
    %600 = math.floor %599 : vector<1x128xf32>
    %cst_185 = arith.constant 6.28318548 : f32
    %601 = vector.broadcast %cst_185 : f32 to vector<1x128xf32>
    %602 = arith.mulf %601, %600 : vector<1x128xf32>
    %603 = arith.subf %595, %602 : vector<1x128xf32>
    %cst_186 = arith.constant 3.14159274 : f32
    %604 = vector.broadcast %cst_186 : f32 to vector<1x128xf32>
    %605 = arith.subf %603, %604 : vector<1x128xf32>
    %cst_187 = arith.constant 5.000000e-01 : f32
    %606 = vector.broadcast %cst_187 : f32 to vector<1x128xf32>
    %607 = arith.mulf %606, %605 : vector<1x128xf32>
    %608 = arith.addf %421, %607 : vector<1x128xf32>
    %cst_188 = arith.constant 6.28318548 : f32
    %609 = vector.broadcast %cst_188 : f32 to vector<1x128xf32>
    %610 = arith.mulf %609, %581 : vector<1x128xf32>
    %611 = arith.addf %610, %608 : vector<1x128xf32>
    %cst_189 = arith.constant 0.159154937 : f32
    %612 = vector.broadcast %cst_189 : f32 to vector<1x128xf32>
    %613 = arith.mulf %611, %612 : vector<1x128xf32>
    %614 = math.floor %613 : vector<1x128xf32>
    %cst_190 = arith.constant 6.28318548 : f32
    %615 = vector.broadcast %cst_190 : f32 to vector<1x128xf32>
    %616 = arith.mulf %615, %614 : vector<1x128xf32>
    %617 = arith.subf %611, %616 : vector<1x128xf32>
    %c3_i32 = arith.constant 3 : i32
    %618 = vector.broadcast %c3_i32 : i32 to vector<1x128xi32>
    %619 = arith.andi %0, %618 : vector<1x128xi32>
    %c0_i32_191 = arith.constant 0 : i32
    %620 = vector.broadcast %c0_i32_191 : i32 to vector<1x128xi32>
    %621 = arith.cmpi eq, %619, %620 : vector<1x128xi32>
    %622 = arith.andi %621, %2 : vector<1x128xi1>
    %c3_i32_192 = arith.constant 3 : i32
    %623 = vector.broadcast %c3_i32_192 : i32 to vector<1x128xi32>
    %624 = arith.andi %0, %623 : vector<1x128xi32>
    %c2_i32 = arith.constant 2 : i32
    %625 = vector.broadcast %c2_i32 : i32 to vector<1x128xi32>
    %626 = arith.cmpi eq, %624, %625 : vector<1x128xi32>
    %627 = arith.andi %626, %2 : vector<1x128xi1>
    %cst_193 = arith.constant 1.000000e+00 : f32
    %628 = vector.broadcast %cst_193 : f32 to vector<1x128xf32>
    %629 = arith.select %622, %592, %628 : vector<1x128xi1>, vector<1x128xf32>
    %630 = math.log %629 : vector<1x128xf32>
    %631 = arith.addf %419, %630 : vector<1x128xf32>
    %c2_i32_194 = arith.constant 2 : i32
    %632 = tpu.dynamic_rotate %617 by %c2_i32_194 dim 1 : vector<1x128xf32>, i32 -> vector<1x128xf32>
    %633 = arith.select %627, %632, %421 : vector<1x128xi1>, vector<1x128xf32>
    %c126_i32 = arith.constant 126 : i32
    %634 = tpu.dynamic_rotate %633 by %c126_i32 dim 1 : vector<1x128xf32>, i32 -> vector<1x128xf32>
    %c14_i32 = arith.constant 14 : i32
    %635 = tpu.dynamic_rotate %633 by %c14_i32 dim 1 : vector<1x128xf32>, i32 -> vector<1x128xf32>
    %c15_i32_195 = arith.constant 15 : i32
    %636 = vector.broadcast %c15_i32_195 : i32 to vector<1x128xi32>
    %637 = arith.andi %0, %636 : vector<1x128xi32>
    %c14_i32_196 = arith.constant 14 : i32
    %638 = vector.broadcast %c14_i32_196 : i32 to vector<1x128xi32>
    %639 = arith.cmpi sge, %637, %638 : vector<1x128xi32>
    %640 = arith.select %639, %635, %634 : vector<1x128xi1>, vector<1x128xf32>
    %641 = arith.subf %633, %640 : vector<1x128xf32>
    %642 = math.cos %641 : vector<1x128xf32>
    %643 = math.sin %641 : vector<1x128xf32>
    %c3 = arith.constant 3 : index
    %c0_197 = arith.constant 0 : index
    %c0_198 = arith.constant 0 : index
    %644 = vector.load %arg2[%c3, %c0_197, %c0_198] : memref<4x32x2xf32, #tpu.memory_space<vmem>>, vector<1x32x2xf32>
    %645 = vector.shape_cast %644 : vector<1x32x2xf32> to vector<32x2xf32>
    %c3_199 = arith.constant 3 : index
    %c0_200 = arith.constant 0 : index
    %c0_201 = arith.constant 0 : index
    %646 = vector.load %arg3[%c3_199, %c0_200, %c0_201] : memref<4x32x1xf32, #tpu.memory_space<vmem>>, vector<1x32x1xf32>
    %647 = vector.shape_cast %646 : vector<1x32x1xf32> to vector<32x1xf32>
    %648 = vector.extract_strided_slice %645 {offsets = [0, 0], sizes = [32, 1], strides = [1, 1]} : vector<32x2xf32> to vector<32x1xf32>
    %649 = vector.broadcast %648 : vector<32x1xf32> to vector<32x128xf32>
    %650 = vector.broadcast %642 : vector<1x128xf32> to vector<32x128xf32>
    %651 = arith.mulf %649, %650 : vector<32x128xf32>
    %652 = vector.extract_strided_slice %645 {offsets = [0, 1], sizes = [32, 1], strides = [1, 1]} : vector<32x2xf32> to vector<32x1xf32>
    %653 = vector.broadcast %652 : vector<32x1xf32> to vector<32x128xf32>
    %654 = vector.broadcast %643 : vector<1x128xf32> to vector<32x128xf32>
    %655 = arith.mulf %653, %654 : vector<32x128xf32>
    %656 = arith.addf %651, %655 : vector<32x128xf32>
    %657 = vector.broadcast %647 : vector<32x1xf32> to vector<32x128xf32>
    %658 = arith.addf %656, %657 : vector<32x128xf32>
    %659 = arith.truncf %658 : vector<32x128xf32> to vector<32x128xbf16>
    %660 = math.tanh %659 : vector<32x128xbf16>
    %c3_202 = arith.constant 3 : index
    %c0_203 = arith.constant 0 : index
    %c0_204 = arith.constant 0 : index
    %661 = vector.load %arg4[%c3_202, %c0_203, %c0_204] : memref<4x32x32xbf16, #tpu.memory_space<vmem>>, vector<1x32x32xbf16>
    %662 = vector.shape_cast %661 : vector<1x32x32xbf16> to vector<32x32xbf16>
    %c3_205 = arith.constant 3 : index
    %c0_206 = arith.constant 0 : index
    %c0_207 = arith.constant 0 : index
    %663 = vector.load %arg5[%c3_205, %c0_206, %c0_207] : memref<4x32x1xf32, #tpu.memory_space<vmem>>, vector<1x32x1xf32>
    %664 = vector.shape_cast %663 : vector<1x32x1xf32> to vector<32x1xf32>
    %cst_208 = arith.constant dense<0.000000e+00> : vector<32x128xf32>
    %665 = tpu.matmul %662, %660, %cst_208 {dimension_numbers = #tpu.dot_dimension_numbers<[1], [0], [0], [1], [0, 0, 1, 1], [], []>} : vector<32x32xbf16>, vector<32x128xbf16>, vector<32x128xf32> -> vector<32x128xf32>
    %666 = vector.broadcast %664 : vector<32x1xf32> to vector<32x128xf32>
    %667 = arith.addf %665, %666 : vector<32x128xf32>
    %668 = arith.truncf %667 : vector<32x128xf32> to vector<32x128xbf16>
    %669 = math.tanh %668 : vector<32x128xbf16>
    %c3_209 = arith.constant 3 : index
    %c0_210 = arith.constant 0 : index
    %c0_211 = arith.constant 0 : index
    %670 = vector.load %arg6[%c3_209, %c0_210, %c0_211] : memref<4x12x32xbf16, #tpu.memory_space<vmem>>, vector<1x12x32xbf16>
    %671 = vector.shape_cast %670 : vector<1x12x32xbf16> to vector<12x32xbf16>
    %c3_212 = arith.constant 3 : index
    %c0_213 = arith.constant 0 : index
    %c0_214 = arith.constant 0 : index
    %672 = vector.load %arg7[%c3_212, %c0_213, %c0_214] : memref<4x12x1xf32, #tpu.memory_space<vmem>>, vector<1x12x1xf32>
    %673 = vector.shape_cast %672 : vector<1x12x1xf32> to vector<12x1xf32>
    %cst_215 = arith.constant dense<0.000000e+00> : vector<12x128xf32>
    %674 = tpu.matmul %671, %669, %cst_215 {dimension_numbers = #tpu.dot_dimension_numbers<[1], [0], [0], [1], [0, 0, 1, 1], [], []>} : vector<12x32xbf16>, vector<32x128xbf16>, vector<12x128xf32> -> vector<12x128xf32>
    %675 = vector.broadcast %673 : vector<12x1xf32> to vector<12x128xf32>
    %676 = arith.addf %674, %675 : vector<12x128xf32>
    %677 = vector.extract_strided_slice %676 {offsets = [0, 0], sizes = [4, 128], strides = [1, 1]} : vector<12x128xf32> to vector<4x128xf32>
    %cst_216 = arith.constant -8.000000e+00 : f32
    %cst_217 = arith.constant 8.000000e+00 : f32
    %678 = vector.broadcast %cst_216 : f32 to vector<4x128xf32>
    %679 = arith.maximumf %678, %677 : vector<4x128xf32>
    %680 = vector.broadcast %cst_217 : f32 to vector<4x128xf32>
    %681 = arith.minimumf %680, %679 : vector<4x128xf32>
    %682 = math.exp %681 : vector<4x128xf32>
    %683 = vector.extract_strided_slice %676 {offsets = [4, 0], sizes = [4, 128], strides = [1, 1]} : vector<12x128xf32> to vector<4x128xf32>
    %684 = vector.extract_strided_slice %676 {offsets = [8, 0], sizes = [4, 128], strides = [1, 1]} : vector<12x128xf32> to vector<4x128xf32>
    %685 = vector.extract_strided_slice %684 {offsets = [0, 0], sizes = [1, 128], strides = [1, 1]} : vector<4x128xf32> to vector<1x128xf32>
    %686 = vector.extract_strided_slice %684 {offsets = [1, 0], sizes = [1, 128], strides = [1, 1]} : vector<4x128xf32> to vector<1x128xf32>
    %687 = arith.maximumf %685, %686 : vector<1x128xf32>
    %688 = vector.extract_strided_slice %684 {offsets = [2, 0], sizes = [1, 128], strides = [1, 1]} : vector<4x128xf32> to vector<1x128xf32>
    %689 = arith.maximumf %687, %688 : vector<1x128xf32>
    %690 = vector.extract_strided_slice %684 {offsets = [3, 0], sizes = [1, 128], strides = [1, 1]} : vector<4x128xf32> to vector<1x128xf32>
    %691 = arith.maximumf %689, %690 : vector<1x128xf32>
    %692 = vector.broadcast %691 : vector<1x128xf32> to vector<4x128xf32>
    %693 = arith.subf %684, %692 : vector<4x128xf32>
    %694 = math.exp %693 : vector<4x128xf32>
    %695 = vector.extract_strided_slice %694 {offsets = [0, 0], sizes = [1, 128], strides = [1, 1]} : vector<4x128xf32> to vector<1x128xf32>
    %696 = vector.extract_strided_slice %694 {offsets = [1, 0], sizes = [1, 128], strides = [1, 1]} : vector<4x128xf32> to vector<1x128xf32>
    %697 = arith.addf %695, %696 : vector<1x128xf32>
    %698 = vector.extract_strided_slice %694 {offsets = [2, 0], sizes = [1, 128], strides = [1, 1]} : vector<4x128xf32> to vector<1x128xf32>
    %699 = arith.addf %697, %698 : vector<1x128xf32>
    %700 = vector.extract_strided_slice %694 {offsets = [3, 0], sizes = [1, 128], strides = [1, 1]} : vector<4x128xf32> to vector<1x128xf32>
    %701 = arith.addf %699, %700 : vector<1x128xf32>
    %702 = tpu.reciprocal %701 {approx = true} : vector<1x128xf32> -> vector<1x128xf32>
    %703 = vector.broadcast %702 : vector<1x128xf32> to vector<4x128xf32>
    %704 = arith.mulf %694, %703 : vector<4x128xf32>
    %cst_218 = arith.constant 0.959999978 : f32
    %705 = vector.broadcast %cst_218 : f32 to vector<4x128xf32>
    %706 = arith.mulf %705, %704 : vector<4x128xf32>
    %cst_219 = arith.constant 0.00999999977 : f32
    %707 = vector.broadcast %cst_219 : f32 to vector<4x128xf32>
    %708 = arith.addf %707, %706 : vector<4x128xf32>
    %c3_220 = arith.constant 3 : index
    %c0_221 = arith.constant 0 : index
    %c0_222 = arith.constant 0 : index
    %709 = vector.load %arg1[%c3_220, %c0_221, %c0_222] : memref<4x1x128xf32, #tpu.memory_space<vmem>>, vector<1x1x128xf32>
    %710 = vector.shape_cast %709 : vector<1x1x128xf32> to vector<1x128xf32>
    %cst_223 = arith.constant 0.159154937 : f32
    %711 = vector.broadcast %cst_223 : f32 to vector<1x128xf32>
    %712 = arith.mulf %710, %711 : vector<1x128xf32>
    %713 = math.floor %712 : vector<1x128xf32>
    %cst_224 = arith.constant 6.28318548 : f32
    %714 = vector.broadcast %cst_224 : f32 to vector<1x128xf32>
    %715 = arith.mulf %714, %713 : vector<1x128xf32>
    %716 = arith.subf %710, %715 : vector<1x128xf32>
    %cst_225 = arith.constant 0.159154937 : f32
    %717 = vector.broadcast %cst_225 : f32 to vector<1x128xf32>
    %718 = arith.mulf %716, %717 : vector<1x128xf32>
    %cst_226 = arith.constant 9.99999997E-7 : f32
    %cst_227 = arith.constant 0.999998986 : f32
    %719 = vector.broadcast %cst_226 : f32 to vector<1x128xf32>
    %720 = arith.maximumf %719, %718 : vector<1x128xf32>
    %721 = vector.broadcast %cst_227 : f32 to vector<1x128xf32>
    %722 = arith.minimumf %721, %720 : vector<1x128xf32>
    %cst_228 = arith.constant 1.000000e+00 : f32
    %723 = vector.broadcast %cst_228 : f32 to vector<1x128xf32>
    %724 = arith.subf %723, %722 : vector<1x128xf32>
    %725 = arith.mulf %722, %722 : vector<1x128xf32>
    %726 = arith.mulf %724, %724 : vector<1x128xf32>
    %727 = arith.addf %725, %726 : vector<1x128xf32>
    %728 = tpu.reciprocal %727 {approx = true} : vector<1x128xf32> -> vector<1x128xf32>
    %729 = arith.mulf %727, %728 : vector<1x128xf32>
    %cst_229 = arith.constant 2.000000e+00 : f32
    %730 = vector.broadcast %cst_229 : f32 to vector<1x128xf32>
    %731 = arith.subf %730, %729 : vector<1x128xf32>
    %732 = arith.mulf %728, %731 : vector<1x128xf32>
    %733 = arith.mulf %725, %732 : vector<1x128xf32>
    %cst_230 = arith.constant 2.000000e+00 : f32
    %734 = vector.broadcast %cst_230 : f32 to vector<1x128xf32>
    %735 = arith.mulf %734, %722 : vector<1x128xf32>
    %736 = arith.mulf %735, %724 : vector<1x128xf32>
    %737 = arith.mulf %736, %732 : vector<1x128xf32>
    %738 = arith.mulf %737, %732 : vector<1x128xf32>
    %cst_231 = arith.constant 5.000000e-01 : f32
    %739 = vector.broadcast %cst_231 : f32 to vector<1x128xf32>
    %740 = arith.subf %733, %739 : vector<1x128xf32>
    %741 = vector.broadcast %740 : vector<1x128xf32> to vector<4x128xf32>
    %742 = arith.mulf %682, %741 : vector<4x128xf32>
    %743 = arith.addf %742, %683 : vector<4x128xf32>
    %cst_232 = arith.constant 5.000000e-01 : f32
    %744 = vector.broadcast %cst_232 : f32 to vector<4x128xf32>
    %745 = arith.mulf %744, %743 : vector<4x128xf32>
    %746 = math.tanh %745 : vector<4x128xf32>
    %cst_233 = arith.constant 1.000000e+00 : f32
    %747 = vector.broadcast %cst_233 : f32 to vector<4x128xf32>
    %748 = arith.addf %746, %747 : vector<4x128xf32>
    %cst_234 = arith.constant 5.000000e-01 : f32
    %749 = vector.broadcast %cst_234 : f32 to vector<4x128xf32>
    %750 = arith.mulf %749, %748 : vector<4x128xf32>
    %cst_235 = arith.constant 5.000000e-01 : f32
    %751 = vector.broadcast %cst_235 : f32 to vector<4x128xf32>
    %752 = arith.mulf %751, %682 : vector<4x128xf32>
    %753 = arith.subf %683, %752 : vector<4x128xf32>
    %cst_236 = arith.constant 5.000000e-01 : f32
    %754 = vector.broadcast %cst_236 : f32 to vector<4x128xf32>
    %755 = arith.mulf %754, %753 : vector<4x128xf32>
    %756 = math.tanh %755 : vector<4x128xf32>
    %cst_237 = arith.constant 1.000000e+00 : f32
    %757 = vector.broadcast %cst_237 : f32 to vector<4x128xf32>
    %758 = arith.addf %756, %757 : vector<4x128xf32>
    %cst_238 = arith.constant 5.000000e-01 : f32
    %759 = vector.broadcast %cst_238 : f32 to vector<4x128xf32>
    %760 = arith.mulf %759, %758 : vector<4x128xf32>
    %cst_239 = arith.constant 5.000000e-01 : f32
    %761 = vector.broadcast %cst_239 : f32 to vector<4x128xf32>
    %762 = arith.mulf %761, %682 : vector<4x128xf32>
    %763 = arith.addf %683, %762 : vector<4x128xf32>
    %cst_240 = arith.constant 5.000000e-01 : f32
    %764 = vector.broadcast %cst_240 : f32 to vector<4x128xf32>
    %765 = arith.mulf %764, %763 : vector<4x128xf32>
    %766 = math.tanh %765 : vector<4x128xf32>
    %cst_241 = arith.constant 1.000000e+00 : f32
    %767 = vector.broadcast %cst_241 : f32 to vector<4x128xf32>
    %768 = arith.addf %766, %767 : vector<4x128xf32>
    %cst_242 = arith.constant 5.000000e-01 : f32
    %769 = vector.broadcast %cst_242 : f32 to vector<4x128xf32>
    %770 = arith.mulf %769, %768 : vector<4x128xf32>
    %771 = arith.subf %770, %760 : vector<4x128xf32>
    %cst_243 = arith.constant 9.99999996E-13 : f32
    %772 = vector.broadcast %cst_243 : f32 to vector<4x128xf32>
    %773 = arith.maximumf %771, %772 : vector<4x128xf32>
    %774 = tpu.reciprocal %773 {approx = true} : vector<4x128xf32> -> vector<4x128xf32>
    %775 = arith.mulf %773, %774 : vector<4x128xf32>
    %cst_244 = arith.constant 2.000000e+00 : f32
    %776 = vector.broadcast %cst_244 : f32 to vector<4x128xf32>
    %777 = arith.subf %776, %775 : vector<4x128xf32>
    %778 = arith.mulf %774, %777 : vector<4x128xf32>
    %779 = arith.subf %750, %760 : vector<4x128xf32>
    %780 = arith.mulf %779, %778 : vector<4x128xf32>
    %781 = arith.mulf %682, %750 : vector<4x128xf32>
    %cst_245 = arith.constant 1.000000e+00 : f32
    %782 = vector.broadcast %cst_245 : f32 to vector<4x128xf32>
    %783 = arith.subf %782, %750 : vector<4x128xf32>
    %784 = arith.mulf %781, %783 : vector<4x128xf32>
    %785 = arith.mulf %784, %778 : vector<4x128xf32>
    %786 = arith.mulf %708, %780 : vector<4x128xf32>
    %787 = vector.extract_strided_slice %786 {offsets = [0, 0], sizes = [1, 128], strides = [1, 1]} : vector<4x128xf32> to vector<1x128xf32>
    %788 = vector.extract_strided_slice %786 {offsets = [1, 0], sizes = [1, 128], strides = [1, 1]} : vector<4x128xf32> to vector<1x128xf32>
    %789 = arith.addf %787, %788 : vector<1x128xf32>
    %790 = vector.extract_strided_slice %786 {offsets = [2, 0], sizes = [1, 128], strides = [1, 1]} : vector<4x128xf32> to vector<1x128xf32>
    %791 = arith.addf %789, %790 : vector<1x128xf32>
    %792 = vector.extract_strided_slice %786 {offsets = [3, 0], sizes = [1, 128], strides = [1, 1]} : vector<4x128xf32> to vector<1x128xf32>
    %793 = arith.addf %791, %792 : vector<1x128xf32>
    %794 = arith.mulf %708, %785 : vector<4x128xf32>
    %795 = vector.extract_strided_slice %794 {offsets = [0, 0], sizes = [1, 128], strides = [1, 1]} : vector<4x128xf32> to vector<1x128xf32>
    %796 = vector.extract_strided_slice %794 {offsets = [1, 0], sizes = [1, 128], strides = [1, 1]} : vector<4x128xf32> to vector<1x128xf32>
    %797 = arith.addf %795, %796 : vector<1x128xf32>
    %798 = vector.extract_strided_slice %794 {offsets = [2, 0], sizes = [1, 128], strides = [1, 1]} : vector<4x128xf32> to vector<1x128xf32>
    %799 = arith.addf %797, %798 : vector<1x128xf32>
    %800 = vector.extract_strided_slice %794 {offsets = [3, 0], sizes = [1, 128], strides = [1, 1]} : vector<4x128xf32> to vector<1x128xf32>
    %801 = arith.addf %799, %800 : vector<1x128xf32>
    %802 = arith.mulf %738, %801 : vector<1x128xf32>
    %cst_246 = arith.constant 9.99999968E-21 : f32
    %803 = vector.broadcast %cst_246 : f32 to vector<1x128xf32>
    %804 = arith.maximumf %802, %803 : vector<1x128xf32>
    %805 = arith.subf %640, %633 : vector<1x128xf32>
    %cst_247 = arith.constant 3.14159274 : f32
    %806 = vector.broadcast %cst_247 : f32 to vector<1x128xf32>
    %807 = arith.addf %805, %806 : vector<1x128xf32>
    %cst_248 = arith.constant 3.14159274 : f32
    %808 = vector.broadcast %cst_248 : f32 to vector<1x128xf32>
    %809 = arith.addf %805, %808 : vector<1x128xf32>
    %cst_249 = arith.constant 0.159154937 : f32
    %810 = vector.broadcast %cst_249 : f32 to vector<1x128xf32>
    %811 = arith.mulf %809, %810 : vector<1x128xf32>
    %812 = math.floor %811 : vector<1x128xf32>
    %cst_250 = arith.constant 6.28318548 : f32
    %813 = vector.broadcast %cst_250 : f32 to vector<1x128xf32>
    %814 = arith.mulf %813, %812 : vector<1x128xf32>
    %815 = arith.subf %807, %814 : vector<1x128xf32>
    %cst_251 = arith.constant 3.14159274 : f32
    %816 = vector.broadcast %cst_251 : f32 to vector<1x128xf32>
    %817 = arith.subf %815, %816 : vector<1x128xf32>
    %cst_252 = arith.constant 5.000000e-01 : f32
    %818 = vector.broadcast %cst_252 : f32 to vector<1x128xf32>
    %819 = arith.mulf %818, %817 : vector<1x128xf32>
    %820 = arith.addf %633, %819 : vector<1x128xf32>
    %cst_253 = arith.constant 6.28318548 : f32
    %821 = vector.broadcast %cst_253 : f32 to vector<1x128xf32>
    %822 = arith.mulf %821, %793 : vector<1x128xf32>
    %823 = arith.addf %822, %820 : vector<1x128xf32>
    %cst_254 = arith.constant 0.159154937 : f32
    %824 = vector.broadcast %cst_254 : f32 to vector<1x128xf32>
    %825 = arith.mulf %823, %824 : vector<1x128xf32>
    %826 = math.floor %825 : vector<1x128xf32>
    %cst_255 = arith.constant 6.28318548 : f32
    %827 = vector.broadcast %cst_255 : f32 to vector<1x128xf32>
    %828 = arith.mulf %827, %826 : vector<1x128xf32>
    %829 = arith.subf %823, %828 : vector<1x128xf32>
    %c1_i32 = arith.constant 1 : i32
    %830 = vector.broadcast %c1_i32 : i32 to vector<1x128xi32>
    %831 = arith.andi %0, %830 : vector<1x128xi32>
    %c0_i32_256 = arith.constant 0 : i32
    %832 = vector.broadcast %c0_i32_256 : i32 to vector<1x128xi32>
    %833 = arith.cmpi eq, %831, %832 : vector<1x128xi32>
    %834 = arith.andi %833, %2 : vector<1x128xi1>
    %c1_i32_257 = arith.constant 1 : i32
    %835 = vector.broadcast %c1_i32_257 : i32 to vector<1x128xi32>
    %836 = arith.andi %0, %835 : vector<1x128xi32>
    %c1_i32_258 = arith.constant 1 : i32
    %837 = vector.broadcast %c1_i32_258 : i32 to vector<1x128xi32>
    %838 = arith.cmpi eq, %836, %837 : vector<1x128xi32>
    %839 = arith.andi %838, %2 : vector<1x128xi1>
    %cst_259 = arith.constant 1.000000e+00 : f32
    %840 = vector.broadcast %cst_259 : f32 to vector<1x128xf32>
    %841 = arith.select %834, %804, %840 : vector<1x128xi1>, vector<1x128xf32>
    %842 = math.log %841 : vector<1x128xf32>
    %843 = arith.addf %631, %842 : vector<1x128xf32>
    %c1_i32_260 = arith.constant 1 : i32
    %844 = tpu.dynamic_rotate %829 by %c1_i32_260 dim 1 : vector<1x128xf32>, i32 -> vector<1x128xf32>
    %845 = arith.select %839, %844, %633 : vector<1x128xi1>, vector<1x128xf32>
    %c0_261 = arith.constant 0 : index
    %c0_262 = arith.constant 0 : index
    %846 = vector.load %arg8[%c0_261, %c0_262] : memref<1x128xf32, #tpu.memory_space<vmem>>, vector<1x128xf32>
    tpu.vector_store %arg8[%c0_261, %c0_262], %845 {strides = array<i32>} : memref<1x128xf32, #tpu.memory_space<vmem>>, vector<1x128xf32>,
    %c0_263 = arith.constant 0 : index
    %c0_264 = arith.constant 0 : index
    %847 = vector.load %arg9[%c0_263, %c0_264] : memref<1x128xf32, #tpu.memory_space<vmem>>, vector<1x128xf32>
    tpu.vector_store %arg9[%c0_263, %c0_264], %843 {strides = array<i32>} : memref<1x128xf32, #tpu.memory_space<vmem>>, vector<1x128xf32>,
    return
  }
}

</mosaic_0001>

<bundles_post_ra>
// kernel: squeeze.6
= control target key start
LH: loop header
LB: loop body
LE: loop exit
PB: predicated region body
PF: predicated region fallthrough
CT: control target
= control target key end

     0   :  { %vm7_vm0 = vcmask 130048   ;;  %s39_s0 = inlined_call_operand.vmem [shape: f32[32], index: 0, kind: input, shape index: {}]   ;;  %s40_s1 = inlined_call_operand.vmem [shape: f32[2,16], index: 1, kind: output, shape index: {}]  }
   0x1   :  { %v4_v0 = vld [vmem:[%s39_s0] sm:$0x1]  ;;  %s22_s0 = smov 112  }
   0x2   :  { %5 = vst [vmem:[#allocation1] sm:$0x1] %v4_v0 }
   0x9   :  { %v9_v1 = vld [vmem:[#allocation1] sm:$0x1]  }
   0xa   :  { %v6_v2 = vld [vmem:[#allocation1] sm:$0x1]   ;;  %10 = vrot.lane.b32.xlu0 %v9_v1, %s22_s0 }
   0xb   :  { %8 = vst.msk [vmem:[#allocation0] sm:$0x1] %vm7_vm0, %v6_v2  }
  0x7c   :  { %v11_v3 = vpop.permute.xlu0 %10  }
  0x7d   :  { %14 = vst.msk [vmem:[#allocation0 + $0x1] sm:$0x1] %vm7_vm0, %v11_v3  }
  0x84   :  { %v18_v4 = vld [vmem:[#allocation0] sm:$0x3] }
  0x85   :  { %20 = vst [vmem:[%s40_s1] sm:$0x3] %v18_v4 }

// kernel: squeeze.7
= control target key start
LH: loop header
LB: loop body
LE: loop exit
PB: predicated region body
PF: predicated region fallthrough
CT: control target
= control target key end

     0   :  { %s85_s0 = inlined_call_operand.vmem [shape: f32[32], index: 0, kind: input, shape index: {}]   ;;  %s86_s1 = inlined_call_operand.hbm [shape: f32[2,16,1], index: 1, kind: output, shape index: {}]  }
   0x1   :  { %v5_v0 = vld [vmem:[%s85_s0] sm:$0x1] }
   0x2   :  { %2 = vsyncpa [#allocation1], 0  ;;  %6 = vst [vmem:[#allocation3] sm:$0x1] %v5_v0  ;;  %vm8_vm0 = vcmask 130048   ;;  %s58_s0 = smov 112  }
   0x3   :  { %s59_s8 = smov [#allocation0]  }
   0x4   :  { %s26_s9 = sshll.u32 %s59_s8, 4  ;;  %s27_s9 = int_to_ptr.vmem [resolvable:$true] %s26_s9 }
   0x5   :  { %s34_s10 = scalar_lea.vmem %s27_s9, 32  ;;  %p39_p1 = scmp.lt.s32.totalorder %s27_s9, %s27_s9 }
   0x6   :  { %p35_p0 = scmp.ne.s32.totalorder %s27_s9, %s34_s10  ;;  %p40_p2 = scmp.lt.s32.totalorder %s34_s10, %s34_s10 }
   0x8   :  { %p41_p3 = por %p40_p2, %p39_p1 }
   0x9   :  { %v10_v1 = vld [vmem:[#allocation3] sm:$0x1]  }
   0xa   :  { %v7_v2 = vld [vmem:[#allocation3] sm:$0x1]   ;;  %11 = vrot.lane.b32.xlu0 %v10_v1, %s58_s0  ;;  %p42_p4 = pnand %p41_p3, %p35_p0 }
   0xb   :  { %9 = vst.msk [vmem:[#allocation2] sm:$0x1] %vm8_vm0, %v7_v2  }
  0x7c   :  { %v12_v3 = vpop.permute.xlu0 %11  }
  0x7d   :  { %15 = vst.msk [vmem:[#allocation2 + $0x1] sm:$0x1] %vm8_vm0, %v12_v3  }
  0x84   :  { %v19_v4 = vld [vmem:[#allocation2] sm:$0x3] }
  0x85   :  { %21 = vst [vmem:[#allocation0] sm:$0x3] %v19_v4 }
  0x86   :  { %45 = shalt.err (!%p42_p4)
}
  0x87   :  { %s46_s13 = scalar_lea.hbm %s86_s1, 32 }
  0x88   :  { %p47_p5 = scmp.ne.s32.totalorder %s86_s1, %s46_s13  ;;  %p50_p6 = scmp.lt.u32.totalorder %s46_s13, %s86_s1 }
  0x8a   :  { %p52_p7 = pnand %p50_p6, %p47_p5 }
  0x8c   :  { %55 = shalt.err (!%p52_p7)
}
  0x8d   :  { %29 = dma.vmem_to_hbm [thread:$0]  %s27_s9, 32, %s86_s1, [#allocation1]  }
  0x8e   :  { %56 = dma.done.wait [#allocation1], 32  }
  0x8f   :  { %57 = vsyncadd [#allocation1], 4294967264 }
  0x90   :  { %31 = vsyncpa [#allocation1], 1 }

// kernel: hierarchical_flow_forward.1
= control target key start
LH: loop header
LB: loop body
LE: loop exit
PB: predicated region body
PF: predicated region fallthrough
CT: control target
= control target key end

     0   :  { %v2979_v0 = vmov 1   ;;  %v2980_v4 = vmov 0   ;;  %v2981_v22 = vmov 683565275   ;;  %v2982_v24 = vmov 2475754826   ;;  %s3621_s2 = inlined_call_operand.vmem [shape: f32[4,32,2], index: 2, kind: input, shape index: {}]   ;;  %s3622_s0 = inlined_call_operand.vmem [shape: f32[1,128], index: 0, kind: input, shape index: {}]   ;;  %s3623_s3 = inlined_call_operand.vmem [shape: f32[4,32,1], index: 3, kind: input, shape index: {}]   ;;  %s3624_s5 = inlined_call_operand.vmem [shape: f32[4,32,1], index: 5, kind: input, shape index: {}]   ;;  %s3625_s7 = inlined_call_operand.vmem [shape: f32[4,12,1], index: 7, kind: input, shape index: {}]   ;;  %s3626_s4 = inlined_call_operand.vmem [shape: bf16[4,32,32], index: 4, kind: input, shape index: {}]   ;;  %s3627_s6 = inlined_call_operand.vmem [shape: bf16[4,12,32], index: 6, kind: input, shape index: {}]   ;;  %s3628_s1 = inlined_call_operand.vmem [shape: f32[4,1,128], index: 1, kind: input, shape index: {}]   ;;  %s3629_s9 = inlined_call_operand.vmem [shape: f32[1,128], index: 9, kind: output, shape index: {1}]   ;;  %s3630_s8 = inlined_call_operand.vmem [shape: f32[1,128], index: 8, kind: output, shape index: {0}]  }
   0x1   :  { %2825 = vset.pattern.permute.xlu0 %v2979_v0  ;;  %2823 = vset.pattern.permute.xlu1 %v2979_v0  ;;  %v246_v1 = vld [vmem:[%s3621_s2 + $0x10] sm:$0xff]  ;;  %v244_v2 = vld [vmem:[%s3621_s2] sm:$0xff]  ;;  %v245_v3 = vld [vmem:[%s3621_s2 + $0x8] sm:$0xff]  ;;  %v2983_v26 = vmov 2131351028   ;;  %vm378_vm6 = vcmask 261120  }
   0x2   :  { %291 = vperm.xlu0 %2825, %v246_v1   ;;  %283 = vperm.xlu1 %2823, %v244_v2   ;;  %v3063_v5 = vld [vmem:[%s3622_s0] sm:$0x1]  ;;  %v247_v7 = vld [vmem:[%s3621_s2 + $0x18] sm:$0xff]  ;;  %v249_v13 = vld [vmem:[%s3623_s3 + $0x8] sm:$0xff]  ;;  %v2984_v29 = vmov 2102212464  }
   0x3   :  { %v3067_v6 = vsub.f32 %v3063_v5, %v3063_v5  ;;  %v248_v15 = vld [vmem:[%s3623_s3] sm:$0xff]  ;;  %v250_v28 = vld [vmem:[%s3623_s3 + $0x10] sm:$0xff]  ;;  %v2985_v31 = vmov 920167782   ;;  %v2986_v39 = vmov 1326507024  }
   0x4   :  { %v344_v18 = vld [vmem:[%s3624_s5] sm:$0xff]  ;;  %v346_v37 = vld [vmem:[%s3624_s5 + $0x10] sm:$0xff]  ;;  %v251_v45 = vld [vmem:[%s3623_s3 + $0x18] sm:$0xff]  ;;  %s2989_s24 = smov 8   ;;  %s2990_s25 = smov 120  }
   0x5   :  { %v40_v8 = vand.u32 2139095040, %v3067_v6  ;;  %v37_v10 = vand.u32 2147483647, %v3067_v6  ;;  %v440_v52 = vld [vmem:[%s3625_s7] sm:$0xff]  ;;  %v345_v58 = vld [vmem:[%s3624_s5 + $0x8] sm:$0xff]  ;;  %vm39_vm8 = vcmp.lt.s32.totalorder %v3067_v6, 0 }
   0x6   :  { %2826 = vset.pattern.permute.xlu0 %v2980_v4  ;;  %287 = vperm.xlu1 %2823, %v245_v3   ;;  %s2991_s0 = smov 4   ;;  %s2992_s19 = smov 12  }
   0x7   :  { %254 = vperm.xlu0 %2826, %v244_v2   ;;  %v41_v9 = vshrl.u32 %v40_v8, 23  ;;  %v44_v14 = vand.u32 8388607, %v37_v10  ;;  %vm38_vm9 = vcmp.le.f32.partialorder %v37_v10, 0.7853982  ;;  %s2993_s20 = smov 124  }
   0x8   :  { %s2994_s14 = smov 2   ;;  %s2995_s15 = smov 14  }
   0x9   :  { %v2565_v11 = vadd.s32 4294967169, %v41_v9  ;;  %v45_v19 = vor.u32 8388608, %v44_v14  ;;  %s2996_s16 = smov 126  }
   0xa   :  { %2824 = vset.pattern.permute.xlu1 %v2980_v4 }
   0xb   :  { %259 = vperm.xlu0 %2826, %v245_v3   ;;  %269 = vperm.xlu1 %2824, %v247_v7   ;;  %v47_v12 = vadd.s32 1, %v2565_v11  ;;  %v85_v41 = vshll.u32 %v45_v19, 8  ;;  %v347_v3 = vld [vmem:[%s3624_s5 + $0x18] sm:$0xff]  ;;  %v441_v11 = vld [vmem:[%s3625_s7 + $0x8] sm:$0xf] }
   0xd   :  { %vm48_vm0 = vcmp.gt.s32.totalorder %v47_v12, 0 }
   0xe   :  { %v49_v16 = vsel %vm48_vm0, %v47_v12, 0  ;;  %vm129_vm0 = vweird.f32 %v3067_v6 }
   0xf   :  { %264 = vperm.xlu0 %2826, %v246_v1   ;;  %2827 = vset.pattern.permute.xlu1 %v2979_v0  ;;  %v51_v17 = vand.u32 31, %v49_v16  ;;  %v50_v20 = vshrl.u32 %v49_v16, 5 }
  0x10   :  { %295 = vperm.xlu1 %2827, %v247_v7  }
  0x11   :  { %v52_v21 = vsub.s32 32, %v51_v17  ;;  %v54_v23 = vshll.u32 %v2981_v22, %v51_v17  ;;  %v57_v25 = vshll.u32 %v2982_v24, %v51_v17  ;;  %v60_v27 = vshll.u32 %v2983_v26, %v51_v17 }
  0x12   :  { %v63_v30 = vshll.u32 %v2984_v29, %v51_v17  ;;  %v66_v32 = vshll.u32 %v2985_v31, %v51_v17  ;;  %vm69_vm1 = vcmp.lt.s32.totalorder %v50_v20, 1  ;;  %vm72_vm2 = vcmp.lt.s32.totalorder %v50_v20, 4 }
  0x13   :  { %319 = vperm.xlu0 %2826, %v249_v13   ;;  %v53_v33 = vshrl.u32 %v2981_v22, %v52_v21  ;;  %v55_v34 = vshrl.u32 %v2982_v24, %v52_v21  ;;  %v58_v35 = vshrl.u32 %v2983_v26, %v52_v21  ;;  %v61_v36 = vshrl.u32 %v2984_v29, %v52_v21 }
  0x14   :  { %2828 = vset.pattern.permute.xlu1 %v2980_v4  ;;  %v64_v38 = vshrl.u32 %v2985_v31, %v52_v21  ;;  %v67_v40 = vshrl.u32 %v2986_v39, %v52_v21  ;;  %vm70_vm3 = vcmp.lt.s32.totalorder %v50_v20, 2  ;;  %vm71_vm4 = vcmp.lt.s32.totalorder %v50_v20, 3 }
  0x15   :  { %314 = vperm.xlu1 %2828, %v248_v15   ;;  %v56_v42 = vor.u32 %v55_v34, %v54_v23  ;;  %v59_v43 = vor.u32 %v58_v35, %v57_v25  ;;  %v62_v44 = vor.u32 %v61_v36, %v60_v27  ;;  %v2847_v15 = vld [vmem:[%s3626_s4] sm:$0xff]  }
  0x16   :  { %v65_v46 = vor.u32 %v64_v38, %v63_v30  ;;  %v68_v47 = vor.u32 %v67_v40, %v66_v32  ;;  %2728 = vmatprep.mubr.msk.bf16.mxu0 %vm378_vm6, %v2847_v15 }
  0x17   :  { %350 = vperm.xlu0 %2826, %v344_v18   ;;  %v73_v48 = vsel %vm69_vm1, %v53_v33, %v56_v42  ;;  %v74_v49 = vsel %vm72_vm2, %v62_v44, 2102212464  ;;  %v77_v50 = vsel %vm69_vm1, %v56_v42, %v59_v43  ;;  %v81_v51 = vsel %vm69_vm1, %v59_v43, %v62_v44 }
  0x18   :  { %v75_v53 = vsel %vm71_vm4, %v59_v43, %v74_v49  ;;  %v78_v54 = vsel %vm72_vm2, %v65_v46, 920167782  ;;  %v82_v55 = vsel %vm72_vm2, %v68_v47, 1326507024  ;;  %vm2988_vm1 = vmmov 0  }
  0x19   :  { %324 = vperm.xlu1 %2828, %v250_v28   ;;  %v79_v56 = vsel %vm71_vm4, %v62_v44, %v78_v54  ;;  %v83_v57 = vsel %vm71_vm4, %v65_v46, %v82_v55  ;;  %v76_v59 = vsel %vm70_vm3, %v73_v48, %v75_v53  ;;  %v32_v54 = vlaneseq }
  0x1a   :  { %v80_v60 = vsel %vm70_vm3, %v77_v50, %v79_v56  ;;  %v84_v61 = vsel %vm70_vm3, %v81_v51, %v83_v57  ;;  %v92_v7 = vmul.u32 %v85_v41, %v76_v59 }
  0x1b   :  { %360 = vperm.xlu0 %2826, %v346_v37   ;;  %v3120_v62 = vmul.u32.u64.low %v85_v41, %v84_v61  ;;  %v3121_v63 = vmul.u32.u64.high %v85_v41, %v84_v61, %v3120_v62  ;;  %v3123_v1 = vmul.u32.u64.low %v85_v41, %v80_v60  ;;  %v3124_v2 = vmul.u32.u64.high %v85_v41, %v80_v60, %v3123_v1 }
  0x1c   :  { %v274_v60 = vshrl.u32 %v32_v54, 7 }
  0x1d   :  { %329 = vperm.xlu1 %2828, %v251_v45   ;;  %vm94_vm5 = vc.u32 %v3121_v63, %v3123_v1  ;;  %v95_v8 = vadd.s32 1, %v3124_v2  ;;  %v93_v27 = vadd.s32 %v3123_v1, %v3121_v63 }
  0x1f   :  { %444 = vperm.xlu0 %2826, %v440_v52   ;;  %v96_v9 = vsel %vm94_vm5, %v95_v8, %v3124_v2 }
  0x20   :  { %v97_v12 = vadd.s32 %v96_v9, %v92_v7 }
  0x21   :  { %355 = vperm.xlu1 %2828, %v345_v58  }
  0x22   :  { %v98_v13 = vadd.s32 536870912, %v97_v12 }
  0x23   :  { %2830 = vset.pattern.permute.xlu0 %v2979_v0 }
  0x24   :  { %v99_v14 = vshrl.u32 %v98_v13, 30 }
  0x25   :  { %365 = vperm.xlu1 %2828, %v347_v3   ;;  %v3147_v3 = vsub.s32 0, %v274_v60 }
  0x26   :  { %v100_v16 = vshll.u32 %v99_v14, 30  ;;  %v123_v43 = vsub.s32 4, %v99_v14 }
  0x28   :  { %v101_v17 = vsub.s32 %v97_v12, %v100_v16  ;;  %v124_v45 = vsel %vm39_vm8, %v123_v43, %v99_v14 }
  0x29   :  { %449 = vperm.xlu1 %2828, %v441_v11   ;;  %v126_v46 = vsel %vm38_vm9, 0, %v124_v45  ;;  %v2848_v45 = vld [vmem:[%s3626_s4 + $0x8] sm:$0xff]  }
  0x2a   :  { %v103_v18 = vsub.s32 0, %v101_v17  ;;  %v233_v47 = vadd.s32 3, %v126_v46  ;;  %v130_v48 = vand.u32 3, %v126_v46  ;;  %v2987_v46 = vmov 0.0  }
  0x2b   :  { %2732 = vmatprep.subr.bf16.mxu1 %v2987_v46  ;;  %2736 = vmatprep.mubr.msk.bf16.mxu1 %vm2988_vm1, %v2987_v46 }
  0x2c   :  { %v2566_v19 = vmin.u32 %v103_v18, %v101_v17  ;;  %v234_v51 = vand.u32 3, %v233_v47  ;;  %vm132_vm10 = vcmp.eq.s32.totalorder %v130_v48, 0  ;;  %vm135_vm11 = vcmp.eq.s32.totalorder %v130_v48, 2 }
  0x2d   :  { %vm131_vm14 = vcmp.lt.s32.totalorder %v130_v48, 2 }
  0x2e   :  { %v105_v20 = vclz %v2566_v19  ;;  %vm236_vm12 = vcmp.eq.s32.totalorder %v234_v51, 0  ;;  %vm239_vm13 = vcmp.eq.s32.totalorder %v234_v51, 2  ;;  %vm235_vm15 = vcmp.lt.s32.totalorder %v234_v51, 2 }
  0x30   :  { %v2567_v21 = vadd.s32 4294967294, %v105_v20 }
  0x32   :  { %vm2568_vm7 = vcmp.lt.s32.totalorder %v2567_v21, 0 }
  0x33   :  { %v108_v23 = vsel %vm2568_vm7, 0, %v2567_v21 }
  0x34   :  { %v113_v25 = vsub.s32 4294967266, %v108_v23  ;;  %v109_v28 = vsub.s32 32, %v108_v23  ;;  %v110_v32 = vshll.u32 %v101_v17, %v108_v23 }
  0x36   :  { %v114_v30 = vadd.s32 127, %v113_v25  ;;  %v111_v33 = vshrl.u32 %v93_v27, %v109_v28 }
  0x38   :  { %v115_v34 = vshll.u32 %v114_v30, 23  ;;  %v112_v35 = vor.u32 %v111_v33, %v110_v32 }
  0x3a   :  { %v116_v36 = vor.u32 4788187, %v115_v34  ;;  %v119_v38 = vcvt.s32.f32 %v112_v35 }
  0x3c   :  { %v117_v37 = vand.u32 2147483647, %v116_v36 }
  0x3e   :  { %v120_v40 = vmul.f32 %v119_v38, %v117_v37 }
  0x40   :  { %v121_v41 = vxor.u32 2147483648, %v120_v40 }
  0x42   :  { %v122_v42 = vsel %vm39_vm8, %v121_v41, %v120_v40 }
  0x43   :  { %v125_v44 = vsel %vm38_vm9, %v3067_v6, %v122_v42 }
  0x44   :  { %2859 = vcosq.f32 %v125_v44 }
  0x45   :  { %2861 = vsinq.f32 %v125_v44 }
  0x4e   :  { %v2860_v49 = vpop.eup %2859 }
  0x4f   :  { %v2862_v50 = vpop.eup %2861  ;;  %v136_v53 = vxor.u32 2147483648, %v2860_v49 }
  0x50   :  { %v133_v52 = vxor.u32 2147483648, %v2862_v50 }
  0x51   :  { %v137_v57 = vsel %vm135_vm11, %v136_v53, %v2862_v50  ;;  %v241_v59 = vsel %vm239_vm13, %v136_v53, %v2862_v50 }
  0x52   :  { %v134_v56 = vsel %vm132_vm10, %v2860_v49, %v133_v52  ;;  %v238_v58 = vsel %vm236_vm12, %v2860_v49, %v133_v52 }
  0x53   :  { %v138_v62 = vsel %vm131_vm14, %v134_v56, %v137_v57  ;;  %v242_v1 = vsel %vm235_vm15, %v238_v58, %v241_v59 }
  0x54   :  { %v139_v2 = vsel %vm129_vm0, nan, %v138_v62  ;;  %v243_v7 = vsel %vm129_vm0, nan, %v242_v1  ;;  %v540_v1 = vld [vmem:[%s3628_s1] sm:$0x1] }
  0x55   :  { %v276_v11 = vrot.slane %v139_v2, %v3147_v3  ;;  %v302_v12 = vrot.slane %v243_v7, %v3147_v3  ;;  %v541_v2 = vmul.f32 0.15915494, %v540_v1 }
  0x57   :  { %v542_v7 = vfloor.f32 %v541_v2 }
  0x81   :  { %v284_v55 = vpop.permute.xlu1 %283  ;;  %v292_v10 = vpop.permute.xlu0 %291 }
  0x82   :  { %v304_v17 = vmul.f32 %v302_v12, %v284_v55  ;;  %v306_v34 = vmul.f32 %v302_v12, %v292_v10 }
  0x85   :  { %v288_v61 = vpop.permute.xlu1 %287 }
  0x86   :  { %v255_v63 = vpop.permute.xlu0 %254  ;;  %v305_v18 = vmul.f32 %v302_v12, %v288_v61 }
  0x87   :  { %v278_v14 = vmul.f32 %v276_v11, %v255_v63  ;;  %v2849_v63 = vld [vmem:[%s3627_s6] sm:$0x3f]  }
  0x89   :  { %v308_v21 = vadd.f32 %v304_v17, %v278_v14 }
  0x8a   :  { %v260_v8 = vpop.permute.xlu0 %259  ;;  %v270_v9 = vpop.permute.xlu1 %269 }
  0x8b   :  { %v279_v15 = vmul.f32 %v276_v11, %v260_v8  ;;  %v281_v35 = vmul.f32 %v276_v11, %v270_v9  ;;  %v543_v8 = vmul.f32 6.2831855, %v542_v7 }
  0x8d   :  { %v309_v20 = vadd.f32 %v305_v18, %v279_v15  ;;  %v544_v9 = vsub.f32 %v540_v1, %v543_v8 }
  0x8e   :  { %v265_v13 = vpop.permute.xlu0 %264 }
  0x8f   :  { %v296_v16 = vpop.permute.xlu1 %295  ;;  %v280_v28 = vmul.f32 %v276_v11, %v265_v13  ;;  %v545_v11 = vmul.f32 0.15915494, %v544_v9 }
  0x90   :  { %v307_v30 = vmul.f32 %v302_v12, %v296_v16 }
  0x91   :  { %v310_v36 = vadd.f32 %v306_v34, %v280_v28  ;;  %v546_v12 = vmax.f32 %v545_v11, 1e-06 }
  0x92   :  { %v320_v19 = vpop.permute.xlu0 %319  ;;  %v311_v37 = vadd.f32 %v307_v30, %v281_v35 }
  0x93   :  { %v333_v25 = vadd.f32 %v320_v19, %v309_v20  ;;  %v547_v13 = vmin.f32 %v546_v12, 0.999999 }
  0x94   :  { %v315_v23 = vpop.permute.xlu1 %314 }
  0x95   :  { %v332_v27 = vadd.f32 %v315_v23, %v308_v21  ;;  %v548_v14 = vsub.f32 1.0, %v547_v13  ;;  %v557_v15 = vmul.f32 2.0, %v547_v13  ;;  %v549_v17 = vmul.f32 %v547_v13, %v547_v13 }
  0x96   :  { %v351_v47 = vpop.permute.xlu0 %350 }
  0x97   :  { %v336_v32 = vpack.c.bf16 %v333_v25, %v332_v27  ;;  %v3169_v16 = vmul.f32 %v557_v15, %v548_v14  ;;  %v550_v18 = vmul.f32 %v548_v14, %v548_v14 }
  0x98   :  { %v325_v33 = vpop.permute.xlu1 %324 }
  0x99   :  { %2863 = vtanh.bf16 %v336_v32  ;;  %v334_v40 = vadd.f32 %v325_v33, %v310_v36  ;;  %v551_v19 = vadd.f32 %v550_v18, %v549_v17 }
  0x9a   :  { %v361_v50 = vpop.permute.xlu0 %360 }
  0x9c   :  { %v330_v38 = vpop.permute.xlu1 %329 }
  0x9d   :  { %v335_v41 = vadd.f32 %v330_v38, %v311_v37 }
  0x9e   :  { %v445_v25 = vpop.permute.xlu0 %444 }
  0x9f   :  { %v337_v42 = vpack.c.bf16 %v335_v41, %v334_v40 }
  0xa0   :  { %v356_v48 = vpop.permute.xlu1 %355 }
  0xa1   :  { %2865 = vtanh.bf16 %v337_v42 }
  0xa4   :  { %v2864_v43 = vpop.eup %2863  ;;  %v366_v52 = vpop.permute.xlu1 %365 }
  0xa5   :  { %2724 = vmatprep.subr.bf16.mxu0 %v2864_v43 }
  0xa6   :  { %2725 = vmatpush3.bf16.msra.mxu0 %v2864_v43 }
  0xa8   :  { %v450_v32 = vpop.permute.xlu1 %449 }
  0xac   :  { %v2866_v44 = vpop.eup %2865 }
  0xad   :  { %2726 = vmatprep.subr.bf16.mxu0 %v2866_v44 }
  0xae   :  { %2727 = vmatpush3.bf16.msra.mxu0 %v2866_v44 }
  0xb1   :  { %2729 = vmatmul.mubr.msk.bf16.vlgmr.msra.gmra.mrb[0].mxu0 %vm378_vm6, %v2848_v45 }
 0x184   :  { %v2730_v49 = vpop.f32.mrb[0].mxu0 }
 0x185   :  { %v419_v51 = vpop.f32.mrb[1].mxu0  ;;  %v428_v55 = vadd.f32 %v2730_v49, %v361_v50 }
 0x186   :  { %v2731_v53 = vpop.f32.mrb[2].mxu0  ;;  %v420_v57 = vadd.f32 %v419_v51, %v351_v47 }
 0x187   :  { %v431_v10 = vadd.f32 %v2731_v53, %v366_v52  ;;  %v422_v56 = vpop.f32.mrb[3].mxu0 }
 0x188   :  { %v423_v58 = vadd.f32 %v422_v56, %v356_v48 }
 0x189   :  { %v435_v59 = vpack.c.bf16 %v431_v10, %v428_v55 }
 0x18a   :  { %v434_v60 = vpack.c.bf16 %v423_v58, %v420_v57 }
 0x18c   :  { %2867 = vtanh.bf16 %v434_v60 }
 0x18d   :  { %2869 = vtanh.bf16 %v435_v59 }
 0x18e   :  { %2871 = vrcp.f32 %v551_v19 }
 0x197   :  { %v2868_v61 = vpop.eup %2867 }
 0x198   :  { %2733 = vmatpush3.bf16.msra.mxu1 %v2868_v61  ;;  %v2870_v62 = vpop.eup %2869 }
 0x199   :  { %2734 = vmatprep.subr.bf16.mxu1 %v2987_v46  ;;  %v2872_v20 = vpop.eup %2871 }
 0x19a   :  { %v553_v21 = vmul.f32 %v2872_v20, %v551_v19 }
 0x19c   :  { %2735 = vmatpush3.bf16.msra.mxu1 %v2870_v62  ;;  %v554_v23 = vsub.f32 2.0, %v553_v21 }
 0x19d   :  { %2748 = vmatprep.subr.bf16.mxu1 %v2987_v46 }
 0x19e   :  { %v3171_v33 = vmul.f32 %v2872_v20, %v554_v23 }
 0x19f   :  { %2737 = vmatmul.mubr.msk.bf16.vlgmr.msra.gmra.mrb[0].mxu1 %vm378_vm6, %v2849_v63 }
 0x1a0   :  { %2752 = vmatprep.mubr.msk.bf16.mxu1 %vm2988_vm1, %v2987_v46  ;;  %v556_v41 = vmul.f32 %v3171_v33, %v549_v17 }
 0x1a2   :  { %v2580_v47 = vadd.f32 -0.5, %v556_v41 }
 0x1a4   :  { %v566_v50 = vrot.slane %v2580_v47, %v3147_v3 }
 0x272   :  { %v494_v27 = vpop.f32.mrb[0].mxu1 }
 0x273   :  { %v495_v28 = vadd.f32 %v494_v27, %v445_v25  ;;  %v2738_v30 = vpop.f32.mrb[1].mxu1 }
 0x274   :  { %v497_v34 = vpop.f32.mrb[2].mxu1 }
 0x275   :  { %v2579_v35 = vclamps-f32 %v495_v28, 8.0  ;;  %v498_v36 = vadd.f32 %v497_v34, %v450_v32  ;;  %v2739_v37 = vpop.f32.mrb[3].mxu1  ;;  %v570_v10 = vrot.slane %v495_v28, 4  ;;  %v633_v34 = vadd.f32 3.1415927, %v3067_v6 }
 0x277   :  { %v503_v38 = vmul.f32 1.442695, %v2579_v35  ;;  %v506_v40 = vrot.slane %v498_v36, 1  ;;  %v509_v43 = vrot.slane %v498_v36, 2  ;;  %v512_v45 = vrot.slane %v498_v36, 3 }
 0x279   :  { %2873 = vpow2.f32 %v503_v38  ;;  %v508_v42 = vmax.f32 %v498_v36, %v506_v40 }
 0x27b   :  { %v511_v44 = vmax.f32 %v508_v42, %v509_v43 }
 0x27d   :  { %v514_v48 = vmax.f32 %v511_v44, %v512_v45 }
 0x27f   :  { %v518_v49 = vrot.slane %v514_v48, %v3147_v3 }
 0x281   :  { %v519_v51 = vsub.f32 %v498_v36, %v518_v49  ;;  %v634_v36 = vmul.f32 0.15915494, %v633_v34 }
 0x283   :  { %v2874_v52 = vpop.eup %2873  ;;  %v520_v53 = vmul.f32 1.442695, %v519_v51  ;;  %v635_v38 = vfloor.f32 %v634_v36  ;;  %v2595_v36 = vld [vmem:[%s3623_s3 + $0x28] sm:$0xff] }
 0x284   :  { %v568_v55 = vmul.f32 %v2874_v52, %v566_v50  ;;  %v577_v56 = vmul.f32 0.5, %v2874_v52 }
 0x285   :  { %2875 = vpow2.f32 %v520_v53  ;;  %v636_v43 = vmul.f32 6.2831855, %v635_v38  ;;  %v2596_v38 = vld [vmem:[%s3623_s3 + $0x30] sm:$0xff] }
 0x286   :  { %v572_v57 = vadd.f32 %v570_v10, %v568_v55  ;;  %v579_v58 = vrot.slane %v577_v56, 4 }
 0x287   :  { %v637_v49 = vsub.f32 %v633_v34, %v636_v43  ;;  %v2597_v34 = vld [vmem:[%s3623_s3 + $0x38] sm:$0xff]  ;;  %v2612_v43 = vld [vmem:[%s3625_s7 + $0x10] sm:$0xff] }
 0x288   :  { %v573_v59 = vmul.f32 0.5, %v572_v57  ;;  %v581_v60 = vsub.f32 %v495_v28, %v579_v58  ;;  %v586_v61 = vadd.f32 %v579_v58, %v495_v28  ;;  %v559_v57 = vmul.f32 %v3169_v16, %v3171_v33 }
 0x289   :  { %v2581_v6 = vadd.f32 -3.1415927, %v637_v49 }
 0x28a   :  { %2877 = vtanh.f32 %v573_v59  ;;  %v582_v62 = vmul.f32 0.5, %v581_v60  ;;  %v587_v63 = vmul.f32 0.5, %v586_v61 }
 0x28b   :  { %v639_v60 = vmul.f32 0.5, %v2581_v6 }
 0x28c   :  { %2879 = vtanh.f32 %v582_v62 }
 0x28d   :  { %2881 = vtanh.f32 %v587_v63 }
 0x28f   :  { %v2876_v1 = vpop.eup %2875 }
 0x290   :  { %v523_v2 = vrot.slane %v2876_v1, 1  ;;  %v526_v8 = vrot.slane %v2876_v1, 2  ;;  %v529_v12 = vrot.slane %v2876_v1, 3 }
 0x292   :  { %v525_v7 = vadd.f32 %v2876_v1, %v523_v2  ;;  %v560_v2 = vmul.f32 %v559_v57, %v3171_v33  ;;  %v3185_v33 = vand.u32 127, %v32_v54  ;;  %v2590_v54 = vld [vmem:[%s3621_s2 + $0x20] sm:$0xff] }
 0x294   :  { %v2878_v9 = vpop.eup %2877  ;;  %v528_v11 = vadd.f32 %v526_v8, %v525_v7  ;;  %vm34_vm3 = vcmp.lt.s32.totalorder %v3185_v33, 32 }
 0x295   :  { %v575_v13 = vadd.f32 1.0, %v2878_v9 }
 0x296   :  { %v2880_v14 = vpop.eup %2879  ;;  %v531_v15 = vadd.f32 %v529_v12, %v528_v11 }
 0x297   :  { %v2882_v17 = vpop.eup %2881  ;;  %v576_v18 = vmul.f32 0.5, %v575_v13  ;;  %v584_v19 = vadd.f32 1.0, %v2880_v14  ;;  %v640_v13 = vadd.f32 %v639_v60, %v3063_v5 }
 0x298   :  { %v589_v20 = vadd.f32 1.0, %v2882_v17  ;;  %2883 = vrcp.f32 %v531_v15 }
 0x299   :  { %v585_v21 = vmul.f32 0.5, %v584_v19  ;;  %v605_v23 = vmul.f32 %v2874_v52, %v576_v18  ;;  %v606_v25 = vsub.f32 1.0, %v576_v18 }
 0x29a   :  { %v590_v27 = vmul.f32 0.5, %v589_v20 }
 0x29b   :  { %v607_v28 = vmul.f32 %v606_v25, %v605_v23  ;;  %v598_v45 = vrot.slane %v585_v21, 4  ;;  %v3188_v23 = vand.u32 15, %v3185_v33 }
 0x29c   :  { %v591_v30 = vsub.f32 %v590_v27, %v585_v21 }
 0x29d   :  { %v600_v50 = vsub.f32 %v576_v18, %v598_v45  ;;  %vm650_vm2 = vcmp.eq.s32.totalorder %v3188_v23, 8  ;;  %vm663_vm5 = vcmp.ge.s32.totalorder %v3188_v23, 8 }
 0x29e   :  { %v592_v32 = vmax.f32 %v591_v30, 1e-12  ;;  %vm651_vm4 = vmand %vm650_vm2, %vm34_vm3  ;;  %v2594_v30 = vld [vmem:[%s3623_s3 + $0x20] sm:$0xff] }
 0x2a0   :  { %2885 = vrcp.f32 %v592_v32 }
 0x2a2   :  { %v2884_v35 = vpop.eup %2883 }
 0x2a3   :  { %v536_v37 = vrot.slane %v2884_v35, %v3147_v3  ;;  %v2603_v35 = vld [vmem:[%s3624_s5 + $0x28] sm:$0xff] }
 0x2a5   :  { %v537_v42 = vmul.f32 %v2876_v1, %v536_v37  ;;  %v2605_v37 = vld [vmem:[%s3624_s5 + $0x38] sm:$0xff] }
 0x2a7   :  { %v538_v48 = vmul.f32 0.96, %v537_v42  ;;  %v2604_v42 = vld [vmem:[%s3624_s5 + $0x30] sm:$0xff] }
 0x2a9   :  { %v539_v55 = vadd.f32 0.01, %v538_v48 }
 0x2aa   :  { %v2886_v40 = vpop.eup %2885 }
 0x2ab   :  { %v594_v41 = vmul.f32 %v2886_v40, %v592_v32  ;;  %v2593_v32 = vld [vmem:[%s3621_s2 + $0x38] sm:$0xff] }
 0x2ad   :  { %v595_v44 = vsub.f32 2.0, %v594_v41  ;;  %v2602_v41 = vld [vmem:[%s3624_s5 + $0x20] sm:$0xff] }
 0x2af   :  { %v596_v47 = vmul.f32 %v2886_v40, %v595_v44  ;;  %v2613_v40 = vld [vmem:[%s3625_s7 + $0x18] sm:$0xf]  ;;  %v2850_v44 = vld [vmem:[%s3626_s4 + $0x10] sm:$0xff]  }
 0x2b0   :  { %2744 = vmatprep.mubr.msk.bf16.mxu0 %vm378_vm6, %v2850_v44 }
 0x2b1   :  { %v602_v51 = vrot.slane %v596_v47, 4 }
 0x2b3   :  { %v604_v52 = vmul.f32 %v602_v51, %v600_v50  ;;  %v608_v53 = vmul.f32 %v607_v28, %v602_v51  ;;  %v2591_v28 = vld [vmem:[%s3621_s2 + $0x28] sm:$0xff] }
 0x2b5   :  { %v609_v10 = vmul.f32 %v604_v52, %v539_v55  ;;  %v620_v56 = vmul.f32 %v608_v53, %v539_v55 }
 0x2b7   :  { %v611_v58 = vrot.slane %v609_v10, 1  ;;  %v622_v59 = vrot.slane %v620_v56, 1  ;;  %v614_v62 = vrot.slane %v609_v10, 2  ;;  %v625_v1 = vrot.slane %v620_v56, 2 }
 0x2b8   :  { %v617_v8 = vrot.slane %v609_v10, 3  ;;  %v628_v11 = vrot.slane %v620_v56, 3 }
 0x2b9   :  { %v613_v61 = vadd.f32 %v611_v58, %v609_v10  ;;  %v624_v63 = vadd.f32 %v622_v59, %v620_v56 }
 0x2bb   :  { %v616_v7 = vadd.f32 %v614_v62, %v613_v61  ;;  %v627_v9 = vadd.f32 %v625_v1, %v624_v63 }
 0x2bd   :  { %v619_v12 = vadd.f32 %v617_v8, %v616_v7  ;;  %v630_v14 = vadd.f32 %v628_v11, %v627_v9 }
 0x2bf   :  { %v641_v15 = vmul.f32 6.2831855, %v619_v12  ;;  %v3182_v17 = vmul.f32 %v630_v14, %v560_v2 }
 0x2c1   :  { %v642_v16 = vadd.f32 %v641_v15, %v640_v13 }
 0x2c3   :  { %v643_v18 = vmul.f32 0.15915494, %v642_v16 }
 0x2c5   :  { %v644_v19 = vfloor.f32 %v643_v18 }
 0x2c7   :  { %v645_v20 = vmul.f32 6.2831855, %v644_v19 }
 0x2c9   :  { %v646_v21 = vsub.f32 %v642_v16, %v645_v20 }
 0x2cb   :  { %656 = vrot.lane.b32.xlu0 %v646_v21, %s2989_s24 }
 0x33d   :  { %v657_v25 = vpop.permute.xlu0 %656 }
 0x33e   :  { %v3195_v27 = vsel %vm651_vm4, %v657_v25, %v3063_v5  ;;  %v2592_v5 = vld [vmem:[%s3621_s2 + $0x30] sm:$0xff] }
 0x33f   :  { %661 = vrot.lane.b32.xlu0 %v3195_v27, %s2989_s24  ;;  %659 = vrot.lane.b32.xlu1 %v3195_v27, %s2990_s25 }
 0x343   :  { %885 = vperm.xlu1 %2828, %v2590_v54   ;;  %916 = vperm.xlu0 %2830, %v2591_v28  }
 0x347   :  { %2829 = vset.pattern.permute.xlu1 %v2979_v0  ;;  %920 = vperm.xlu0 %2830, %v2592_v5  }
 0x348   :  { %912 = vperm.xlu1 %2829, %v2590_v54  }
 0x34b   :  { %2832 = vset.pattern.permute.xlu0 %v2980_v4 }
 0x34c   :  { %2831 = vset.pattern.permute.xlu1 %v2980_v4  ;;  %890 = vperm.xlu0 %2832, %v2591_v28  }
 0x34d   :  { %895 = vperm.xlu1 %2831, %v2592_v5  }
 0x350   :  { %941 = vperm.xlu0 %2832, %v2594_v30  }
 0x351   :  { %900 = vperm.xlu1 %2831, %v2593_v32  }
 0x354   :  { %956 = vperm.xlu0 %2832, %v2597_v34  }
 0x355   :  { %2833 = vset.pattern.permute.xlu1 %v2979_v0 }
 0x356   :  { %924 = vperm.xlu1 %2833, %v2593_v32  }
 0x358   :  { %984 = vperm.xlu0 %2832, %v2603_v35  }
 0x35a   :  { %2834 = vset.pattern.permute.xlu1 %v2980_v4 }
 0x35b   :  { %946 = vperm.xlu1 %2834, %v2595_v36  }
 0x35c   :  { %994 = vperm.xlu0 %2832, %v2605_v37  }
 0x35f   :  { %951 = vperm.xlu1 %2834, %v2596_v38  }
 0x360   :  { %1079 = vperm.xlu0 %2832, %v2613_v40  }
 0x363   :  { %979 = vperm.xlu1 %2834, %v2602_v41  }
 0x364   :  { %2835 = vset.pattern.permute.xlu0 %v2979_v0 }
 0x367   :  { %989 = vperm.xlu1 %2834, %v2604_v42  }
 0x36b   :  { %1074 = vperm.xlu1 %2834, %v2612_v43  }
 0x3b1   :  { %v662_v45 = vpop.permute.xlu0 %661  ;;  %v660_v47 = vpop.permute.xlu1 %659 }
 0x3b2   :  { %v3252_v48 = vsel %vm663_vm5, %v662_v45, %v660_v47 }
 0x3b3   :  { %v3256_v49 = vsub.f32 %v3195_v27, %v3252_v48 }
 0x3b5   :  { %v669_v50 = vand.u32 2139095040, %v3256_v49  ;;  %v666_v55 = vand.u32 2147483647, %v3256_v49  ;;  %vm668_vm14 = vcmp.lt.s32.totalorder %v3256_v49, 0 }
 0x3b7   :  { %v670_v51 = vshrl.u32 %v669_v50, 23  ;;  %v673_v56 = vand.u32 8388607, %v666_v55  ;;  %vm667_vm15 = vcmp.le.f32.partialorder %v666_v55, 0.7853982 }
 0x3b9   :  { %v2582_v52 = vadd.s32 4294967169, %v670_v51  ;;  %v674_v11 = vor.u32 8388608, %v673_v56 }
 0x3bb   :  { %v676_v53 = vadd.s32 1, %v2582_v52  ;;  %v714_v30 = vshll.u32 %v674_v11, 8 }
 0x3bd   :  { %vm677_vm7 = vcmp.gt.s32.totalorder %v676_v53, 0 }
 0x3be   :  { %v678_v6 = vsel %vm677_vm7, %v676_v53, 0 }
 0x3bf   :  { %v680_v10 = vand.u32 31, %v678_v6  ;;  %v679_v58 = vshrl.u32 %v678_v6, 5 }
 0x3c1   :  { %v681_v57 = vsub.s32 32, %v680_v10  ;;  %v683_v59 = vshll.u32 %v2981_v22, %v680_v10  ;;  %v686_v60 = vshll.u32 %v2982_v24, %v680_v10  ;;  %v689_v63 = vshll.u32 %v2983_v26, %v680_v10 }
 0x3c2   :  { %v692_v2 = vshll.u32 %v2984_v29, %v680_v10  ;;  %v695_v8 = vshll.u32 %v2985_v31, %v680_v10  ;;  %vm698_vm8 = vcmp.lt.s32.totalorder %v679_v58, 1  ;;  %vm701_vm9 = vcmp.lt.s32.totalorder %v679_v58, 4 }
 0x3c3   :  { %v684_v61 = vshrl.u32 %v2982_v24, %v681_v57  ;;  %v687_v62 = vshrl.u32 %v2983_v26, %v681_v57  ;;  %v690_v1 = vshrl.u32 %v2984_v29, %v681_v57  ;;  %v693_v7 = vshrl.u32 %v2985_v31, %v681_v57 }
 0x3c4   :  { %v696_v9 = vshrl.u32 %v2986_v39, %v681_v57  ;;  %v682_v21 = vshrl.u32 %v2981_v22, %v681_v57  ;;  %vm700_vm10 = vcmp.lt.s32.totalorder %v679_v58, 3  ;;  %vm699_vm11 = vcmp.lt.s32.totalorder %v679_v58, 2 }
 0x3c5   :  { %v685_v12 = vor.u32 %v684_v61, %v683_v59  ;;  %v688_v13 = vor.u32 %v687_v62, %v686_v60  ;;  %v691_v14 = vor.u32 %v690_v1, %v689_v63  ;;  %v694_v15 = vor.u32 %v693_v7, %v692_v2 }
 0x3c6   :  { %v697_v16 = vor.u32 %v696_v9, %v695_v8  ;;  %v886_v8 = vpop.permute.xlu1 %885 }
 0x3c7   :  { %v703_v18 = vsel %vm701_vm9, %v691_v14, 2102212464  ;;  %v706_v19 = vsel %vm698_vm8, %v685_v12, %v688_v13  ;;  %v710_v20 = vsel %vm698_vm8, %v688_v13, %v691_v14  ;;  %v707_v25 = vsel %vm701_vm9, %v694_v15, 920167782 }
 0x3c8   :  { %v711_v54 = vsel %vm701_vm9, %v697_v16, 1326507024  ;;  %v708_v28 = vsel %vm700_vm10, %v691_v14, %v707_v25  ;;  %v702_v32 = vsel %vm698_vm8, %v682_v21, %v685_v12  ;;  %v704_v34 = vsel %vm700_vm10, %v688_v13, %v703_v18  ;;  %v917_v21 = vpop.permute.xlu0 %916 }
 0x3c9   :  { %v712_v5 = vsel %vm700_vm10, %v694_v15, %v711_v54  ;;  %v709_v35 = vsel %vm699_vm11, %v706_v19, %v708_v28  ;;  %v705_v42 = vsel %vm699_vm11, %v702_v32, %v704_v34  ;;  %vm758_vm9 = vweird.f32 %v3256_v49 }
 0x3ca   :  { %v713_v36 = vsel %vm699_vm11, %v710_v20, %v712_v5  ;;  %v3276_v40 = vmul.u32.u64.low %v714_v30, %v709_v35  ;;  %v3277_v41 = vmul.u32.u64.high %v714_v30, %v709_v35, %v3276_v40  ;;  %v721_v44 = vmul.u32 %v714_v30, %v705_v42  ;;  %v913_v13 = vpop.permute.xlu1 %912 }
 0x3cb   :  { %v3273_v37 = vmul.u32.u64.low %v714_v30, %v713_v36  ;;  %v3274_v38 = vmul.u32.u64.high %v714_v30, %v713_v36, %v3273_v37  ;;  %vm648_vm10 = vcmp.eq.s32.totalorder %v3188_v23, 0 }
 0x3cc   :  { %v724_v43 = vadd.s32 1, %v3277_v41  ;;  %v921_v5 = vpop.permute.xlu0 %920  ;;  %vm649_vm11 = vmand %vm648_vm10, %vm34_vm3 }
 0x3cd   :  { %vm723_vm12 = vc.u32 %v3274_v38, %v3276_v40  ;;  %v722_v59 = vadd.s32 %v3276_v40, %v3274_v38 }
 0x3ce   :  { %v725_v45 = vsel %vm723_vm12, %v724_v43, %v3277_v41  ;;  %v896_v25 = vpop.permute.xlu1 %895 }
 0x3cf   :  { %v726_v47 = vadd.s32 %v725_v45, %v721_v44 }
 0x3d0   :  { %v891_v38 = vpop.permute.xlu0 %890 }
 0x3d1   :  { %v727_v50 = vadd.s32 536870912, %v726_v47 }
 0x3d2   :  { %v901_v30 = vpop.permute.xlu1 %900 }
 0x3d3   :  { %v728_v51 = vshrl.u32 %v727_v50, 30 }
 0x3d5   :  { %v729_v52 = vshll.u32 %v728_v51, 30  ;;  %v752_v15 = vsub.s32 4, %v728_v51 }
 0x3d6   :  { %v925_v40 = vpop.permute.xlu1 %924 }
 0x3d7   :  { %v730_v53 = vsub.s32 %v726_v47, %v729_v52  ;;  %v753_v19 = vsel %vm668_vm14, %v752_v15, %v728_v51 }
 0x3d8   :  { %v755_v54 = vsel %vm667_vm15, 0, %v753_v19 }
 0x3d9   :  { %v732_v6 = vsub.s32 0, %v730_v53  ;;  %v862_v28 = vadd.s32 3, %v755_v54  ;;  %v759_v32 = vand.u32 3, %v755_v54 }
 0x3db   :  { %v2583_v10 = vmin.u32 %v732_v6, %v730_v53  ;;  %v863_v34 = vand.u32 3, %v862_v28  ;;  %vm764_vm0 = vcmp.eq.s32.totalorder %v759_v32, 2  ;;  %vm761_vm4 = vcmp.eq.s32.totalorder %v759_v32, 0  ;;  %v942_v6 = vpop.permute.xlu0 %941 }
 0x3dc   :  { %vm760_vm7 = vcmp.lt.s32.totalorder %v759_v32, 2 }
 0x3dd   :  { %v734_v56 = vclz %v2583_v10  ;;  %vm868_vm2 = vcmp.eq.s32.totalorder %v863_v34, 2  ;;  %vm865_vm5 = vcmp.eq.s32.totalorder %v863_v34, 0  ;;  %vm864_vm8 = vcmp.lt.s32.totalorder %v863_v34, 2  ;;  %v947_v10 = vpop.permute.xlu1 %946 }
 0x3df   :  { %v2584_v57 = vadd.s32 4294967294, %v734_v56 }
 0x3e1   :  { %vm2585_vm13 = vcmp.lt.s32.totalorder %v2584_v57, 0 }
 0x3e2   :  { %v737_v58 = vsel %vm2585_vm13, 0, %v2584_v57 }
 0x3e3   :  { %v738_v60 = vsub.s32 32, %v737_v58  ;;  %v742_v61 = vsub.s32 4294967266, %v737_v58  ;;  %v739_v62 = vshll.u32 %v730_v53, %v737_v58 }
 0x3e5   :  { %v740_v63 = vshrl.u32 %v722_v59, %v738_v60  ;;  %v743_v1 = vadd.s32 127, %v742_v61 }
 0x3e7   :  { %v741_v2 = vor.u32 %v740_v63, %v739_v62  ;;  %v744_v7 = vshll.u32 %v743_v1, 23 }
 0x3e9   :  { %v745_v9 = vor.u32 4788187, %v744_v7  ;;  %v748_v12 = vcvt.s32.f32 %v741_v2 }
 0x3eb   :  { %v746_v11 = vand.u32 2147483647, %v745_v9 }
 0x3ed   :  { %v749_v14 = vmul.f32 %v748_v12, %v746_v11  ;;  %v957_v11 = vpop.permute.xlu0 %956  ;;  %v952_v12 = vpop.permute.xlu1 %951 }
 0x3ef   :  { %v750_v16 = vxor.u32 2147483648, %v749_v14 }
 0x3f1   :  { %v751_v18 = vsel %vm668_vm14, %v750_v16, %v749_v14 }
 0x3f2   :  { %v754_v20 = vsel %vm667_vm15, %v3256_v49, %v751_v18 }
 0x3f3   :  { %2887 = vcosq.f32 %v754_v20 }
 0x3f4   :  { %2889 = vsinq.f32 %v754_v20  ;;  %v2851_v20 = vld [vmem:[%s3626_s4 + $0x18] sm:$0xff]  }
 0x3fd   :  { %v2888_v35 = vpop.eup %2887 }
 0x3fe   :  { %v2890_v36 = vpop.eup %2889  ;;  %v765_v37 = vxor.u32 2147483648, %v2888_v35 }
 0x3ff   :  { %v762_v55 = vxor.u32 2147483648, %v2890_v36 }
 0x400   :  { %v766_v41 = vsel %vm764_vm0, %v765_v37, %v2890_v36  ;;  %v870_v42 = vsel %vm868_vm2, %v765_v37, %v2890_v36  ;;  %vm1295_vm0 = vcmp.ge.s32.totalorder %v3188_v23, 12 }
 0x401   :  { %v763_v43 = vsel %vm761_vm4, %v2888_v35, %v762_v55  ;;  %v867_v44 = vsel %vm865_vm5, %v2888_v35, %v762_v55 }
 0x402   :  { %v767_v45 = vsel %vm760_vm7, %v763_v43, %v766_v41  ;;  %v871_v47 = vsel %vm864_vm8, %v867_v44, %v870_v42  ;;  %v2852_v43 = vld [vmem:[%s3627_s6 + $0x8] sm:$0x3f]   ;;  %v2617_v44 = vld [vmem:[%s3628_s1 + $0x1] sm:$0x1] }
 0x403   :  { %v768_v50 = vsel %vm758_vm9, nan, %v767_v45  ;;  %v872_v51 = vsel %vm758_vm9, nan, %v871_v47  ;;  %v1172_v45 = vmul.f32 0.15915494, %v2617_v44 }
 0x404   :  { %v906_v52 = vrot.slane %v768_v50, %v3147_v3  ;;  %v930_v53 = vrot.slane %v872_v51, %v3147_v3 }
 0x405   :  { %v1173_v47 = vfloor.f32 %v1172_v45 }
 0x406   :  { %v907_v56 = vmul.f32 %v906_v52, %v886_v8  ;;  %v932_v57 = vmul.f32 %v930_v53, %v917_v21  ;;  %v931_v58 = vmul.f32 %v930_v53, %v913_v13  ;;  %v933_v59 = vmul.f32 %v930_v53, %v921_v5  ;;  %v985_v21 = vpop.permute.xlu0 %984 }
 0x407   :  { %v909_v60 = vmul.f32 %v906_v52, %v896_v25  ;;  %v908_v61 = vmul.f32 %v906_v52, %v891_v38  ;;  %v910_v62 = vmul.f32 %v906_v52, %v901_v30  ;;  %v934_v63 = vmul.f32 %v930_v53, %v925_v40  ;;  %v980_v25 = vpop.permute.xlu1 %979 }
 0x408   :  { %v935_v1 = vadd.f32 %v931_v58, %v907_v56  ;;  %v1174_v50 = vmul.f32 6.2831855, %v1173_v47 }
 0x409   :  { %v938_v49 = vadd.f32 %v934_v63, %v910_v62  ;;  %v936_v2 = vadd.f32 %v932_v57, %v908_v61  ;;  %v937_v7 = vadd.f32 %v933_v59, %v909_v60 }
 0x40a   :  { %v959_v9 = vadd.f32 %v942_v6, %v935_v1  ;;  %v995_v28 = vpop.permute.xlu0 %994  ;;  %v1175_v51 = vsub.f32 %v2617_v44, %v1174_v50 }
 0x40b   :  { %v962_v14 = vadd.f32 %v957_v11, %v938_v49  ;;  %v960_v15 = vadd.f32 %v947_v10, %v936_v2  ;;  %v961_v16 = vadd.f32 %v952_v12, %v937_v7  ;;  %v990_v30 = vpop.permute.xlu1 %989 }
 0x40c   :  { %v1176_v52 = vmul.f32 0.15915494, %v1175_v51 }
 0x40d   :  { %v963_v18 = vpack.c.bf16 %v960_v15, %v959_v9  ;;  %v964_v19 = vpack.c.bf16 %v962_v14, %v961_v16 }
 0x40e   :  { %v1177_v53 = vmax.f32 %v1176_v52, 1e-06  ;;  %v1080_v2 = vpop.permute.xlu0 %1079 }
 0x40f   :  { %2891 = vtanh.bf16 %v963_v18  ;;  %v1075_v62 = vpop.permute.xlu1 %1074 }
 0x410   :  { %2893 = vtanh.bf16 %v964_v19  ;;  %v3305_v6 = vmin.f32 %v1177_v53, 0.999999 }
 0x412   :  { %v3308_v10 = vsub.f32 1.0, %v3305_v6  ;;  %v1180_v56 = vmul.f32 %v3305_v6, %v3305_v6 }
 0x414   :  { %v1181_v57 = vmul.f32 %v3308_v10, %v3308_v10 }
 0x416   :  { %v1182_v58 = vadd.f32 %v1181_v57, %v1180_v56 }
 0x41a   :  { %v2892_v8 = vpop.eup %2891 }
 0x41b   :  { %2740 = vmatprep.subr.bf16.mxu0 %v2892_v8  ;;  %v2894_v13 = vpop.eup %2893 }
 0x41c   :  { %2741 = vmatpush3.bf16.msra.mxu0 %v2892_v8 }
 0x41d   :  { %2742 = vmatprep.subr.bf16.mxu0 %v2894_v13 }
 0x420   :  { %2743 = vmatpush3.bf16.msra.mxu0 %v2894_v13 }
 0x423   :  { %2745 = vmatmul.mubr.msk.bf16.vlgmr.msra.gmra.mrb[4].mxu0 %vm378_vm6, %v2851_v20 }
 0x4f6   :  { %v2746_v54 = vpop.f32.mrb[4].mxu0 }
 0x4f7   :  { %v1047_v5 = vpop.f32.mrb[5].mxu0  ;;  %v1056_v34 = vadd.f32 %v2746_v54, %v990_v30 }
 0x4f8   :  { %v2747_v32 = vpop.f32.mrb[6].mxu0  ;;  %v1048_v37 = vadd.f32 %v1047_v5, %v980_v25 }
 0x4f9   :  { %v1059_v35 = vadd.f32 %v2747_v32, %v995_v28  ;;  %v1050_v36 = vpop.f32.mrb[7].mxu0 }
 0x4fa   :  { %v1051_v38 = vadd.f32 %v1050_v36, %v985_v21 }
 0x4fb   :  { %v1063_v40 = vpack.c.bf16 %v1059_v35, %v1056_v34 }
 0x4fc   :  { %v1062_v55 = vpack.c.bf16 %v1051_v38, %v1048_v37 }
 0x4fe   :  { %2895 = vtanh.bf16 %v1062_v55 }
 0x4ff   :  { %2897 = vtanh.bf16 %v1063_v40 }
 0x500   :  { %2899 = vrcp.f32 %v1182_v58 }
 0x509   :  { %v2896_v41 = vpop.eup %2895 }
 0x50a   :  { %2749 = vmatpush3.bf16.msra.mxu1 %v2896_v41  ;;  %v2898_v42 = vpop.eup %2897 }
 0x50b   :  { %2750 = vmatprep.subr.bf16.mxu1 %v2987_v46  ;;  %v2900_v59 = vpop.eup %2899 }
 0x50c   :  { %v1184_v60 = vmul.f32 %v2900_v59, %v1182_v58 }
 0x50e   :  { %2751 = vmatpush3.bf16.msra.mxu1 %v2898_v42  ;;  %v1185_v61 = vsub.f32 2.0, %v1184_v60 }
 0x50f   :  { %2764 = vmatprep.subr.bf16.mxu1 %v2987_v46 }
 0x510   :  { %v3314_v7 = vmul.f32 %v2900_v59, %v1185_v61 }
 0x511   :  { %2753 = vmatmul.mubr.msk.bf16.vlgmr.msra.gmra.mrb[4].mxu1 %vm378_vm6, %v2852_v43 }
 0x512   :  { %2768 = vmatprep.mubr.msk.bf16.mxu1 %vm2988_vm1, %v2987_v46  ;;  %v1187_v18 = vmul.f32 %v3314_v7, %v1180_v56 }
 0x514   :  { %v2618_v21 = vadd.f32 -0.5, %v1187_v18 }
 0x516   :  { %v1197_v28 = vrot.slane %v2618_v21, %v3147_v3 }
 0x5e4   :  { %v1124_v63 = vpop.f32.mrb[4].mxu1 }
 0x5e5   :  { %v1125_v1 = vadd.f32 %v1124_v63, %v1075_v62  ;;  %v2754_v49 = vpop.f32.mrb[5].mxu1 }
 0x5e6   :  { %v1127_v9 = vpop.f32.mrb[6].mxu1 }
 0x5e7   :  { %v2616_v11 = vclamps-f32 %v1125_v1, 8.0  ;;  %v1128_v12 = vadd.f32 %v1127_v9, %v1080_v2  ;;  %v2755_v14 = vpop.f32.mrb[7].mxu1  ;;  %v1201_v35 = vrot.slane %v1125_v1, 4 }
 0x5e9   :  { %v1133_v15 = vmul.f32 1.442695, %v2616_v11  ;;  %v1136_v16 = vrot.slane %v1128_v12, 1  ;;  %v1139_v8 = vrot.slane %v1128_v12, 2  ;;  %v1142_v20 = vrot.slane %v1128_v12, 3 }
 0x5eb   :  { %2901 = vpow2.f32 %v1133_v15  ;;  %v1138_v19 = vmax.f32 %v1128_v12, %v1136_v16 }
 0x5ed   :  { %v1141_v13 = vmax.f32 %v1138_v19, %v1139_v8 }
 0x5ef   :  { %v1144_v25 = vmax.f32 %v1141_v13, %v1142_v20 }
 0x5f1   :  { %v1148_v54 = vrot.slane %v1144_v25, %v3147_v3 }
 0x5f3   :  { %v1149_v5 = vsub.f32 %v1128_v12, %v1148_v54  ;;  %v1264_v12 = vsub.f32 %v3252_v48, %v3195_v27 }
 0x5f5   :  { %v2902_v30 = vpop.eup %2901  ;;  %v1150_v32 = vmul.f32 1.442695, %v1149_v5  ;;  %v1265_v15 = vadd.f32 3.1415927, %v1264_v12  ;;  %v1188_v5 = vmul.f32 2.0, %v3305_v6  ;;  %v1279_v6 = vand.u32 7, %v3185_v33 }
 0x5f6   :  { %v1199_v34 = vmul.f32 %v2902_v30, %v1197_v28  ;;  %v1208_v36 = vmul.f32 0.5, %v2902_v30 }
 0x5f7   :  { %2903 = vpow2.f32 %v1150_v32  ;;  %v1266_v18 = vmul.f32 0.15915494, %v1265_v15  ;;  %vm1280_vm12 = vcmp.eq.s32.totalorder %v1279_v6, 0  ;;  %vm1282_vm14 = vcmp.eq.s32.totalorder %v1279_v6, 4 }
 0x5f8   :  { %v1203_v37 = vadd.f32 %v1201_v35, %v1199_v34  ;;  %v1210_v38 = vrot.slane %v1208_v36, 4  ;;  %v1189_v36 = vmul.f32 %v1188_v5, %v3308_v10  ;;  %v632_v10 = vmax.f32 %v3182_v17, 1e-20  ;;  %vm1281_vm13 = vmand %vm1280_vm12, %vm34_vm3  ;;  %v2632_v5 = vld [vmem:[%s3623_s3 + $0x40] sm:$0xff] }
 0x5f9   :  { %v1267_v13 = vfloor.f32 %v1266_v18  ;;  %vm1283_vm15 = vmand %vm1282_vm14, %vm34_vm3 }
 0x5fa   :  { %v1204_v40 = vmul.f32 0.5, %v1203_v37  ;;  %v1212_v55 = vsub.f32 %v1125_v1, %v1210_v38  ;;  %v1217_v41 = vadd.f32 %v1210_v38, %v1125_v1 }
 0x5fb   :  { %v1268_v28 = vmul.f32 6.2831855, %v1267_v13 }
 0x5fc   :  { %2905 = vtanh.f32 %v1204_v40  ;;  %v1213_v42 = vmul.f32 0.5, %v1212_v55  ;;  %v1218_v43 = vmul.f32 0.5, %v1217_v41 }
 0x5fd   :  { %v1269_v35 = vsub.f32 %v1265_v15, %v1268_v28  ;;  %v2630_v28 = vld [vmem:[%s3621_s2 + $0x50] sm:$0xff] }
 0x5fe   :  { %2907 = vtanh.f32 %v1213_v42 }
 0x5ff   :  { %2909 = vtanh.f32 %v1218_v43  ;;  %v2619_v42 = vadd.f32 -3.1415927, %v1269_v35  ;;  %v1190_v43 = vmul.f32 %v1189_v36, %v3314_v7  ;;  %v2635_v35 = vld [vmem:[%s3623_s3 + $0x58] sm:$0xff]  ;;  %v2650_v36 = vld [vmem:[%s3625_s7 + $0x20] sm:$0xff] }
 0x601   :  { %v2904_v44 = vpop.eup %2903 }
 0x602   :  { %v1153_v45 = vrot.slane %v2904_v44, 1  ;;  %v1156_v50 = vrot.slane %v2904_v44, 2  ;;  %v1159_v53 = vrot.slane %v2904_v44, 3 }
 0x604   :  { %v1155_v47 = vadd.f32 %v2904_v44, %v1153_v45 }
 0x606   :  { %v2906_v51 = vpop.eup %2905  ;;  %v1158_v52 = vadd.f32 %v1156_v50, %v1155_v47 }
 0x607   :  { %v1206_v56 = vadd.f32 1.0, %v2906_v51 }
 0x608   :  { %v2908_v57 = vpop.eup %2907  ;;  %v1161_v58 = vadd.f32 %v1159_v53, %v1158_v52  ;;  %v1271_v53 = vmul.f32 0.5, %v2619_v42 }
 0x609   :  { %v2910_v59 = vpop.eup %2909  ;;  %v1207_v60 = vmul.f32 0.5, %v1206_v56  ;;  %v1215_v61 = vadd.f32 1.0, %v2908_v57  ;;  %v1191_v56 = vmul.f32 %v1190_v43, %v3314_v7 }
 0x60a   :  { %v1220_v62 = vadd.f32 1.0, %v2910_v59  ;;  %2911 = vrcp.f32 %v1161_v58 }
 0x60b   :  { %v1216_v63 = vmul.f32 0.5, %v1215_v61  ;;  %v1236_v1 = vmul.f32 %v2902_v30, %v1207_v60  ;;  %v1237_v49 = vsub.f32 1.0, %v1207_v60 }
 0x60c   :  { %v1221_v2 = vmul.f32 0.5, %v1220_v62 }
 0x60d   :  { %v1238_v9 = vmul.f32 %v1237_v49, %v1236_v1  ;;  %v1229_v54 = vrot.slane %v1216_v63, 4  ;;  %v652_v49 = vsel %vm649_vm11, %v632_v10, 1.0 }
 0x60e   :  { %v1222_v11 = vsub.f32 %v1221_v2, %v1216_v63  ;;  %v1272_v63 = vadd.f32 %v1271_v53, %v3195_v27 }
 0x60f   :  { %v1231_v34 = vsub.f32 %v1207_v60, %v1229_v54  ;;  %v2628_v54 = vld [vmem:[%s3621_s2 + $0x40] sm:$0xff] }
 0x610   :  { %v1223_v14 = vmax.f32 %v1222_v11, 1e-12 }
 0x612   :  { %2913 = vrcp.f32 %v1223_v14 }
 0x613   :  { %2915 = vlog2.f32 %v652_v49 }
 0x614   :  { %v2912_v16 = vpop.eup %2911 }
 0x615   :  { %v1166_v19 = vrot.slane %v2912_v16, %v3147_v3 }
 0x617   :  { %v1167_v21 = vmul.f32 %v2904_v44, %v1166_v19 }
 0x619   :  { %v1168_v32 = vmul.f32 0.96, %v1167_v21 }
 0x61b   :  { %v1169_v40 = vadd.f32 0.01, %v1168_v32  ;;  %v2640_v32 = vld [vmem:[%s3624_s5 + $0x40] sm:$0xff] }
 0x61c   :  { %v2914_v8 = vpop.eup %2913 }
 0x61d   :  { %v1225_v20 = vmul.f32 %v2914_v8, %v1223_v14  ;;  %v2916_v16 = vpop.eup %2915 }
 0x61e   :  { %v654_v19 = vmul.f32 0.6931472, %v2916_v16 }
 0x61f   :  { %v1226_v25 = vsub.f32 2.0, %v1225_v20 }
 0x621   :  { %v1227_v30 = vmul.f32 %v2914_v8, %v1226_v25  ;;  %v2629_v25 = vld [vmem:[%s3621_s2 + $0x48] sm:$0xff] }
 0x623   :  { %v1233_v48 = vrot.slane %v1227_v30, 4  ;;  %v2634_v30 = vld [vmem:[%s3623_s3 + $0x50] sm:$0xff] }
 0x625   :  { %v1235_v37 = vmul.f32 %v1233_v48, %v1231_v34  ;;  %v1239_v38 = vmul.f32 %v1238_v9, %v1233_v48  ;;  %v2633_v34 = vld [vmem:[%s3623_s3 + $0x48] sm:$0xff]  ;;  %v2642_v48 = vld [vmem:[%s3624_s5 + $0x50] sm:$0xff] }
 0x627   :  { %v1240_v55 = vmul.f32 %v1235_v37, %v1169_v40  ;;  %v1251_v41 = vmul.f32 %v1239_v38, %v1169_v40  ;;  %v2641_v37 = vld [vmem:[%s3624_s5 + $0x48] sm:$0xff]  ;;  %v2643_v38 = vld [vmem:[%s3624_s5 + $0x58] sm:$0xff] }
 0x628   :  { %v2651_v40 = vld [vmem:[%s3625_s7 + $0x28] sm:$0xf] }
 0x629   :  { %v1242_v44 = vrot.slane %v1240_v55, 1  ;;  %v1253_v45 = vrot.slane %v1251_v41, 1  ;;  %v1245_v50 = vrot.slane %v1240_v55, 2  ;;  %v1256_v52 = vrot.slane %v1251_v41, 2 }
 0x62a   :  { %v1248_v58 = vrot.slane %v1240_v55, 3  ;;  %v1259_v60 = vrot.slane %v1251_v41, 3 }
 0x62b   :  { %v1244_v47 = vadd.f32 %v1242_v44, %v1240_v55  ;;  %v1255_v51 = vadd.f32 %v1253_v45, %v1251_v41  ;;  %v2853_v55 = vld [vmem:[%s3626_s4 + $0x20] sm:$0xff]  }
 0x62c   :  { %2760 = vmatprep.mubr.msk.bf16.mxu0 %vm378_vm6, %v2853_v55 }
 0x62d   :  { %v1247_v57 = vadd.f32 %v1245_v50, %v1244_v47  ;;  %v1258_v59 = vadd.f32 %v1256_v52, %v1255_v51 }
 0x62f   :  { %v1250_v61 = vadd.f32 %v1248_v58, %v1247_v57  ;;  %v1261_v62 = vadd.f32 %v1259_v60, %v1258_v59 }
 0x631   :  { %v1273_v1 = vmul.f32 6.2831855, %v1250_v61  ;;  %v1262_v2 = vmul.f32 %v1261_v62, %v1191_v56 }
 0x633   :  { %v1274_v17 = vadd.f32 %v1273_v1, %v1272_v63  ;;  %v1263_v7 = vmax.f32 %v1262_v2, 1e-20 }
 0x635   :  { %v1275_v9 = vmul.f32 0.15915494, %v1274_v17  ;;  %v1284_v11 = vsel %vm1281_vm13, %v1263_v7, 1.0 }
 0x636   :  { %2917 = vlog2.f32 %v1284_v11 }
 0x637   :  { %v1276_v12 = vfloor.f32 %v1275_v9 }
 0x639   :  { %v1277_v14 = vmul.f32 6.2831855, %v1276_v12 }
 0x63b   :  { %v1278_v15 = vsub.f32 %v1274_v17, %v1277_v14 }
 0x63d   :  { %1288 = vrot.lane.b32.xlu1 %v1278_v15, %s2991_s0 }
 0x640   :  { %v2918_v18 = vpop.eup %2917 }
 0x641   :  { %v1286_v8 = vmul.f32 0.6931472, %v2918_v18 }
 0x643   :  { %v3334_v13 = vadd.f32 %v1286_v8, %v654_v19 }
 0x6af   :  { %v1289_v20 = vpop.permute.xlu1 %1288 }
 0x6b0   :  { %v3339_v21 = vsel %vm1283_vm15, %v1289_v20, %v3195_v27  ;;  %v2631_v27 = vld [vmem:[%s3621_s2 + $0x58] sm:$0xff] }
 0x6b1   :  { %1293 = vrot.lane.b32.xlu1 %v3339_v21, %s2992_s19  ;;  %1291 = vrot.lane.b32.xlu0 %v3339_v21, %s2993_s20 }
 0x6b5   :  { %1522 = vperm.xlu1 %2834, %v2629_v25   ;;  %1544 = vperm.xlu0 %2835, %v2628_v54  }
 0x6b9   :  { %2837 = vset.pattern.permute.xlu1 %v2979_v0  ;;  %2836 = vset.pattern.permute.xlu0 %v2980_v4 }
 0x6ba   :  { %1548 = vperm.xlu1 %2837, %v2629_v25   ;;  %1517 = vperm.xlu0 %2836, %v2628_v54  }
 0x6be   :  { %2838 = vset.pattern.permute.xlu1 %v2980_v4  ;;  %1532 = vperm.xlu0 %2836, %v2631_v27  }
 0x6bf   :  { %1527 = vperm.xlu1 %2838, %v2630_v28  }
 0x6c2   :  { %1573 = vperm.xlu0 %2836, %v2632_v5  }
 0x6c3   :  { %2839 = vset.pattern.permute.xlu1 %v2979_v0 }
 0x6c4   :  { %1552 = vperm.xlu1 %2839, %v2630_v28  }
 0x6c6   :  { %1583 = vperm.xlu0 %2836, %v2634_v30  }
 0x6c8   :  { %1556 = vperm.xlu1 %2839, %v2631_v27  }
 0x6ca   :  { %1611 = vperm.xlu0 %2836, %v2640_v32  }
 0x6cc   :  { %2840 = vset.pattern.permute.xlu1 %v2980_v4 }
 0x6cd   :  { %1578 = vperm.xlu1 %2840, %v2633_v34  }
 0x6ce   :  { %1621 = vperm.xlu0 %2836, %v2642_v48  }
 0x6d1   :  { %1588 = vperm.xlu1 %2840, %v2635_v35  }
 0x6d2   :  { %1706 = vperm.xlu0 %2836, %v2650_v36  }
 0x6d5   :  { %1616 = vperm.xlu1 %2840, %v2641_v37  }
 0x6d6   :  { %2842 = vset.pattern.permute.xlu0 %v2979_v0 }
 0x6d9   :  { %1626 = vperm.xlu1 %2840, %v2643_v38  }
 0x6dd   :  { %1711 = vperm.xlu1 %2840, %v2651_v40  }
 0x723   :  { %v1294_v41 = vpop.permute.xlu1 %1293  ;;  %v1292_v42 = vpop.permute.xlu0 %1291 }
 0x724   :  { %v3396_v43 = vsel %vm1295_vm0, %v1294_v41, %v1292_v42 }
 0x725   :  { %v3400_v44 = vsub.f32 %v3339_v21, %v3396_v43 }
 0x727   :  { %v1301_v45 = vand.u32 2139095040, %v3400_v44  ;;  %v1298_v51 = vand.u32 2147483647, %v3400_v44  ;;  %vm1300_vm11 = vcmp.lt.s32.totalorder %v3400_v44, 0 }
 0x729   :  { %v1302_v6 = vshrl.u32 %v1301_v45, 23  ;;  %v1305_v10 = vand.u32 8388607, %v1298_v51  ;;  %vm1299_vm12 = vcmp.le.f32.partialorder %v1298_v51, 0.7853982 }
 0x72b   :  { %v2620_v47 = vadd.s32 4294967169, %v1302_v6  ;;  %v1306_v7 = vor.u32 8388608, %v1305_v10 }
 0x72d   :  { %v1308_v50 = vadd.s32 1, %v2620_v47  ;;  %v1346_v28 = vshll.u32 %v1306_v7, 8 }
 0x72f   :  { %vm1309_vm2 = vcmp.gt.s32.totalorder %v1308_v50, 0 }
 0x730   :  { %v1310_v52 = vsel %vm1309_vm2, %v1308_v50, 0 }
 0x731   :  { %v1312_v53 = vand.u32 31, %v1310_v52  ;;  %v1311_v57 = vshrl.u32 %v1310_v52, 5 }
 0x733   :  { %v1313_v56 = vsub.s32 32, %v1312_v53  ;;  %v1315_v58 = vshll.u32 %v2981_v22, %v1312_v53  ;;  %v1318_v59 = vshll.u32 %v2982_v24, %v1312_v53  ;;  %v1321_v62 = vshll.u32 %v2983_v26, %v1312_v53 }
 0x734   :  { %v1324_v1 = vshll.u32 %v2984_v29, %v1312_v53  ;;  %v1327_v2 = vshll.u32 %v2985_v31, %v1312_v53  ;;  %vm1330_vm4 = vcmp.lt.s32.totalorder %v1311_v57, 1  ;;  %vm1333_vm5 = vcmp.lt.s32.totalorder %v1311_v57, 4 }
 0x735   :  { %v1316_v60 = vshrl.u32 %v2982_v24, %v1313_v56  ;;  %v1319_v61 = vshrl.u32 %v2983_v26, %v1313_v56  ;;  %v1322_v63 = vshrl.u32 %v2984_v29, %v1313_v56  ;;  %v1325_v49 = vshrl.u32 %v2985_v31, %v1313_v56 }
 0x736   :  { %v1328_v17 = vshrl.u32 %v2986_v39, %v1313_v56  ;;  %v1314_v8 = vshrl.u32 %v2981_v22, %v1313_v56  ;;  %vm1332_vm7 = vcmp.lt.s32.totalorder %v1311_v57, 3  ;;  %vm1331_vm8 = vcmp.lt.s32.totalorder %v1311_v57, 2 }
 0x737   :  { %v1317_v9 = vor.u32 %v1316_v60, %v1315_v58  ;;  %v1320_v11 = vor.u32 %v1319_v61, %v1318_v59  ;;  %v1323_v12 = vor.u32 %v1322_v63, %v1321_v62  ;;  %v1326_v14 = vor.u32 %v1325_v49, %v1324_v1 }
 0x738   :  { %v1329_v15 = vor.u32 %v1328_v17, %v1327_v2  ;;  %v1523_v2 = vpop.permute.xlu1 %1522 }
 0x739   :  { %v1335_v16 = vsel %vm1333_vm5, %v1323_v12, 2102212464  ;;  %v1338_v18 = vsel %vm1330_vm4, %v1317_v9, %v1320_v11  ;;  %v1342_v19 = vsel %vm1330_vm4, %v1320_v11, %v1323_v12  ;;  %v1339_v20 = vsel %vm1333_vm5, %v1326_v14, 920167782 }
 0x73a   :  { %v1343_v25 = vsel %vm1333_vm5, %v1329_v15, 1326507024  ;;  %v1340_v54 = vsel %vm1332_vm7, %v1323_v12, %v1339_v20  ;;  %v1334_v5 = vsel %vm1330_vm4, %v1314_v8, %v1317_v9  ;;  %v1336_v30 = vsel %vm1332_vm7, %v1320_v11, %v1335_v16  ;;  %v1545_v8 = vpop.permute.xlu0 %1544 }
 0x73b   :  { %v1344_v27 = vsel %vm1332_vm7, %v1326_v14, %v1343_v25  ;;  %v1341_v32 = vsel %vm1331_vm8, %v1338_v18, %v1340_v54  ;;  %v1337_v38 = vsel %vm1331_vm8, %v1334_v5, %v1336_v30  ;;  %vm1390_vm5 = vweird.f32 %v3400_v44 }
 0x73c   :  { %v1345_v34 = vsel %vm1331_vm8, %v1342_v19, %v1344_v27  ;;  %v3420_v36 = vmul.u32.u64.low %v1346_v28, %v1341_v32  ;;  %v3421_v37 = vmul.u32.u64.high %v1346_v28, %v1341_v32, %v3420_v36  ;;  %v1353_v55 = vmul.u32 %v1346_v28, %v1337_v38  ;;  %v1549_v11 = vpop.permute.xlu1 %1548 }
 0x73d   :  { %v3417_v48 = vmul.u32.u64.low %v1346_v28, %v1345_v34  ;;  %v3418_v35 = vmul.u32.u64.high %v1346_v28, %v1345_v34, %v3417_v48 }
 0x73e   :  { %v1356_v40 = vadd.s32 1, %v3421_v37  ;;  %v1518_v27 = vpop.permute.xlu0 %1517 }
 0x73f   :  { %vm1355_vm9 = vc.u32 %v3418_v35, %v3420_v36  ;;  %v1354_v58 = vadd.s32 %v3420_v36, %v3418_v35 }
 0x740   :  { %v1357_v41 = vsel %vm1355_vm9, %v1356_v40, %v3421_v37  ;;  %v1528_v20 = vpop.permute.xlu1 %1527 }
 0x741   :  { %v1358_v42 = vadd.s32 %v1357_v41, %v1353_v55 }
 0x742   :  { %v1533_v35 = vpop.permute.xlu0 %1532 }
 0x743   :  { %v1359_v45 = vadd.s32 536870912, %v1358_v42 }
 0x744   :  { %v1553_v28 = vpop.permute.xlu1 %1552 }
 0x745   :  { %v1360_v6 = vshrl.u32 %v1359_v45, 30 }
 0x747   :  { %v1361_v47 = vshll.u32 %v1360_v6, 30  ;;  %v1384_v14 = vsub.s32 4, %v1360_v6 }
 0x748   :  { %v1557_v36 = vpop.permute.xlu1 %1556 }
 0x749   :  { %v1362_v50 = vsub.s32 %v1358_v42, %v1361_v47  ;;  %v1385_v18 = vsel %vm1300_vm11, %v1384_v14, %v1360_v6 }
 0x74a   :  { %v1387_v25 = vsel %vm1299_vm12, 0, %v1385_v18 }
 0x74b   :  { %v1364_v52 = vsub.s32 0, %v1362_v50  ;;  %v1494_v54 = vadd.s32 3, %v1387_v25  ;;  %v1391_v5 = vand.u32 3, %v1387_v25 }
 0x74d   :  { %v2621_v53 = vmin.u32 %v1364_v52, %v1362_v50  ;;  %v1495_v30 = vand.u32 3, %v1494_v54  ;;  %vm1396_vm13 = vcmp.eq.s32.totalorder %v1391_v5, 2  ;;  %vm1393_vm15 = vcmp.eq.s32.totalorder %v1391_v5, 0  ;;  %v1574_v52 = vpop.permute.xlu0 %1573 }
 0x74e   :  { %vm1392_vm2 = vcmp.lt.s32.totalorder %v1391_v5, 2 }
 0x74f   :  { %v1366_v10 = vclz %v2621_v53  ;;  %vm1500_vm14 = vcmp.eq.s32.totalorder %v1495_v30, 2  ;;  %vm1497_vm0 = vcmp.eq.s32.totalorder %v1495_v30, 0  ;;  %vm1496_vm4 = vcmp.lt.s32.totalorder %v1495_v30, 2  ;;  %v1579_v53 = vpop.permute.xlu1 %1578 }
 0x751   :  { %v2622_v56 = vadd.s32 4294967294, %v1366_v10 }
 0x753   :  { %vm2623_vm10 = vcmp.lt.s32.totalorder %v2622_v56, 0 }
 0x754   :  { %v1369_v57 = vsel %vm2623_vm10, 0, %v2622_v56  ;;  %vm1927_vm10 = vcmp.ge.s32.totalorder %v3188_v23, 14 }
 0x755   :  { %v1370_v59 = vsub.s32 32, %v1369_v57  ;;  %v1374_v60 = vsub.s32 4294967266, %v1369_v57  ;;  %v1371_v61 = vshll.u32 %v1362_v50, %v1369_v57 }
 0x757   :  { %v1372_v62 = vshrl.u32 %v1354_v58, %v1370_v59  ;;  %v1375_v63 = vadd.s32 127, %v1374_v60 }
 0x759   :  { %v1373_v1 = vor.u32 %v1372_v62, %v1371_v61  ;;  %v1376_v49 = vshll.u32 %v1375_v63, 23 }
 0x75b   :  { %v1377_v17 = vor.u32 4788187, %v1376_v49  ;;  %v1380_v9 = vcvt.s32.f32 %v1373_v1 }
 0x75d   :  { %v1378_v7 = vand.u32 2147483647, %v1377_v17 }
 0x75f   :  { %v1381_v12 = vmul.f32 %v1380_v9, %v1378_v7  ;;  %v1584_v7 = vpop.permute.xlu0 %1583 }
 0x761   :  { %v1382_v15 = vxor.u32 2147483648, %v1381_v12 }
 0x763   :  { %v1383_v16 = vsel %vm1300_vm11, %v1382_v15, %v1381_v12  ;;  %v1589_v12 = vpop.permute.xlu1 %1588 }
 0x764   :  { %v1386_v19 = vsel %vm1299_vm12, %v3400_v44, %v1383_v16 }
 0x765   :  { %2919 = vcosq.f32 %v1386_v19 }
 0x766   :  { %2921 = vsinq.f32 %v1386_v19  ;;  %v2854_v19 = vld [vmem:[%s3626_s4 + $0x28] sm:$0xff]  }
 0x76f   :  { %v2920_v32 = vpop.eup %2919 }
 0x770   :  { %v2922_v34 = vpop.eup %2921  ;;  %v1397_v48 = vxor.u32 2147483648, %v2920_v32 }
 0x771   :  { %v1394_v51 = vxor.u32 2147483648, %v2922_v34 }
 0x772   :  { %v1398_v37 = vsel %vm1396_vm13, %v1397_v48, %v2922_v34  ;;  %v1502_v38 = vsel %vm1500_vm14, %v1397_v48, %v2922_v34 }
 0x773   :  { %v1395_v40 = vsel %vm1393_vm15, %v2920_v32, %v1394_v51  ;;  %v1499_v55 = vsel %vm1497_vm0, %v2920_v32, %v1394_v51 }
 0x774   :  { %v1399_v41 = vsel %vm1392_vm2, %v1395_v40, %v1398_v37  ;;  %v1503_v42 = vsel %vm1496_vm4, %v1499_v55, %v1502_v38  ;;  %v2855_v40 = vld [vmem:[%s3627_s6 + $0x10] sm:$0x3f]   ;;  %v2655_v55 = vld [vmem:[%s3628_s1 + $0x2] sm:$0x1] }
 0x775   :  { %v1400_v45 = vsel %vm1390_vm5, nan, %v1399_v41  ;;  %v1504_v6 = vsel %vm1390_vm5, nan, %v1503_v42  ;;  %v1804_v41 = vmul.f32 0.15915494, %v2655_v55 }
 0x776   :  { %v1538_v47 = vrot.slane %v1400_v45, %v3147_v3  ;;  %v1562_v50 = vrot.slane %v1504_v6, %v3147_v3 }
 0x777   :  { %v1805_v42 = vfloor.f32 %v1804_v41 }
 0x778   :  { %v1540_v10 = vmul.f32 %v1538_v47, %v1523_v2  ;;  %v1563_v56 = vmul.f32 %v1562_v50, %v1545_v8  ;;  %v1564_v57 = vmul.f32 %v1562_v50, %v1549_v11  ;;  %v1539_v58 = vmul.f32 %v1538_v47, %v1518_v27  ;;  %v1612_v8 = vpop.permute.xlu0 %1611 }
 0x779   :  { %v1541_v59 = vmul.f32 %v1538_v47, %v1528_v20  ;;  %v1542_v60 = vmul.f32 %v1538_v47, %v1533_v35  ;;  %v1565_v61 = vmul.f32 %v1562_v50, %v1553_v28  ;;  %v1566_v62 = vmul.f32 %v1562_v50, %v1557_v36  ;;  %v1617_v20 = vpop.permute.xlu1 %1616 }
 0x77a   :  { %v1567_v63 = vadd.f32 %v1563_v56, %v1539_v58  ;;  %v1568_v44 = vadd.f32 %v1564_v57, %v1540_v10  ;;  %v1806_v45 = vmul.f32 6.2831855, %v1805_v42 }
 0x77b   :  { %v1569_v1 = vadd.f32 %v1565_v61, %v1541_v59  ;;  %v1570_v49 = vadd.f32 %v1566_v62, %v1542_v60 }
 0x77c   :  { %v1591_v17 = vadd.f32 %v1574_v52, %v1567_v63  ;;  %v1592_v9 = vadd.f32 %v1579_v53, %v1568_v44  ;;  %v1622_v54 = vpop.permute.xlu0 %1621  ;;  %v1807_v6 = vsub.f32 %v2655_v55, %v1806_v45 }
 0x77d   :  { %v1593_v14 = vadd.f32 %v1584_v7, %v1569_v1  ;;  %v1594_v15 = vadd.f32 %v1589_v12, %v1570_v49  ;;  %v1627_v28 = vpop.permute.xlu1 %1626 }
 0x77e   :  { %v1595_v16 = vpack.c.bf16 %v1592_v9, %v1591_v17  ;;  %v1808_v47 = vmul.f32 0.15915494, %v1807_v6 }
 0x77f   :  { %v1596_v18 = vpack.c.bf16 %v1594_v15, %v1593_v14 }
 0x780   :  { %2923 = vtanh.bf16 %v1595_v16  ;;  %v1809_v50 = vmax.f32 %v1808_v47, 1e-06  ;;  %v1707_v61 = vpop.permute.xlu0 %1706 }
 0x781   :  { %2925 = vtanh.bf16 %v1596_v18  ;;  %v1712_v1 = vpop.permute.xlu1 %1711 }
 0x782   :  { %v3449_v52 = vmin.f32 %v1809_v50, 0.999999 }
 0x784   :  { %v3452_v53 = vsub.f32 1.0, %v3449_v52  ;;  %v1812_v10 = vmul.f32 %v3449_v52, %v3449_v52 }
 0x786   :  { %v1813_v56 = vmul.f32 %v3452_v53, %v3452_v53 }
 0x788   :  { %v1814_v57 = vadd.f32 %v1813_v56, %v1812_v10 }
 0x78b   :  { %v2924_v2 = vpop.eup %2923 }
 0x78c   :  { %2756 = vmatprep.subr.bf16.mxu0 %v2924_v2  ;;  %v2926_v11 = vpop.eup %2925 }
 0x78d   :  { %2757 = vmatpush3.bf16.msra.mxu0 %v2924_v2 }
 0x78e   :  { %2758 = vmatprep.subr.bf16.mxu0 %v2926_v11 }
 0x791   :  { %2759 = vmatpush3.bf16.msra.mxu0 %v2926_v11 }
 0x794   :  { %2761 = vmatmul.mubr.msk.bf16.vlgmr.msra.gmra.mrb[8].mxu0 %vm378_vm6, %v2854_v19 }
 0x867   :  { %v2762_v25 = vpop.f32.mrb[8].mxu0 }
 0x868   :  { %v1679_v27 = vpop.f32.mrb[9].mxu0  ;;  %v1688_v30 = vadd.f32 %v2762_v25, %v1622_v54 }
 0x869   :  { %v2763_v5 = vpop.f32.mrb[10].mxu0  ;;  %v1680_v48 = vadd.f32 %v1679_v27, %v1612_v8 }
 0x86a   :  { %v1691_v32 = vadd.f32 %v2763_v5, %v1627_v28  ;;  %v1682_v34 = vpop.f32.mrb[11].mxu0 }
 0x86b   :  { %v1683_v35 = vadd.f32 %v1682_v34, %v1617_v20 }
 0x86c   :  { %v1695_v36 = vpack.c.bf16 %v1691_v32, %v1688_v30 }
 0x86d   :  { %v1694_v51 = vpack.c.bf16 %v1683_v35, %v1680_v48 }
 0x86f   :  { %2927 = vtanh.bf16 %v1694_v51 }
 0x870   :  { %2929 = vtanh.bf16 %v1695_v36 }
 0x871   :  { %2931 = vrcp.f32 %v1814_v57 }
 0x87a   :  { %v2928_v37 = vpop.eup %2927 }
 0x87b   :  { %2765 = vmatpush3.bf16.msra.mxu1 %v2928_v37  ;;  %v2930_v38 = vpop.eup %2929 }
 0x87c   :  { %2766 = vmatprep.subr.bf16.mxu1 %v2987_v46  ;;  %v2932_v58 = vpop.eup %2931 }
 0x87d   :  { %v1816_v59 = vmul.f32 %v2932_v58, %v1814_v57 }
 0x87f   :  { %2767 = vmatpush3.bf16.msra.mxu1 %v2930_v38  ;;  %v1817_v60 = vsub.f32 2.0, %v1816_v59 }
 0x880   :  { %2780 = vmatprep.subr.bf16.mxu1 %v2987_v46 }
 0x881   :  { %v3458_v49 = vmul.f32 %v2932_v58, %v1817_v60 }
 0x882   :  { %2769 = vmatmul.mubr.msk.bf16.vlgmr.msra.gmra.mrb[8].mxu1 %vm378_vm6, %v2855_v40 }
 0x883   :  { %2784 = vmatprep.mubr.msk.bf16.mxu1 %vm2988_vm1, %v2987_v46  ;;  %v1819_v16 = vmul.f32 %v3458_v49, %v1812_v10 }
 0x885   :  { %v2656_v8 = vadd.f32 -0.5, %v1819_v16 }
 0x887   :  { %v1829_v54 = vrot.slane %v2656_v8, %v3147_v3 }
 0x955   :  { %v1756_v62 = vpop.f32.mrb[8].mxu1 }
 0x956   :  { %v1757_v63 = vadd.f32 %v1756_v62, %v1707_v61  ;;  %v2770_v44 = vpop.f32.mrb[9].mxu1 }
 0x957   :  { %v1759_v17 = vpop.f32.mrb[10].mxu1 }
 0x958   :  { %v2654_v7 = vclamps-f32 %v1757_v63, 8.0  ;;  %v1760_v9 = vadd.f32 %v1759_v17, %v1712_v1  ;;  %v2771_v12 = vpop.f32.mrb[11].mxu1  ;;  %v1833_v32 = vrot.slane %v1757_v63, 4 }
 0x95a   :  { %v1765_v14 = vmul.f32 1.442695, %v2654_v7  ;;  %v1768_v15 = vrot.slane %v1760_v9, 1  ;;  %v1771_v2 = vrot.slane %v1760_v9, 2  ;;  %v1774_v19 = vrot.slane %v1760_v9, 3 }
 0x95c   :  { %2933 = vpow2.f32 %v1765_v14  ;;  %v1770_v18 = vmax.f32 %v1760_v9, %v1768_v15 }
 0x95e   :  { %v1773_v11 = vmax.f32 %v1770_v18, %v1771_v2 }
 0x960   :  { %v1776_v20 = vmax.f32 %v1773_v11, %v1774_v19 }
 0x962   :  { %v1780_v25 = vrot.slane %v1776_v20, %v3147_v3 }
 0x964   :  { %v1781_v27 = vsub.f32 %v1760_v9, %v1780_v25  ;;  %v1896_v9 = vsub.f32 %v3396_v43, %v3339_v21 }
 0x966   :  { %v2934_v28 = vpop.eup %2933  ;;  %v1782_v5 = vmul.f32 1.442695, %v1781_v27  ;;  %v1897_v14 = vadd.f32 3.1415927, %v1896_v9  ;;  %v1820_v27 = vmul.f32 2.0, %v3449_v52 }
 0x967   :  { %v1831_v30 = vmul.f32 %v2934_v28, %v1829_v54  ;;  %v1840_v34 = vmul.f32 0.5, %v2934_v28 }
 0x968   :  { %2935 = vpow2.f32 %v1782_v5  ;;  %v1898_v16 = vmul.f32 0.15915494, %v1897_v14 }
 0x969   :  { %v1835_v48 = vadd.f32 %v1833_v32, %v1831_v30  ;;  %v1842_v35 = vrot.slane %v1840_v34, 4  ;;  %v1821_v34 = vmul.f32 %v1820_v27, %v3452_v53  ;;  %v2681_v27 = vld [vmem:[%s3624_s5 + $0x78] sm:$0xff] }
 0x96a   :  { %v1899_v11 = vfloor.f32 %v1898_v16 }
 0x96b   :  { %v1836_v36 = vmul.f32 0.5, %v1835_v48  ;;  %v1844_v51 = vsub.f32 %v1757_v63, %v1842_v35  ;;  %v1849_v37 = vadd.f32 %v1842_v35, %v1757_v63 }
 0x96c   :  { %v1900_v54 = vmul.f32 6.2831855, %v1899_v11  ;;  %v2666_v11 = vld [vmem:[%s3621_s2 + $0x60] sm:$0xff] }
 0x96d   :  { %2937 = vtanh.f32 %v1836_v36  ;;  %v1845_v38 = vmul.f32 0.5, %v1844_v51  ;;  %v1850_v40 = vmul.f32 0.5, %v1849_v37 }
 0x96e   :  { %v1901_v32 = vsub.f32 %v1897_v14, %v1900_v54  ;;  %v2671_v54 = vld [vmem:[%s3623_s3 + $0x68] sm:$0xff] }
 0x96f   :  { %2939 = vtanh.f32 %v1845_v38 }
 0x970   :  { %2941 = vtanh.f32 %v1850_v40  ;;  %v2657_v38 = vadd.f32 -3.1415927, %v1901_v32  ;;  %v1822_v40 = vmul.f32 %v1821_v34, %v3458_v49 }
 0x972   :  { %v2936_v55 = vpop.eup %2935 }
 0x973   :  { %v1785_v41 = vrot.slane %v2936_v55, 1  ;;  %v1788_v45 = vrot.slane %v2936_v55, 2  ;;  %v1791_v50 = vrot.slane %v2936_v55, 3 }
 0x975   :  { %v1787_v42 = vadd.f32 %v2936_v55, %v1785_v41 }
 0x977   :  { %v2938_v6 = vpop.eup %2937  ;;  %v1790_v47 = vadd.f32 %v1788_v45, %v1787_v42  ;;  %v1911_v42 = vand.u32 3, %v3185_v33 }
 0x978   :  { %v1838_v10 = vadd.f32 1.0, %v2938_v6 }
 0x979   :  { %v2940_v56 = vpop.eup %2939  ;;  %v1793_v57 = vadd.f32 %v1791_v50, %v1790_v47  ;;  %v1903_v50 = vmul.f32 0.5, %v2657_v38  ;;  %vm1912_vm1 = vcmp.eq.s32.totalorder %v1911_v42, 0  ;;  %vm1914_vm8 = vcmp.eq.s32.totalorder %v1911_v42, 2 }
 0x97a   :  { %v2942_v58 = vpop.eup %2941  ;;  %v1839_v59 = vmul.f32 0.5, %v1838_v10  ;;  %v1847_v60 = vadd.f32 1.0, %v2940_v56  ;;  %v1823_v10 = vmul.f32 %v1822_v40, %v3458_v49  ;;  %vm1913_vm7 = vmand %vm1912_vm1, %vm34_vm3 }
 0x97b   :  { %v1852_v61 = vadd.f32 1.0, %v2942_v58  ;;  %2943 = vrcp.f32 %v1793_v57  ;;  %vm1915_vm9 = vmand %vm1914_vm8, %vm34_vm3 }
 0x97c   :  { %v1848_v62 = vmul.f32 0.5, %v1847_v60  ;;  %v1868_v63 = vmul.f32 %v2934_v28, %v1839_v59  ;;  %v1869_v44 = vsub.f32 1.0, %v1839_v59 }
 0x97d   :  { %v1853_v1 = vmul.f32 0.5, %v1852_v61  ;;  %v1904_v61 = vadd.f32 %v1903_v50, %v3339_v21 }
 0x97e   :  { %v1870_v17 = vmul.f32 %v1869_v44, %v1868_v63  ;;  %v1861_v25 = vrot.slane %v1848_v62, 4 }
 0x97f   :  { %v1854_v7 = vsub.f32 %v1853_v1, %v1848_v62 }
 0x980   :  { %v1863_v30 = vsub.f32 %v1839_v59, %v1861_v25  ;;  %v2679_v25 = vld [vmem:[%s3624_s5 + $0x68] sm:$0xff] }
 0x981   :  { %v1855_v12 = vmax.f32 %v1854_v7, 1e-12 }
 0x983   :  { %2945 = vrcp.f32 %v1855_v12 }
 0x985   :  { %v2944_v15 = vpop.eup %2943 }
 0x986   :  { %v1798_v18 = vrot.slane %v2944_v15, %v3147_v3 }
 0x988   :  { %v1799_v8 = vmul.f32 %v2936_v55, %v1798_v18 }
 0x98a   :  { %v1800_v5 = vmul.f32 0.96, %v1799_v8  ;;  %v2669_v8 = vld [vmem:[%s3621_s2 + $0x78] sm:$0xff] }
 0x98c   :  { %v1801_v36 = vadd.f32 0.01, %v1800_v5  ;;  %v2678_v5 = vld [vmem:[%s3624_s5 + $0x60] sm:$0xff] }
 0x98d   :  { %v2946_v2 = vpop.eup %2945 }
 0x98e   :  { %v1857_v19 = vmul.f32 %v2946_v2, %v1855_v12 }
 0x990   :  { %v1858_v20 = vsub.f32 2.0, %v1857_v19  ;;  %v2670_v19 = vld [vmem:[%s3623_s3 + $0x60] sm:$0xff] }
 0x992   :  { %v1859_v28 = vmul.f32 %v2946_v2, %v1858_v20  ;;  %v2673_v20 = vld [vmem:[%s3623_s3 + $0x78] sm:$0xff] }
 0x994   :  { %v1865_v43 = vrot.slane %v1859_v28, 4  ;;  %v2689_v28 = vld [vmem:[%s3625_s7 + $0x38] sm:$0xf] }
 0x996   :  { %v1867_v48 = vmul.f32 %v1865_v43, %v1863_v30  ;;  %v1871_v35 = vmul.f32 %v1870_v17, %v1865_v43  ;;  %v2688_v30 = vld [vmem:[%s3625_s7 + $0x30] sm:$0xff] }
 0x997   :  { %v2856_v43 = vld [vmem:[%s3626_s4 + $0x30] sm:$0xff]  }
 0x998   :  { %v1872_v51 = vmul.f32 %v1867_v48, %v1801_v36  ;;  %v1883_v37 = vmul.f32 %v1871_v35, %v1801_v36  ;;  %2776 = vmatprep.mubr.msk.bf16.mxu0 %vm378_vm6, %v2856_v43 }
 0x99a   :  { %v1874_v55 = vrot.slane %v1872_v51, 1  ;;  %v1885_v41 = vrot.slane %v1883_v37, 1  ;;  %v1877_v45 = vrot.slane %v1872_v51, 2  ;;  %v1888_v47 = vrot.slane %v1883_v37, 2 }
 0x99b   :  { %v1880_v56 = vrot.slane %v1872_v51, 3  ;;  %v1891_v58 = vrot.slane %v1883_v37, 3 }
 0x99c   :  { %v1876_v52 = vadd.f32 %v1874_v55, %v1872_v51  ;;  %v1887_v6 = vadd.f32 %v1885_v41, %v1883_v37 }
 0x99e   :  { %v1879_v53 = vadd.f32 %v1877_v45, %v1876_v52  ;;  %v1890_v57 = vadd.f32 %v1888_v47, %v1887_v6 }
 0x9a0   :  { %v1882_v59 = vadd.f32 %v1880_v56, %v1879_v53  ;;  %v1893_v60 = vadd.f32 %v1891_v58, %v1890_v57 }
 0x9a2   :  { %v1905_v62 = vmul.f32 6.2831855, %v1882_v59  ;;  %v1894_v63 = vmul.f32 %v1893_v60, %v1823_v10 }
 0x9a4   :  { %v1906_v44 = vadd.f32 %v1905_v62, %v1904_v61  ;;  %v1895_v1 = vmax.f32 %v1894_v63, 1e-20 }
 0x9a6   :  { %v1907_v17 = vmul.f32 0.15915494, %v1906_v44  ;;  %v1916_v7 = vsel %vm1913_vm7, %v1895_v1, 1.0 }
 0x9a7   :  { %2947 = vlog2.f32 %v1916_v7 }
 0x9a8   :  { %v1908_v49 = vfloor.f32 %v1907_v17 }
 0x9aa   :  { %v1909_v9 = vmul.f32 6.2831855, %v1908_v49 }
 0x9ac   :  { %v1910_v12 = vsub.f32 %v1906_v44, %v1909_v9 }
 0x9ae   :  { %1920 = vrot.lane.b32.xlu0 %v1910_v12, %s2994_s14 }
 0x9b1   :  { %v2948_v14 = vpop.eup %2947 }
 0x9b2   :  { %v1918_v15 = vmul.f32 0.6931472, %v2948_v14 }
 0x9b4   :  { %v3475_v16 = vadd.f32 %v1918_v15, %v3334_v13  ;;  %v2667_v13 = vld [vmem:[%s3621_s2 + $0x68] sm:$0xff] }
 0xa20   :  { %v1921_v18 = vpop.permute.xlu0 %1920 }
 0xa21   :  { %v3480_v2 = vsel %vm1915_vm9, %v1921_v18, %v3339_v21  ;;  %v2668_v21 = vld [vmem:[%s3621_s2 + $0x70] sm:$0xff] }
 0xa22   :  { %1925 = vrot.lane.b32.xlu0 %v3480_v2, %s2995_s15  ;;  %1923 = vrot.lane.b32.xlu1 %v3480_v2, %s2996_s16 }
 0xa26   :  { %2149 = vperm.xlu1 %2840, %v2666_v11   ;;  %2180 = vperm.xlu0 %2842, %v2667_v13  }
 0xa2a   :  { %2841 = vset.pattern.permute.xlu1 %v2979_v0  ;;  %2184 = vperm.xlu0 %2842, %v2668_v21  }
 0xa2b   :  { %2176 = vperm.xlu1 %2841, %v2666_v11  }
 0xa2e   :  { %2844 = vset.pattern.permute.xlu0 %v2980_v4 }
 0xa2f   :  { %2843 = vset.pattern.permute.xlu1 %v2980_v4  ;;  %2154 = vperm.xlu0 %2844, %v2667_v13  }
 0xa30   :  { %2159 = vperm.xlu1 %2843, %v2668_v21  }
 0xa33   :  { %2205 = vperm.xlu0 %2844, %v2670_v19  }
 0xa34   :  { %2164 = vperm.xlu1 %2843, %v2669_v8  }
 0xa37   :  { %2220 = vperm.xlu0 %2844, %v2673_v20  }
 0xa38   :  { %2845 = vset.pattern.permute.xlu1 %v2979_v0  ;;  %v2672_v0 = vld [vmem:[%s3623_s3 + $0x70] sm:$0xff] }
 0xa39   :  { %2188 = vperm.xlu1 %2845, %v2669_v8  }
 0xa3b   :  { %2248 = vperm.xlu0 %2844, %v2679_v25  }
 0xa3d   :  { %2846 = vset.pattern.permute.xlu1 %v2980_v4  ;;  %v2680_v4 = vld [vmem:[%s3624_s5 + $0x70] sm:$0xff] }
 0xa3e   :  { %2210 = vperm.xlu1 %2846, %v2671_v54  }
 0xa3f   :  { %2258 = vperm.xlu0 %2844, %v2681_v27  }
 0xa42   :  { %2215 = vperm.xlu1 %2846, %v2672_v0  }
 0xa43   :  { %2343 = vperm.xlu0 %2844, %v2689_v28  }
 0xa46   :  { %2243 = vperm.xlu1 %2846, %v2678_v5  }
 0xa4a   :  { %2253 = vperm.xlu1 %2846, %v2680_v4  }
 0xa4e   :  { %2338 = vperm.xlu1 %2846, %v2688_v30  }
 0xa94   :  { %v1926_v32 = vpop.permute.xlu0 %1925  ;;  %v1924_v34 = vpop.permute.xlu1 %1923 }
 0xa95   :  { %v3536_v48 = vsel %vm1927_vm10, %v1926_v32, %v1924_v34 }
 0xa96   :  { %v3540_v35 = vsub.f32 %v3480_v2, %v3536_v48 }
 0xa98   :  { %v1933_v36 = vand.u32 2139095040, %v3540_v35  ;;  %v1930_v40 = vand.u32 2147483647, %v3540_v35  ;;  %vm1932_vm4 = vcmp.lt.s32.totalorder %v3540_v35, 0 }
 0xa9a   :  { %v1934_v51 = vshrl.u32 %v1933_v36, 23  ;;  %v1937_v23 = vand.u32 8388607, %v1930_v40  ;;  %vm1931_vm5 = vcmp.le.f32.partialorder %v1930_v40, 0.7853982 }
 0xa9c   :  { %v2658_v37 = vadd.s32 4294967169, %v1934_v51  ;;  %v1938_v60 = vor.u32 8388608, %v1937_v23 }
 0xa9e   :  { %v1940_v38 = vadd.s32 1, %v2658_v37 }
 0xaa0   :  { %vm1941_vm11 = vcmp.gt.s32.totalorder %v1940_v38, 0 }
 0xaa1   :  { %v1942_v55 = vsel %vm1941_vm11, %v1940_v38, 0 }
 0xaa2   :  { %v1944_v41 = vand.u32 31, %v1942_v55  ;;  %v1943_v52 = vshrl.u32 %v1942_v55, 5 }
 0xaa4   :  { %v1945_v42 = vsub.s32 32, %v1944_v41  ;;  %v1947_v45 = vshll.u32 %v2981_v22, %v1944_v41  ;;  %v1950_v6 = vshll.u32 %v2982_v24, %v1944_v41  ;;  %v1953_v10 = vshll.u32 %v2983_v26, %v1944_v41 }
 0xaa5   :  { %v1956_v56 = vshll.u32 %v2984_v29, %v1944_v41  ;;  %v1959_v58 = vshll.u32 %v2985_v31, %v1944_v41  ;;  %vm1962_vm12 = vcmp.lt.s32.totalorder %v1943_v52, 1  ;;  %vm1965_vm13 = vcmp.lt.s32.totalorder %v1943_v52, 4 }
 0xaa6   :  { %v1948_v47 = vshrl.u32 %v2982_v24, %v1945_v42  ;;  %v1951_v50 = vshrl.u32 %v2983_v26, %v1945_v42  ;;  %v1954_v53 = vshrl.u32 %v2984_v29, %v1945_v42  ;;  %v1957_v57 = vshrl.u32 %v2985_v31, %v1945_v42 }
 0xaa7   :  { %v1960_v59 = vshrl.u32 %v2986_v39, %v1945_v42  ;;  %v1946_v7 = vshrl.u32 %v2981_v22, %v1945_v42  ;;  %vm1964_vm14 = vcmp.lt.s32.totalorder %v1943_v52, 3  ;;  %vm1963_vm15 = vcmp.lt.s32.totalorder %v1943_v52, 2  ;;  %v2150_v52 = vpop.permute.xlu1 %2149 }
 0xaa8   :  { %v1949_v61 = vor.u32 %v1948_v47, %v1947_v45  ;;  %v1952_v62 = vor.u32 %v1951_v50, %v1950_v6  ;;  %v1955_v63 = vor.u32 %v1954_v53, %v1953_v10  ;;  %v1958_v44 = vor.u32 %v1957_v57, %v1956_v56 }
 0xaa9   :  { %v1961_v24 = vor.u32 %v1960_v59, %v1959_v58  ;;  %v1978_v39 = vshll.u32 %v1938_v60, 8  ;;  %v2181_v60 = vpop.permute.xlu0 %2180 }
 0xaaa   :  { %v1967_v1 = vsel %vm1965_vm13, %v1955_v63, 2102212464  ;;  %v1970_v26 = vsel %vm1962_vm12, %v1949_v61, %v1952_v62  ;;  %v1974_v17 = vsel %vm1962_vm12, %v1952_v62, %v1955_v63  ;;  %v1971_v29 = vsel %vm1965_vm13, %v1958_v44, 920167782 }
 0xaab   :  { %v1975_v49 = vsel %vm1965_vm13, %v1961_v24, 1326507024  ;;  %v1972_v31 = vsel %vm1964_vm14, %v1955_v63, %v1971_v29  ;;  %v1966_v12 = vsel %vm1962_vm12, %v1946_v7, %v1949_v61  ;;  %v1968_v14 = vsel %vm1964_vm14, %v1952_v62, %v1967_v1  ;;  %v2177_v50 = vpop.permute.xlu1 %2176 }
 0xaac   :  { %v1976_v9 = vsel %vm1964_vm14, %v1958_v44, %v1975_v49  ;;  %v1973_v15 = vsel %vm1963_vm15, %v1970_v26, %v1972_v31  ;;  %v1969_v8 = vsel %vm1963_vm15, %v1966_v12, %v1968_v14  ;;  %vm2022_vm12 = vweird.f32 %v3540_v35 }
 0xaad   :  { %v1977_v18 = vsel %vm1963_vm15, %v1974_v17, %v1976_v9  ;;  %v3560_v21 = vmul.u32.u64.low %v1978_v39, %v1973_v15  ;;  %v3561_v19 = vmul.u32.u64.high %v1978_v39, %v1973_v15, %v3560_v21  ;;  %v1985_v20 = vmul.u32 %v1978_v39, %v1969_v8  ;;  %v2185_v44 = vpop.permute.xlu0 %2184 }
 0xaae   :  { %v3557_v11 = vmul.u32.u64.low %v1978_v39, %v1977_v18  ;;  %v3558_v13 = vmul.u32.u64.high %v1978_v39, %v1977_v18, %v3557_v11 }
 0xaaf   :  { %v1988_v22 = vadd.s32 1, %v3561_v19  ;;  %v2160_v61 = vpop.permute.xlu1 %2159 }
 0xab0   :  { %vm1987_vm0 = vc.u32 %v3558_v13, %v3560_v21  ;;  %v1986_v36 = vadd.s32 %v3560_v21, %v3558_v13 }
 0xab1   :  { %v1989_v25 = vsel %vm1987_vm0, %v1988_v22, %v3561_v19  ;;  %v2155_v49 = vpop.permute.xlu0 %2154 }
 0xab2   :  { %v1990_v54 = vadd.s32 %v1989_v25, %v1985_v20 }
 0xab3   :  { %v2165_v24 = vpop.permute.xlu1 %2164 }
 0xab4   :  { %v1991_v27 = vadd.s32 536870912, %v1990_v54 }
 0xab5   :  { %v2206_v8 = vpop.permute.xlu0 %2205 }
 0xab6   :  { %v1992_v0 = vshrl.u32 %v1991_v27, 30 }
 0xab8   :  { %v1993_v28 = vshll.u32 %v1992_v0, 30  ;;  %v2016_v53 = vsub.s32 4, %v1992_v0  ;;  %v2189_v31 = vpop.permute.xlu1 %2188 }
 0xaba   :  { %v1994_v5 = vsub.s32 %v1990_v54, %v1993_v28  ;;  %v2017_v58 = vsel %vm1932_vm4, %v2016_v53, %v1992_v0 }
 0xabb   :  { %v2019_v62 = vsel %vm1931_vm5, 0, %v2017_v58 }
 0xabc   :  { %v1996_v4 = vsub.s32 0, %v1994_v5  ;;  %v2126_v63 = vadd.s32 3, %v2019_v62  ;;  %v2023_v1 = vand.u32 3, %v2019_v62 }
 0xabd   :  { %v2211_v22 = vpop.permute.xlu1 %2210 }
 0xabe   :  { %v2659_v30 = vmin.u32 %v1996_v4, %v1994_v5  ;;  %v2127_v26 = vand.u32 3, %v2126_v63  ;;  %vm2028_vm1 = vcmp.eq.s32.totalorder %v2023_v1, 2  ;;  %vm2025_vm8 = vcmp.eq.s32.totalorder %v2023_v1, 0 }
 0xabf   :  { %vm2024_vm10 = vcmp.lt.s32.totalorder %v2023_v1, 2 }
 0xac0   :  { %v1998_v43 = vclz %v2659_v30  ;;  %vm2132_vm7 = vcmp.eq.s32.totalorder %v2127_v26, 2  ;;  %vm2129_vm9 = vcmp.eq.s32.totalorder %v2127_v26, 0  ;;  %vm2128_vm11 = vcmp.lt.s32.totalorder %v2127_v26, 2  ;;  %v2858_v26 = vld [vmem:[%s3627_s6 + $0x18] sm:$0x3f]  }
 0xac2   :  { %v2660_v32 = vadd.s32 4294967294, %v1998_v43 }
 0xac4   :  { %vm2661_vm2 = vcmp.lt.s32.totalorder %v2660_v32, 0 }
 0xac5   :  { %v2001_v34 = vsel %vm2661_vm2, 0, %v2660_v32 }
 0xac6   :  { %v2002_v51 = vsub.s32 32, %v2001_v34  ;;  %v2006_v37 = vsub.s32 4294967266, %v2001_v34  ;;  %v2003_v38 = vshll.u32 %v1994_v5, %v2001_v34 }
 0xac8   :  { %v2004_v55 = vshrl.u32 %v1986_v36, %v2002_v51  ;;  %v2007_v41 = vadd.s32 127, %v2006_v37  ;;  %v2221_v36 = vpop.permute.xlu0 %2220  ;;  %v2216_v51 = vpop.permute.xlu1 %2215 }
 0xaca   :  { %v2005_v23 = vor.u32 %v2004_v55, %v2003_v38  ;;  %v2008_v42 = vshll.u32 %v2007_v41, 23 }
 0xacc   :  { %v2009_v45 = vor.u32 4788187, %v2008_v42  ;;  %v2012_v47 = vcvt.s32.f32 %v2005_v23 }
 0xace   :  { %v2010_v6 = vand.u32 2147483647, %v2009_v45  ;;  %v2857_v45 = vld [vmem:[%s3626_s4 + $0x38] sm:$0xff]  }
 0xad0   :  { %v2013_v10 = vmul.f32 %v2012_v47, %v2010_v6  ;;  %v2249_v6 = vpop.permute.xlu0 %2248  ;;  %v2244_v47 = vpop.permute.xlu1 %2243 }
 0xad2   :  { %v2014_v56 = vxor.u32 2147483648, %v2013_v10 }
 0xad4   :  { %v2015_v57 = vsel %vm1932_vm4, %v2014_v56, %v2013_v10  ;;  %v2259_v10 = vpop.permute.xlu0 %2258  ;;  %v2254_v56 = vpop.permute.xlu1 %2253 }
 0xad5   :  { %v2018_v59 = vsel %vm1931_vm5, %v3540_v35, %v2015_v57 }
 0xad6   :  { %2949 = vcosq.f32 %v2018_v59 }
 0xad7   :  { %2951 = vsinq.f32 %v2018_v59 }
 0xae0   :  { %v2950_v17 = vpop.eup %2949 }
 0xae1   :  { %v2952_v7 = vpop.eup %2951  ;;  %v2029_v29 = vxor.u32 2147483648, %v2950_v17 }
 0xae2   :  { %v2026_v40 = vxor.u32 2147483648, %v2952_v7 }
 0xae3   :  { %v2030_v9 = vsel %vm2028_vm1, %v2029_v29, %v2952_v7  ;;  %v2134_v39 = vsel %vm2132_vm7, %v2029_v29, %v2952_v7 }
 0xae4   :  { %v2027_v12 = vsel %vm2025_vm8, %v2950_v17, %v2026_v40  ;;  %v2131_v14 = vsel %vm2129_vm9, %v2950_v17, %v2026_v40  ;;  %v2693_v17 = vld [vmem:[%s3628_s1 + $0x3] sm:$0x1]  ;;  %s2997_s1 = smov 1  }
 0xae5   :  { %v2031_v15 = vsel %vm2024_vm10, %v2027_v12, %v2030_v9  ;;  %v2135_v18 = vsel %vm2128_vm11, %v2131_v14, %v2134_v39  ;;  %v2436_v7 = vmul.f32 0.15915494, %v2693_v17 }
 0xae6   :  { %v2032_v11 = vsel %vm2022_vm12, nan, %v2031_v15  ;;  %v2136_v13 = vsel %vm2022_vm12, nan, %v2135_v18 }
 0xae7   :  { %v2170_v21 = vrot.slane %v2032_v11, %v3147_v3  ;;  %v2194_v19 = vrot.slane %v2136_v13, %v3147_v3  ;;  %v2437_v29 = vfloor.f32 %v2436_v7  ;;  %v2339_v11 = vpop.permute.xlu1 %2338 }
 0xae9   :  { %v2171_v20 = vmul.f32 %v2170_v21, %v2150_v52  ;;  %v2196_v25 = vmul.f32 %v2194_v19, %v2181_v60  ;;  %v2195_v54 = vmul.f32 %v2194_v19, %v2177_v50  ;;  %v2197_v27 = vmul.f32 %v2194_v19, %v2185_v44 }
 0xaea   :  { %v2173_v0 = vmul.f32 %v2170_v21, %v2160_v61  ;;  %v2172_v28 = vmul.f32 %v2170_v21, %v2155_v49  ;;  %v2174_v5 = vmul.f32 %v2170_v21, %v2165_v24  ;;  %v2198_v4 = vmul.f32 %v2194_v19, %v2189_v31 }
 0xaeb   :  { %v2199_v30 = vadd.f32 %v2195_v54, %v2171_v20  ;;  %v2438_v49 = vmul.f32 6.2831855, %v2437_v29 }
 0xaec   :  { %v2202_v35 = vadd.f32 %v2198_v4, %v2174_v5  ;;  %v2200_v43 = vadd.f32 %v2196_v25, %v2172_v28  ;;  %v2201_v32 = vadd.f32 %v2197_v27, %v2173_v0 }
 0xaed   :  { %v2223_v34 = vadd.f32 %v2206_v8, %v2199_v30  ;;  %v2439_v31 = vsub.f32 %v2693_v17, %v2438_v49  ;;  %v2344_v8 = vpop.permute.xlu0 %2343 }
 0xaee   :  { %v2226_v37 = vadd.f32 %v2221_v36, %v2202_v35  ;;  %v2224_v38 = vadd.f32 %v2211_v22, %v2200_v43  ;;  %v2225_v55 = vadd.f32 %v2216_v51, %v2201_v32 }
 0xaef   :  { %v2440_v40 = vmul.f32 0.15915494, %v2439_v31  ;;  %v2528_v31 = vsub.f32 %v3536_v48, %v3480_v2 }
 0xaf0   :  { %v2227_v41 = vpack.c.bf16 %v2224_v38, %v2223_v34  ;;  %v2228_v23 = vpack.c.bf16 %v2226_v37, %v2225_v55 }
 0xaf1   :  { %v2441_v9 = vmax.f32 %v2440_v40, 1e-06 }
 0xaf2   :  { %2953 = vtanh.bf16 %v2227_v41 }
 0xaf3   :  { %2955 = vtanh.bf16 %v2228_v23  ;;  %v3586_v39 = vmin.f32 %v2441_v9, 0.999999 }
 0xaf5   :  { %v2444_v12 = vmul.f32 %v3586_v39, %v3586_v39  ;;  %v2452_v48 = vmul.f32 2.0, %v3586_v39 }
 0xafd   :  { %v2954_v42 = vpop.eup %2953 }
 0xafe   :  { %2772 = vmatprep.subr.bf16.mxu0 %v2954_v42  ;;  %v2956_v52 = vpop.eup %2955 }
 0xaff   :  { %2773 = vmatpush3.bf16.msra.mxu0 %v2954_v42 }
 0xb00   :  { %2774 = vmatprep.subr.bf16.mxu0 %v2956_v52 }
 0xb03   :  { %2775 = vmatpush3.bf16.msra.mxu0 %v2956_v52 }
 0xb06   :  { %2777 = vmatmul.mubr.msk.bf16.vlgmr.msra.gmra.mrb[12].mxu0 %vm378_vm6, %v2857_v45 }
 0xbd9   :  { %v2778_v50 = vpop.f32.mrb[12].mxu0 }
 0xbda   :  { %v2311_v53 = vpop.f32.mrb[13].mxu0  ;;  %v2320_v58 = vadd.f32 %v2778_v50, %v2254_v56 }
 0xbdb   :  { %v2779_v57 = vpop.f32.mrb[14].mxu0  ;;  %v2312_v61 = vadd.f32 %v2311_v53, %v2244_v47 }
 0xbdc   :  { %v2323_v59 = vadd.f32 %v2779_v57, %v2259_v10  ;;  %v2314_v60 = vpop.f32.mrb[15].mxu0 }
 0xbdd   :  { %v2315_v62 = vadd.f32 %v2314_v60, %v2249_v6 }
 0xbde   :  { %v2327_v63 = vpack.c.bf16 %v2323_v59, %v2320_v58 }
 0xbdf   :  { %v2326_v44 = vpack.c.bf16 %v2315_v62, %v2312_v61 }
 0xbe1   :  { %2957 = vtanh.bf16 %v2326_v44 }
 0xbe2   :  { %2959 = vtanh.bf16 %v2327_v63 }
 0xbec   :  { %v2958_v24 = vpop.eup %2957 }
 0xbed   :  { %2781 = vmatpush3.bf16.msra.mxu1 %v2958_v24  ;;  %v2960_v1 = vpop.eup %2959 }
 0xbee   :  { %2782 = vmatprep.subr.bf16.mxu1 %v2987_v46  ;;  %v3589_v46 = vsub.f32 1.0, %v3586_v39  ;;  %v2543_v39 = vand.u32 1, %v3185_v33 }
 0xbf0   :  { %v2445_v14 = vmul.f32 %v3589_v46, %v3589_v46  ;;  %vm2546_vm14 = vcmp.eq.s32.totalorder %v2543_v39, 1 }
 0xbf1   :  { %2783 = vmatpush3.bf16.msra.mxu1 %v2960_v1  ;;  %vm2547_vm15 = vmand %vm2546_vm14, %vm34_vm3 }
 0xbf2   :  { %v2446_v15 = vadd.f32 %v2445_v14, %v2444_v12 }
 0xbf4   :  { %2785 = vmatmul.mubr.msk.bf16.vlgmr.msra.gmra.mrb[12].mxu1 %vm378_vm6, %v2858_v26  ;;  %2961 = vrcp.f32 %v2446_v15  ;;  %vm2544_vm6 = vcmp.eq.s32.totalorder %v2543_v39, 0 }
 0xbf5   :  { %vm2545_vm13 = vmand %vm2544_vm6, %vm34_vm3 }
 0xbfe   :  { %v2962_v18 = vpop.eup %2961 }
 0xbff   :  { %v2448_v22 = vmul.f32 %v2962_v18, %v2446_v15 }
 0xc01   :  { %v2449_v5 = vsub.f32 2.0, %v2448_v22 }
 0xc03   :  { %v3595_v32 = vmul.f32 %v2962_v18, %v2449_v5 }
 0xc05   :  { %v2451_v51 = vmul.f32 %v3595_v32, %v2444_v12  ;;  %v2529_v12 = vadd.f32 3.1415927, %v2528_v31 }
 0xc07   :  { %v2694_v41 = vadd.f32 -0.5, %v2451_v51  ;;  %v2530_v18 = vmul.f32 0.15915494, %v2529_v12 }
 0xc09   :  { %v2461_v52 = vrot.slane %v2694_v41, %v3147_v3 }
 0xcc7   :  { %v2388_v13 = vpop.f32.mrb[12].mxu1 }
 0xcc8   :  { %v2389_v21 = vadd.f32 %v2388_v13, %v2339_v11  ;;  %v2786_v19 = vpop.f32.mrb[13].mxu1 }
 0xcc9   :  { %v2391_v20 = vpop.f32.mrb[14].mxu1  ;;  %v2531_v19 = vfloor.f32 %v2530_v18 }
 0xcca   :  { %v2692_v25 = vclamps-f32 %v2389_v21, 8.0  ;;  %v2392_v54 = vadd.f32 %v2391_v20, %v2344_v8  ;;  %v2787_v27 = vpop.f32.mrb[15].mxu1  ;;  %v2465_v53 = vrot.slane %v2389_v21, 4 }
 0xccc   :  { %v2397_v0 = vmul.f32 1.442695, %v2692_v25  ;;  %v2400_v28 = vrot.slane %v2392_v54, 1  ;;  %v2403_v30 = vrot.slane %v2392_v54, 2  ;;  %v2406_v43 = vrot.slane %v2392_v54, 3 }
 0xcce   :  { %2963 = vpow2.f32 %v2397_v0  ;;  %v2402_v4 = vmax.f32 %v2392_v54, %v2400_v28  ;;  %v2532_v0 = vmul.f32 6.2831855, %v2531_v19 }
 0xcd0   :  { %v2405_v35 = vmax.f32 %v2402_v4, %v2403_v30 }
 0xcd2   :  { %v2408_v34 = vmax.f32 %v2405_v35, %v2406_v43  ;;  %v2533_v43 = vsub.f32 %v2529_v12, %v2532_v0 }
 0xcd4   :  { %v2412_v36 = vrot.slane %v2408_v34, %v3147_v3  ;;  %v2695_v41 = vadd.f32 -3.1415927, %v2533_v43 }
 0xcd6   :  { %v2413_v37 = vsub.f32 %v2392_v54, %v2412_v36 }
 0xcd8   :  { %v2964_v38 = vpop.eup %2963  ;;  %v2414_v55 = vmul.f32 1.442695, %v2413_v37 }
 0xcd9   :  { %v2472_v23 = vmul.f32 0.5, %v2964_v38  ;;  %v2463_v10 = vmul.f32 %v2964_v38, %v2461_v52 }
 0xcda   :  { %2965 = vpow2.f32 %v2414_v55 }
 0xcdb   :  { %v2474_v42 = vrot.slane %v2472_v23, 4  ;;  %v2467_v57 = vadd.f32 %v2465_v53, %v2463_v10 }
 0xcdd   :  { %v2476_v45 = vsub.f32 %v2389_v21, %v2474_v42  ;;  %v2481_v6 = vadd.f32 %v2474_v42, %v2389_v21  ;;  %v2468_v61 = vmul.f32 0.5, %v2467_v57 }
 0xcdf   :  { %v2477_v47 = vmul.f32 0.5, %v2476_v45  ;;  %v2482_v50 = vmul.f32 0.5, %v2481_v6 }
 0xce1   :  { %2967 = vtanh.f32 %v2477_v47 }
 0xce2   :  { %2969 = vtanh.f32 %v2482_v50  ;;  %v2535_v50 = vmul.f32 0.5, %v2695_v41 }
 0xce3   :  { %2971 = vtanh.f32 %v2468_v61 }
 0xce4   :  { %v2966_v56 = vpop.eup %2965 }
 0xce5   :  { %v2417_v58 = vrot.slane %v2966_v56, 1  ;;  %v2420_v60 = vrot.slane %v2966_v56, 2  ;;  %v2423_v63 = vrot.slane %v2966_v56, 3 }
 0xce7   :  { %v2419_v59 = vadd.f32 %v2966_v56, %v2417_v58 }
 0xce9   :  { %v2422_v62 = vadd.f32 %v2420_v60, %v2419_v59  ;;  %v2536_v60 = vadd.f32 %v2535_v50, %v3480_v2 }
 0xceb   :  { %v2968_v44 = vpop.eup %2967  ;;  %v2425_v24 = vadd.f32 %v2423_v63, %v2422_v62 }
 0xcec   :  { %v2970_v1 = vpop.eup %2969  ;;  %v2479_v26 = vadd.f32 1.0, %v2968_v44 }
 0xced   :  { %v2484_v17 = vadd.f32 1.0, %v2970_v1  ;;  %2973 = vrcp.f32 %v2425_v24  ;;  %v2972_v9 = vpop.eup %2971 }
 0xcee   :  { %v2480_v7 = vmul.f32 0.5, %v2479_v26  ;;  %v2470_v15 = vadd.f32 1.0, %v2972_v9 }
 0xcef   :  { %v2485_v29 = vmul.f32 0.5, %v2484_v17 }
 0xcf0   :  { %v2471_v13 = vmul.f32 0.5, %v2470_v15  ;;  %v2493_v25 = vrot.slane %v2480_v7, 4 }
 0xcf1   :  { %v2486_v49 = vsub.f32 %v2485_v29, %v2480_v7 }
 0xcf2   :  { %v2500_v54 = vmul.f32 %v2964_v38, %v2471_v13  ;;  %v2501_v27 = vsub.f32 1.0, %v2471_v13  ;;  %v2495_v4 = vsub.f32 %v2471_v13, %v2493_v25 }
 0xcf3   :  { %v2487_v40 = vmax.f32 %v2486_v49, 1e-12 }
 0xcf4   :  { %v2502_v35 = vmul.f32 %v2501_v27, %v2500_v54 }
 0xcf5   :  { %2975 = vrcp.f32 %v2487_v40 }
 0xcf7   :  { %v2974_v14 = vpop.eup %2973 }
 0xcf8   :  { %v2430_v11 = vrot.slane %v2974_v14, %v3147_v3  ;;  %v2453_v3 = vmul.f32 %v2452_v48, %v3589_v46 }
 0xcfa   :  { %v2431_v22 = vmul.f32 %v2966_v56, %v2430_v11  ;;  %v2454_v38 = vmul.f32 %v2453_v3, %v3595_v32 }
 0xcfc   :  { %v2432_v5 = vmul.f32 0.96, %v2431_v22  ;;  %v2455_v10 = vmul.f32 %v2454_v38, %v3595_v32 }
 0xcfe   :  { %v2433_v51 = vadd.f32 0.01, %v2432_v5 }
 0xcff   :  { %v2976_v21 = vpop.eup %2975 }
 0xd00   :  { %v2489_v8 = vmul.f32 %v2976_v21, %v2487_v40 }
 0xd02   :  { %v2490_v20 = vsub.f32 2.0, %v2489_v8 }
 0xd04   :  { %v2491_v28 = vmul.f32 %v2976_v21, %v2490_v20 }
 0xd06   :  { %v2497_v30 = vrot.slane %v2491_v28, 4 }
 0xd08   :  { %v2499_v34 = vmul.f32 %v2497_v30, %v2495_v4  ;;  %v2503_v36 = vmul.f32 %v2502_v35, %v2497_v30 }
 0xd0a   :  { %v2504_v37 = vmul.f32 %v2499_v34, %v2433_v51  ;;  %v2515_v55 = vmul.f32 %v2503_v36, %v2433_v51 }
 0xd0c   :  { %v2506_v23 = vrot.slane %v2504_v37, 1  ;;  %v2517_v42 = vrot.slane %v2515_v55, 1  ;;  %v2509_v45 = vrot.slane %v2504_v37, 2  ;;  %v2520_v47 = vrot.slane %v2515_v55, 2 }
 0xd0d   :  { %v2512_v53 = vrot.slane %v2504_v37, 3  ;;  %v2523_v57 = vrot.slane %v2515_v55, 3 }
 0xd0e   :  { %v2508_v52 = vadd.f32 %v2506_v23, %v2504_v37  ;;  %v2519_v6 = vadd.f32 %v2517_v42, %v2515_v55 }
 0xd10   :  { %v2511_v46 = vadd.f32 %v2509_v45, %v2508_v52  ;;  %v2522_v56 = vadd.f32 %v2520_v47, %v2519_v6 }
 0xd12   :  { %v2514_v58 = vadd.f32 %v2512_v53, %v2511_v46  ;;  %v2525_v59 = vadd.f32 %v2523_v57, %v2522_v56 }
 0xd14   :  { %v2537_v61 = vmul.f32 6.2831855, %v2514_v58  ;;  %v2526_v62 = vmul.f32 %v2525_v59, %v2455_v10 }
 0xd16   :  { %v2538_v63 = vadd.f32 %v2537_v61, %v2536_v60  ;;  %v2527_v44 = vmax.f32 %v2526_v62, 1e-20 }
 0xd18   :  { %v2539_v24 = vmul.f32 0.15915494, %v2538_v63  ;;  %v2548_v1 = vsel %vm2545_vm13, %v2527_v44, 1.0 }
 0xd19   :  { %2977 = vlog2.f32 %v2548_v1 }
 0xd1a   :  { %v2540_v32 = vfloor.f32 %v2539_v24 }
 0xd1c   :  { %v2541_v26 = vmul.f32 6.2831855, %v2540_v32 }
 0xd1e   :  { %v2542_v17 = vsub.f32 %v2538_v63, %v2541_v26 }
 0xd20   :  { %2552 = vrot.lane.b32.xlu1 %v2542_v17, %s2997_s1 }
 0xd23   :  { %v2978_v7 = vpop.eup %2977 }
 0xd24   :  { %v2550_v29 = vmul.f32 0.6931472, %v2978_v7 }
 0xd26   :  { %v2551_v49 = vadd.f32 %v2550_v29, %v3475_v16 }
 0xd28   :  { %2556 = vst [vmem:[%s3629_s9] sm:$0x1] %v2551_v49 }
 0xd92   :  { %v2553_v31 = vpop.permute.xlu1 %2552 }
 0xd93   :  { %v2554_v40 = vsel %vm2547_vm15, %v2553_v31, %v3480_v2 }
 0xd94   :  { %2555 = vst [vmem:[%s3630_s8] sm:$0x1] %v2554_v40 }

</bundles_post_ra>
